<compile_context>
chip_gen: v7x
topology: tpu7x:2x2x1
jax: 0.10.0
libtpu: 0.0.40
codegen_flags: <defaults>
</compile_context>

<pallas_src>
import jax
import jax.numpy as jnp
from jax import lax
from jax.experimental import pallas as pl
from jax.experimental.pallas import tpu as pltpu

SOS_TOKEN = 1
MAX_SEQUENCE_LENGTH = 8
_NEG_INF = -1e30   # bias for padded vocab columns: exp() underflows to 0, never argmax


def _round_up(x, m):
    return ((x + m - 1) // m) * m


def _decoder_kernel(emb_wi_ref, wh_ref, bh_ref, wout_ref, bout_ref, h0_ref,
                    logp_ref, hfin_ref):
    BB, T, Vp = logp_ref.shape
    Hp = h0_ref.shape[1]
    f32, bf16 = jnp.float32, jnp.bfloat16

    # Column-index iota reused for one-hot construction and lowest-index argmax.
    col = lax.broadcasted_iota(jnp.int32, (BB, Vp), 1)

    # decoder_hidden = encoder_hidden ; decoder_input = SOS_TOKEN (all rows).
    # Both carried as loop-local values (vreg-resident), never through VMEM scratch.
    h = h0_ref[...]                                       # (BB, Hp) f32
    onehot = (col == SOS_TOKEN).astype(f32)               # (BB, Vp) exact 0/1

    # Fully-unrolled, strictly serial greedy decode.  Weight refs are read at the
    # call sites inside the loop (no hoisting over the unrolled body).
    for t in range(T):
        # Input path: one matmul against the prefused (emb @ W_i + b_i) table.
        # onehot is exact 0/1 and the table is f32, so this is an exact row select.
        gi = jnp.dot(onehot, emb_wi_ref[...], preferred_element_type=f32)   # (BB,3Hp)

        # Hidden path: fused (BB,Hp)@(Hp,3Hp) bf16 matmul, f32 accumulation.
        gh = jnp.dot(h.astype(bf16), wh_ref[...],
                     preferred_element_type=f32) + bh_ref[...]              # (BB,3Hp)

        # PyTorch GRU cell — all elementwise math in f32 (v5e has no bf16 VPU/EUP).
        # Gate g lives in lane-aligned columns [g*Hp, g*Hp + Hp).
        r = jax.nn.sigmoid(gi[:, :Hp] + gh[:, :Hp])
        z = jax.nn.sigmoid(gi[:, Hp:2 * Hp] + gh[:, Hp:2 * Hp])
        n = jnp.tanh(gi[:, 2 * Hp:] + r * gh[:, 2 * Hp:])
        h = (1.0 - z) * n + z * h

        # Output projection (nn.Linear); padded vocab columns get -1e30 via the bias.
        logits = jnp.dot(h.astype(bf16), wout_ref[...],
                         preferred_element_type=f32) + bout_ref[...]        # (BB,Vp)

        # log_softmax over the vocab (padded columns contribute exp(...) == 0).
        m = jnp.max(logits, axis=-1, keepdims=True)
        lse = m + jnp.log(jnp.sum(jnp.exp(logits - m), axis=-1, keepdims=True))
        logp_ref[:, t, :] = logits - lse                  # lane-dense (BB,Vp) store

        # Greedy feedback: lowest index among exact ties (same rule as torch.topk).
        # NOTE: if logits contained NaN no column would match and the one-hot would be
        # all-zero; inputs here are finite so this path is not reachable.
        idx = jnp.min(jnp.where(logits == m, col, Vp), axis=-1, keepdims=True)
        onehot = (col == idx).astype(f32)

    # Final hidden state: single store, only the last value is ever read back.
    hfin_ref[...] = h


def _fuse_and_pad_params(params, H, V, Hp, Vp):
    """Fuse per-gate GRU weights, zero-pad to (Hp, Vp) tiles, prefuse emb into W_i.

    Gate g (0=r, 1=z, 2=n) occupies fused columns [g*Hp, g*Hp + H).  Padded rows /
    columns are zero so padded hidden dims stay exactly 0 through the recurrence.
    Padded vocab columns of the output bias are -1e30 so they never win max/argmax and
    add exactly 0 to the logsumexp.  emb_wi = emb_bf16 @ Wi_bf16 (+ b_i), accumulated
    and stored in f32, so the in-kernel one-hot select reproduces the per-step
    bf16-matmul result exactly.
    """
    f32, bf16 = jnp.float32, jnp.bfloat16
    wi = jnp.zeros((Hp, 3 * Hp), f32)
    wh = jnp.zeros((Hp, 3 * Hp), f32)
    bi = jnp.zeros((1, 3 * Hp), f32)
    bh = jnp.zeros((1, 3 * Hp), f32)
    for g, (wi_name, wh_name) in enumerate((("wir", "whr"), ("wiz", "whz"),
                                            ("win", "whn"))):
        wi = wi.at[:H, g * Hp:g * Hp + H].set(params[wi_name])
        wh = wh.at[:H, g * Hp:g * Hp + H].set(params[wh_name])
        bi = bi.at[0, g * Hp:g * Hp + H].set(params["bih"][g])
        bh = bh.at[0, g * Hp:g * Hp + H].set(params["bhh"][g])
    emb = jnp.zeros((Vp, Hp), f32).at[:V, :H].set(params["emb"])
    wout = jnp.zeros((Hp, Vp), f32).at[:H, :V].set(params["wout"])
    bout = jnp.full((1, Vp), _NEG_INF, f32).at[0, :V].set(params["bout"][0])

    emb_wi = jnp.dot(emb.astype(bf16), wi.astype(bf16),
                     preferred_element_type=f32) + bi          # (Vp, 3Hp) f32
    return emb_wi, wh.astype(bf16), bh, wout.astype(bf16), bout


def decoder_forward(params, encoder_outputs, encoder_hidden,
                    max_len=MAX_SEQUENCE_LENGTH):
    """Greedy decode. Returns (log_probs (B,T,V), hidden (1,B,H), attentions=[])."""
    B = encoder_outputs.shape[0]            # encoder_outputs only supplies batch size
    H = encoder_hidden.shape[-1]
    V = params["emb"].shape[0]
    T = max_len

    Hp = _round_up(H, 128)                  # lane-aligned hidden / gate slices
    Vp = _round_up(V, 128)                  # lane-dense vocab dim and logp stores
    BB = min(_round_up(B, 8), 128)          # batch tile: sublane-aligned, fills MXU rows
    Bp = _round_up(B, BB)
    nb = Bp // BB

    emb_wi, wh, bh, wout, bout = _fuse_and_pad_params(params, H, V, Hp, Vp)
    h0 = jnp.zeros((Bp, Hp), jnp.float32)
    h0 = h0.at[:B, :H].set(encoder_hidden[0].astype(jnp.float32))

    const = lambda b: (0, 0)
    in_specs = [
        pl.BlockSpec((Vp, 3 * Hp), const),          # prefused emb@Wi + bi   (f32)
        pl.BlockSpec((Hp, 3 * Hp), const),          # fused W_hidden         (bf16)
        pl.BlockSpec((1, 3 * Hp), const),           # fused b_hidden         (f32)
        pl.BlockSpec((Hp, Vp), const),              # output projection      (bf16)
        pl.BlockSpec((1, Vp), const),               # output bias (pads = -1e30, f32)
        pl.BlockSpec((BB, Hp), lambda b: (b, 0)),   # initial hidden, batch tile
    ]
    out_specs = [
        pl.BlockSpec((BB, T, Vp), lambda b: (b, 0, 0)),   # log-probs, (B,T,V) layout
        pl.BlockSpec((BB, Hp), lambda b: (b, 0)),         # final hidden
    ]

    logp_pad, h_fin_pad = pl.pallas_call(
        _decoder_kernel,
        grid=(nb,),
        in_specs=in_specs,
        out_specs=out_specs,
        out_shape=[
            jax.ShapeDtypeStruct((Bp, T, Vp), jnp.float32),
            jax.ShapeDtypeStruct((Bp, Hp), jnp.float32),
        ],
        compiler_params=pltpu.CompilerParams(
            dimension_semantics=("parallel",),      # batch tiles shard across TCs
            vmem_limit_bytes=64 * 1024 * 1024),
    )(emb_wi, wh, bh, wout, bout, h0)

    decoder_outputs = logp_pad[:B, :, :V]                             # (B, T, V)
    decoder_hidden = h_fin_pad[:B, :H][None, :, :]                    # (1, B, H)
    attentions = []                                                   # use_attention=False
    return decoder_outputs, decoder_hidden, attentions


def decoder_forward_ref(params, encoder_outputs, encoder_hidden,
                        max_len=MAX_SEQUENCE_LENGTH):
    """Pure-JAX greedy reference mirroring the kernel math (bf16 weights, f32 accum)."""
    B = encoder_outputs.shape[0]
    bf16, f32 = jnp.bfloat16, jnp.float32
    emb = params["emb"].astype(bf16)
    wir, wiz, win = (params[k].astype(bf16) for k in ("wir", "wiz", "win"))
    whr, whz, whn = (params[k].astype(bf16) for k in ("whr", "whz", "whn"))
    wout = params["wout"].astype(bf16)
    bih, bhh, bout = params["bih"], params["bhh"], params["bout"]
    dot = lambda a, b: jnp.dot(a, b, preferred_element_type=f32)

    h = encoder_hidden[0].astype(f32)
    tok = jnp.full((B,), SOS_TOKEN, jnp.int32)
    outs = []
    for _ in range(max_len):
        x = emb[tok]                                    # (B, H) bf16
        hb = h.astype(bf16)
        gir = dot(x, wir) + bih[0]
        giz = dot(x, wiz) + bih[1]
        gin = dot(x, win) + bih[2]
        ghr = dot(hb, whr) + bhh[0]
        ghz = dot(hb, whz) + bhh[1]
        ghn = dot(hb, whn) + bhh[2]
        r = jax.nn.sigmoid(gir + ghr)
        z = jax.nn.sigmoid(giz + ghz)
        n = jnp.tanh(gin + r * ghn)
        h = (1.0 - z) * n + z * h
        logits = dot(h.astype(bf16), wout) + bout[0]    # (B, V)
        outs.append(logits)
        tok = jnp.argmax(logits, axis=-1).astype(jnp.int32)
    logits_all = jnp.stack(outs, axis=1)                # (B, T, V)
    logp = jax.nn.log_softmax(logits_all, axis=-1)
    return logp, h[None, :, :], []


def init_params(key, output_size, hidden_size):
    """Deterministic synthetic init matching PyTorch shapes/distributions."""
    H, V = hidden_size, output_size
    k = jax.random.split(key, 12)
    s = 1.0 / jnp.sqrt(H)
    u = lambda kk, shape: jax.random.uniform(kk, shape, jnp.float32, -s, s)
    return {
        "emb":  jax.random.normal(k[0], (V, H), jnp.float32),   # nn.Embedding ~ N(0,1)
        "wir":  u(k[1], (H, H)), "wiz": u(k[2], (H, H)), "win": u(k[3], (H, H)),
        "whr":  u(k[4], (H, H)), "whz": u(k[5], (H, H)), "whn": u(k[6], (H, H)),
        "bih":  u(k[7], (3, H)), "bhh": u(k[8], (3, H)),
        "wout": u(k[9], (H, V)), "bout": u(k[10], (1, V)),
    }


if __name__ == "__main__":
    B, S, H, V = 2, 8, 32, 16   # batch, encoder seq, hidden_size, output_size

    key = jax.random.PRNGKey(0)
    kp, ke, kh = jax.random.split(key, 3)
    params = init_params(kp, output_size=V, hidden_size=H)
    encoder_outputs = jax.random.normal(ke, (B, S, H), jnp.float32)
    encoder_hidden = jax.random.normal(kh, (1, B, H), jnp.float32)

    logp, hidden, attn = decoder_forward(params, encoder_outputs, encoder_hidden)
    jax.block_until_ready(logp)
    jax.block_until_ready(hidden)

    logp_ref, hidden_ref, _ = decoder_forward_ref(params, encoder_outputs,
                                                  encoder_hidden)
    assert logp.shape == (B, MAX_SEQUENCE_LENGTH, V)
    assert hidden.shape == (1, B, H)
    # Greedy token trajectories must match exactly (robust tie/divergence check).
    assert bool(jnp.all(jnp.argmax(logp, -1) == jnp.argmax(logp_ref, -1))), "token mismatch"
    assert jnp.allclose(logp, logp_ref, atol=2e-3, rtol=2e-3), "log-prob mismatch"
    assert jnp.allclose(hidden, hidden_ref, atol=2e-3, rtol=2e-3), "hidden mismatch"

    print("KERNEL_OK")
</pallas_src>

<mosaic_0001>
module attributes {stable_mosaic.version = 11 : i64} {
  func.func @_decoder_kernel(%arg0: i32, %arg1: memref<128x384xf32, #tpu.memory_space<vmem>>, %arg2: memref<128x384xbf16, #tpu.memory_space<vmem>>, %arg3: memref<1x384xf32, #tpu.memory_space<vmem>>, %arg4: memref<128x128xbf16, #tpu.memory_space<vmem>>, %arg5: memref<1x128xf32, #tpu.memory_space<vmem>>, %arg6: memref<8x128xf32, #tpu.memory_space<vmem>>, %arg7: memref<8x8x128xf32, #tpu.memory_space<vmem>>, %arg8: memref<8x128xf32, #tpu.memory_space<vmem>>) attributes {dimension_semantics = [#tpu.dimension_semantics<parallel>], iteration_bounds = array<i64: 1>, scalar_prefetch = 0 : i64, scratch_operands = 0 : i64, tpu.core_type = #tpu.core_type<tc>, window_params = [{pipeline_mode = #tpu.pipeline_mode<synchronous>, transform_indices = @transform_0, window_bounds = array<i64: 128, 384>}, {pipeline_mode = #tpu.pipeline_mode<synchronous>, transform_indices = @transform_1, window_bounds = array<i64: 128, 384>}, {pipeline_mode = #tpu.pipeline_mode<synchronous>, transform_indices = @transform_2, window_bounds = array<i64: 1, 384>}, {pipeline_mode = #tpu.pipeline_mode<synchronous>, transform_indices = @transform_3, window_bounds = array<i64: 128, 128>}, {pipeline_mode = #tpu.pipeline_mode<synchronous>, transform_indices = @transform_4, window_bounds = array<i64: 1, 128>}, {transform_indices = @transform_5, window_bounds = array<i64: 8, 128>}, {transform_indices = @transform_6, window_bounds = array<i64: 8, 8, 128>}, {transform_indices = @transform_7, window_bounds = array<i64: 8, 128>}]} {
    %0 = tpu.iota {dimensions = array<i32: 1>} : vector<8x128xi32>
    %c0 = arith.constant 0 : index
    %c0_0 = arith.constant 0 : index
    %1 = vector.load %arg6[%c0, %c0_0] : memref<8x128xf32, #tpu.memory_space<vmem>>, vector<8x128xf32>
    %c1_i32 = arith.constant 1 : i32
    %2 = vector.broadcast %c1_i32 : i32 to vector<8x128xi32>
    %3 = arith.cmpi eq, %0, %2 : vector<8x128xi32>
    %4 = arith.extui %3 : vector<8x128xi1> to vector<8x128xi32>
    %5 = arith.sitofp %4 : vector<8x128xi32> to vector<8x128xf32>
    %c0_1 = arith.constant 0 : index
    %c0_2 = arith.constant 0 : index
    %6 = vector.load %arg1[%c0_1, %c0_2] : memref<128x384xf32, #tpu.memory_space<vmem>>, vector<128x384xf32>
    %cst = arith.constant dense<0.000000e+00> : vector<8x384xf32>
    %7 = tpu.matmul %5, %6, %cst {dimension_numbers = #tpu.dot_dimension_numbers<[1], [0], [0], [1], [0, 0, 1, 1], [], []>} : vector<8x128xf32>, vector<128x384xf32>, vector<8x384xf32> -> vector<8x384xf32>
    %8 = arith.truncf %1 : vector<8x128xf32> to vector<8x128xbf16>
    %c0_3 = arith.constant 0 : index
    %c0_4 = arith.constant 0 : index
    %9 = vector.load %arg2[%c0_3, %c0_4] : memref<128x384xbf16, #tpu.memory_space<vmem>>, vector<128x384xbf16>
    %cst_5 = arith.constant dense<0.000000e+00> : vector<8x384xf32>
    %10 = tpu.matmul %8, %9, %cst_5 {dimension_numbers = #tpu.dot_dimension_numbers<[1], [0], [0], [1], [0, 0, 1, 1], [], []>} : vector<8x128xbf16>, vector<128x384xbf16>, vector<8x384xf32> -> vector<8x384xf32>
    %c0_6 = arith.constant 0 : index
    %c0_7 = arith.constant 0 : index
    %11 = vector.load %arg3[%c0_6, %c0_7] : memref<1x384xf32, #tpu.memory_space<vmem>>, vector<1x384xf32>
    %12 = vector.broadcast %11 : vector<1x384xf32> to vector<8x384xf32>
    %13 = arith.addf %10, %12 : vector<8x384xf32>
    %14 = vector.extract_strided_slice %7 {offsets = [0, 0], sizes = [8, 128], strides = [1, 1]} : vector<8x384xf32> to vector<8x128xf32>
    %15 = vector.extract_strided_slice %13 {offsets = [0, 0], sizes = [8, 128], strides = [1, 1]} : vector<8x384xf32> to vector<8x128xf32>
    %16 = arith.addf %14, %15 : vector<8x128xf32>
    %17 = arith.negf %16 : vector<8x128xf32>
    %18 = math.exp %17 : vector<8x128xf32>
    %cst_8 = arith.constant 1.000000e+00 : f32
    %19 = vector.broadcast %cst_8 : f32 to vector<8x128xf32>
    %20 = arith.addf %19, %18 : vector<8x128xf32>
    %21 = arith.divf %19, %20 : vector<8x128xf32>
    %22 = vector.extract_strided_slice %7 {offsets = [0, 128], sizes = [8, 128], strides = [1, 1]} : vector<8x384xf32> to vector<8x128xf32>
    %23 = vector.extract_strided_slice %13 {offsets = [0, 128], sizes = [8, 128], strides = [1, 1]} : vector<8x384xf32> to vector<8x128xf32>
    %24 = arith.addf %22, %23 : vector<8x128xf32>
    %25 = arith.negf %24 : vector<8x128xf32>
    %26 = math.exp %25 : vector<8x128xf32>
    %cst_9 = arith.constant 1.000000e+00 : f32
    %27 = vector.broadcast %cst_9 : f32 to vector<8x128xf32>
    %28 = arith.addf %27, %26 : vector<8x128xf32>
    %29 = arith.divf %27, %28 : vector<8x128xf32>
    %30 = vector.extract_strided_slice %7 {offsets = [0, 256], sizes = [8, 128], strides = [1, 1]} : vector<8x384xf32> to vector<8x128xf32>
    %31 = vector.extract_strided_slice %13 {offsets = [0, 256], sizes = [8, 128], strides = [1, 1]} : vector<8x384xf32> to vector<8x128xf32>
    %32 = arith.mulf %21, %31 : vector<8x128xf32>
    %33 = arith.addf %30, %32 : vector<8x128xf32>
    %34 = math.tanh %33 : vector<8x128xf32>
    %cst_10 = arith.constant 1.000000e+00 : f32
    %35 = vector.broadcast %cst_10 : f32 to vector<8x128xf32>
    %36 = arith.subf %35, %29 : vector<8x128xf32>
    %37 = arith.mulf %36, %34 : vector<8x128xf32>
    %38 = arith.mulf %29, %1 : vector<8x128xf32>
    %39 = arith.addf %37, %38 : vector<8x128xf32>
    %40 = arith.truncf %39 : vector<8x128xf32> to vector<8x128xbf16>
    %c0_11 = arith.constant 0 : index
    %c0_12 = arith.constant 0 : index
    %41 = vector.load %arg4[%c0_11, %c0_12] : memref<128x128xbf16, #tpu.memory_space<vmem>>, vector<128x128xbf16>
    %cst_13 = arith.constant dense<0.000000e+00> : vector<8x128xf32>
    %42 = tpu.matmul %40, %41, %cst_13 {dimension_numbers = #tpu.dot_dimension_numbers<[1], [0], [0], [1], [0, 0, 1, 1], [], []>} : vector<8x128xbf16>, vector<128x128xbf16>, vector<8x128xf32> -> vector<8x128xf32>
    %c0_14 = arith.constant 0 : index
    %c0_15 = arith.constant 0 : index
    %43 = vector.load %arg5[%c0_14, %c0_15] : memref<1x128xf32, #tpu.memory_space<vmem>>, vector<1x128xf32>
    %44 = vector.broadcast %43 : vector<1x128xf32> to vector<8x128xf32>
    %45 = arith.addf %42, %44 : vector<8x128xf32>
    %cst_16 = arith.constant dense<0xFF800000> : vector<8xf32>
    %46 = vector.multi_reduction <maximumf>, %45, %cst_16 [1] : vector<8x128xf32> to vector<8xf32>
    %47 = vector.shape_cast %46 : vector<8xf32> to vector<8x1xf32>
    %48 = vector.broadcast %47 : vector<8x1xf32> to vector<8x128xf32>
    %49 = arith.subf %45, %48 : vector<8x128xf32>
    %50 = math.exp %49 : vector<8x128xf32>
    %cst_17 = arith.constant dense<0.000000e+00> : vector<8xf32>
    %51 = vector.multi_reduction <add>, %50, %cst_17 [1] : vector<8x128xf32> to vector<8xf32>
    %52 = vector.shape_cast %51 : vector<8xf32> to vector<8x1xf32>
    %53 = math.log %52 : vector<8x1xf32>
    %54 = arith.addf %47, %53 : vector<8x1xf32>
    %55 = vector.broadcast %54 : vector<8x1xf32> to vector<8x128xf32>
    %56 = arith.subf %45, %55 : vector<8x128xf32>
    %c0_18 = arith.constant 0 : index
    %c0_19 = arith.constant 0 : index
    %c0_20 = arith.constant 0 : index
    %57 = vector.load %arg7[%c0_18, %c0_19, %c0_20] : memref<8x8x128xf32, #tpu.memory_space<vmem>>, vector<8x1x128xf32>
    %58 = vector.shape_cast %57 : vector<8x1x128xf32> to vector<8x128xf32>
    %59 = vector.shape_cast %56 : vector<8x128xf32> to vector<8x1x128xf32>
    tpu.vector_store %arg7[%c0_18, %c0_19, %c0_20], %59 {strides = array<i32>} : memref<8x8x128xf32, #tpu.memory_space<vmem>>, vector<8x1x128xf32>,
    %60 = vector.broadcast %47 : vector<8x1xf32> to vector<8x128xf32>
    %61 = arith.cmpf oeq, %45, %60 : vector<8x128xf32>
    %c128_i32 = arith.constant 128 : i32
    %62 = vector.broadcast %c128_i32 : i32 to vector<8x128xi32>
    %63 = arith.select %61, %0, %62 : vector<8x128xi1>, vector<8x128xi32>
    %cst_21 = arith.constant dense<2147483647> : vector<8xi32>
    %64 = vector.multi_reduction <minsi>, %63, %cst_21 [1] : vector<8x128xi32> to vector<8xi32>
    %65 = vector.shape_cast %64 : vector<8xi32> to vector<8x1xi32>
    %66 = vector.broadcast %65 : vector<8x1xi32> to vector<8x128xi32>
    %67 = arith.cmpi eq, %0, %66 : vector<8x128xi32>
    %68 = arith.extui %67 : vector<8x128xi1> to vector<8x128xi32>
    %69 = arith.sitofp %68 : vector<8x128xi32> to vector<8x128xf32>
    %c0_22 = arith.constant 0 : index
    %c0_23 = arith.constant 0 : index
    %70 = vector.load %arg1[%c0_22, %c0_23] : memref<128x384xf32, #tpu.memory_space<vmem>>, vector<128x384xf32>
    %cst_24 = arith.constant dense<0.000000e+00> : vector<8x384xf32>
    %71 = tpu.matmul %69, %70, %cst_24 {dimension_numbers = #tpu.dot_dimension_numbers<[1], [0], [0], [1], [0, 0, 1, 1], [], []>} : vector<8x128xf32>, vector<128x384xf32>, vector<8x384xf32> -> vector<8x384xf32>
    %72 = arith.truncf %39 : vector<8x128xf32> to vector<8x128xbf16>
    %c0_25 = arith.constant 0 : index
    %c0_26 = arith.constant 0 : index
    %73 = vector.load %arg2[%c0_25, %c0_26] : memref<128x384xbf16, #tpu.memory_space<vmem>>, vector<128x384xbf16>
    %cst_27 = arith.constant dense<0.000000e+00> : vector<8x384xf32>
    %74 = tpu.matmul %72, %73, %cst_27 {dimension_numbers = #tpu.dot_dimension_numbers<[1], [0], [0], [1], [0, 0, 1, 1], [], []>} : vector<8x128xbf16>, vector<128x384xbf16>, vector<8x384xf32> -> vector<8x384xf32>
    %c0_28 = arith.constant 0 : index
    %c0_29 = arith.constant 0 : index
    %75 = vector.load %arg3[%c0_28, %c0_29] : memref<1x384xf32, #tpu.memory_space<vmem>>, vector<1x384xf32>
    %76 = vector.broadcast %75 : vector<1x384xf32> to vector<8x384xf32>
    %77 = arith.addf %74, %76 : vector<8x384xf32>
    %78 = vector.extract_strided_slice %71 {offsets = [0, 0], sizes = [8, 128], strides = [1, 1]} : vector<8x384xf32> to vector<8x128xf32>
    %79 = vector.extract_strided_slice %77 {offsets = [0, 0], sizes = [8, 128], strides = [1, 1]} : vector<8x384xf32> to vector<8x128xf32>
    %80 = arith.addf %78, %79 : vector<8x128xf32>
    %81 = arith.negf %80 : vector<8x128xf32>
    %82 = math.exp %81 : vector<8x128xf32>
    %cst_30 = arith.constant 1.000000e+00 : f32
    %83 = vector.broadcast %cst_30 : f32 to vector<8x128xf32>
    %84 = arith.addf %83, %82 : vector<8x128xf32>
    %85 = arith.divf %83, %84 : vector<8x128xf32>
    %86 = vector.extract_strided_slice %71 {offsets = [0, 128], sizes = [8, 128], strides = [1, 1]} : vector<8x384xf32> to vector<8x128xf32>
    %87 = vector.extract_strided_slice %77 {offsets = [0, 128], sizes = [8, 128], strides = [1, 1]} : vector<8x384xf32> to vector<8x128xf32>
    %88 = arith.addf %86, %87 : vector<8x128xf32>
    %89 = arith.negf %88 : vector<8x128xf32>
    %90 = math.exp %89 : vector<8x128xf32>
    %cst_31 = arith.constant 1.000000e+00 : f32
    %91 = vector.broadcast %cst_31 : f32 to vector<8x128xf32>
    %92 = arith.addf %91, %90 : vector<8x128xf32>
    %93 = arith.divf %91, %92 : vector<8x128xf32>
    %94 = vector.extract_strided_slice %71 {offsets = [0, 256], sizes = [8, 128], strides = [1, 1]} : vector<8x384xf32> to vector<8x128xf32>
    %95 = vector.extract_strided_slice %77 {offsets = [0, 256], sizes = [8, 128], strides = [1, 1]} : vector<8x384xf32> to vector<8x128xf32>
    %96 = arith.mulf %85, %95 : vector<8x128xf32>
    %97 = arith.addf %94, %96 : vector<8x128xf32>
    %98 = math.tanh %97 : vector<8x128xf32>
    %cst_32 = arith.constant 1.000000e+00 : f32
    %99 = vector.broadcast %cst_32 : f32 to vector<8x128xf32>
    %100 = arith.subf %99, %93 : vector<8x128xf32>
    %101 = arith.mulf %100, %98 : vector<8x128xf32>
    %102 = arith.mulf %93, %39 : vector<8x128xf32>
    %103 = arith.addf %101, %102 : vector<8x128xf32>
    %104 = arith.truncf %103 : vector<8x128xf32> to vector<8x128xbf16>
    %c0_33 = arith.constant 0 : index
    %c0_34 = arith.constant 0 : index
    %105 = vector.load %arg4[%c0_33, %c0_34] : memref<128x128xbf16, #tpu.memory_space<vmem>>, vector<128x128xbf16>
    %cst_35 = arith.constant dense<0.000000e+00> : vector<8x128xf32>
    %106 = tpu.matmul %104, %105, %cst_35 {dimension_numbers = #tpu.dot_dimension_numbers<[1], [0], [0], [1], [0, 0, 1, 1], [], []>} : vector<8x128xbf16>, vector<128x128xbf16>, vector<8x128xf32> -> vector<8x128xf32>
    %c0_36 = arith.constant 0 : index
    %c0_37 = arith.constant 0 : index
    %107 = vector.load %arg5[%c0_36, %c0_37] : memref<1x128xf32, #tpu.memory_space<vmem>>, vector<1x128xf32>
    %108 = vector.broadcast %107 : vector<1x128xf32> to vector<8x128xf32>
    %109 = arith.addf %106, %108 : vector<8x128xf32>
    %cst_38 = arith.constant dense<0xFF800000> : vector<8xf32>
    %110 = vector.multi_reduction <maximumf>, %109, %cst_38 [1] : vector<8x128xf32> to vector<8xf32>
    %111 = vector.shape_cast %110 : vector<8xf32> to vector<8x1xf32>
    %112 = vector.broadcast %111 : vector<8x1xf32> to vector<8x128xf32>
    %113 = arith.subf %109, %112 : vector<8x128xf32>
    %114 = math.exp %113 : vector<8x128xf32>
    %cst_39 = arith.constant dense<0.000000e+00> : vector<8xf32>
    %115 = vector.multi_reduction <add>, %114, %cst_39 [1] : vector<8x128xf32> to vector<8xf32>
    %116 = vector.shape_cast %115 : vector<8xf32> to vector<8x1xf32>
    %117 = math.log %116 : vector<8x1xf32>
    %118 = arith.addf %111, %117 : vector<8x1xf32>
    %119 = vector.broadcast %118 : vector<8x1xf32> to vector<8x128xf32>
    %120 = arith.subf %109, %119 : vector<8x128xf32>
    %c0_40 = arith.constant 0 : index
    %c1 = arith.constant 1 : index
    %c0_41 = arith.constant 0 : index
    %121 = vector.load %arg7[%c0_40, %c1, %c0_41] : memref<8x8x128xf32, #tpu.memory_space<vmem>>, vector<8x1x128xf32>
    %122 = vector.shape_cast %121 : vector<8x1x128xf32> to vector<8x128xf32>
    %123 = vector.shape_cast %120 : vector<8x128xf32> to vector<8x1x128xf32>
    tpu.vector_store %arg7[%c0_40, %c1, %c0_41], %123 {strides = array<i32>} : memref<8x8x128xf32, #tpu.memory_space<vmem>>, vector<8x1x128xf32>,
    %124 = vector.broadcast %111 : vector<8x1xf32> to vector<8x128xf32>
    %125 = arith.cmpf oeq, %109, %124 : vector<8x128xf32>
    %c128_i32_42 = arith.constant 128 : i32
    %126 = vector.broadcast %c128_i32_42 : i32 to vector<8x128xi32>
    %127 = arith.select %125, %0, %126 : vector<8x128xi1>, vector<8x128xi32>
    %cst_43 = arith.constant dense<2147483647> : vector<8xi32>
    %128 = vector.multi_reduction <minsi>, %127, %cst_43 [1] : vector<8x128xi32> to vector<8xi32>
    %129 = vector.shape_cast %128 : vector<8xi32> to vector<8x1xi32>
    %130 = vector.broadcast %129 : vector<8x1xi32> to vector<8x128xi32>
    %131 = arith.cmpi eq, %0, %130 : vector<8x128xi32>
    %132 = arith.extui %131 : vector<8x128xi1> to vector<8x128xi32>
    %133 = arith.sitofp %132 : vector<8x128xi32> to vector<8x128xf32>
    %c0_44 = arith.constant 0 : index
    %c0_45 = arith.constant 0 : index
    %134 = vector.load %arg1[%c0_44, %c0_45] : memref<128x384xf32, #tpu.memory_space<vmem>>, vector<128x384xf32>
    %cst_46 = arith.constant dense<0.000000e+00> : vector<8x384xf32>
    %135 = tpu.matmul %133, %134, %cst_46 {dimension_numbers = #tpu.dot_dimension_numbers<[1], [0], [0], [1], [0, 0, 1, 1], [], []>} : vector<8x128xf32>, vector<128x384xf32>, vector<8x384xf32> -> vector<8x384xf32>
    %136 = arith.truncf %103 : vector<8x128xf32> to vector<8x128xbf16>
    %c0_47 = arith.constant 0 : index
    %c0_48 = arith.constant 0 : index
    %137 = vector.load %arg2[%c0_47, %c0_48] : memref<128x384xbf16, #tpu.memory_space<vmem>>, vector<128x384xbf16>
    %cst_49 = arith.constant dense<0.000000e+00> : vector<8x384xf32>
    %138 = tpu.matmul %136, %137, %cst_49 {dimension_numbers = #tpu.dot_dimension_numbers<[1], [0], [0], [1], [0, 0, 1, 1], [], []>} : vector<8x128xbf16>, vector<128x384xbf16>, vector<8x384xf32> -> vector<8x384xf32>
    %c0_50 = arith.constant 0 : index
    %c0_51 = arith.constant 0 : index
    %139 = vector.load %arg3[%c0_50, %c0_51] : memref<1x384xf32, #tpu.memory_space<vmem>>, vector<1x384xf32>
    %140 = vector.broadcast %139 : vector<1x384xf32> to vector<8x384xf32>
    %141 = arith.addf %138, %140 : vector<8x384xf32>
    %142 = vector.extract_strided_slice %135 {offsets = [0, 0], sizes = [8, 128], strides = [1, 1]} : vector<8x384xf32> to vector<8x128xf32>
    %143 = vector.extract_strided_slice %141 {offsets = [0, 0], sizes = [8, 128], strides = [1, 1]} : vector<8x384xf32> to vector<8x128xf32>
    %144 = arith.addf %142, %143 : vector<8x128xf32>
    %145 = arith.negf %144 : vector<8x128xf32>
    %146 = math.exp %145 : vector<8x128xf32>
    %cst_52 = arith.constant 1.000000e+00 : f32
    %147 = vector.broadcast %cst_52 : f32 to vector<8x128xf32>
    %148 = arith.addf %147, %146 : vector<8x128xf32>
    %149 = arith.divf %147, %148 : vector<8x128xf32>
    %150 = vector.extract_strided_slice %135 {offsets = [0, 128], sizes = [8, 128], strides = [1, 1]} : vector<8x384xf32> to vector<8x128xf32>
    %151 = vector.extract_strided_slice %141 {offsets = [0, 128], sizes = [8, 128], strides = [1, 1]} : vector<8x384xf32> to vector<8x128xf32>
    %152 = arith.addf %150, %151 : vector<8x128xf32>
    %153 = arith.negf %152 : vector<8x128xf32>
    %154 = math.exp %153 : vector<8x128xf32>
    %cst_53 = arith.constant 1.000000e+00 : f32
    %155 = vector.broadcast %cst_53 : f32 to vector<8x128xf32>
    %156 = arith.addf %155, %154 : vector<8x128xf32>
    %157 = arith.divf %155, %156 : vector<8x128xf32>
    %158 = vector.extract_strided_slice %135 {offsets = [0, 256], sizes = [8, 128], strides = [1, 1]} : vector<8x384xf32> to vector<8x128xf32>
    %159 = vector.extract_strided_slice %141 {offsets = [0, 256], sizes = [8, 128], strides = [1, 1]} : vector<8x384xf32> to vector<8x128xf32>
    %160 = arith.mulf %149, %159 : vector<8x128xf32>
    %161 = arith.addf %158, %160 : vector<8x128xf32>
    %162 = math.tanh %161 : vector<8x128xf32>
    %cst_54 = arith.constant 1.000000e+00 : f32
    %163 = vector.broadcast %cst_54 : f32 to vector<8x128xf32>
    %164 = arith.subf %163, %157 : vector<8x128xf32>
    %165 = arith.mulf %164, %162 : vector<8x128xf32>
    %166 = arith.mulf %157, %103 : vector<8x128xf32>
    %167 = arith.addf %165, %166 : vector<8x128xf32>
    %168 = arith.truncf %167 : vector<8x128xf32> to vector<8x128xbf16>
    %c0_55 = arith.constant 0 : index
    %c0_56 = arith.constant 0 : index
    %169 = vector.load %arg4[%c0_55, %c0_56] : memref<128x128xbf16, #tpu.memory_space<vmem>>, vector<128x128xbf16>
    %cst_57 = arith.constant dense<0.000000e+00> : vector<8x128xf32>
    %170 = tpu.matmul %168, %169, %cst_57 {dimension_numbers = #tpu.dot_dimension_numbers<[1], [0], [0], [1], [0, 0, 1, 1], [], []>} : vector<8x128xbf16>, vector<128x128xbf16>, vector<8x128xf32> -> vector<8x128xf32>
    %c0_58 = arith.constant 0 : index
    %c0_59 = arith.constant 0 : index
    %171 = vector.load %arg5[%c0_58, %c0_59] : memref<1x128xf32, #tpu.memory_space<vmem>>, vector<1x128xf32>
    %172 = vector.broadcast %171 : vector<1x128xf32> to vector<8x128xf32>
    %173 = arith.addf %170, %172 : vector<8x128xf32>
    %cst_60 = arith.constant dense<0xFF800000> : vector<8xf32>
    %174 = vector.multi_reduction <maximumf>, %173, %cst_60 [1] : vector<8x128xf32> to vector<8xf32>
    %175 = vector.shape_cast %174 : vector<8xf32> to vector<8x1xf32>
    %176 = vector.broadcast %175 : vector<8x1xf32> to vector<8x128xf32>
    %177 = arith.subf %173, %176 : vector<8x128xf32>
    %178 = math.exp %177 : vector<8x128xf32>
    %cst_61 = arith.constant dense<0.000000e+00> : vector<8xf32>
    %179 = vector.multi_reduction <add>, %178, %cst_61 [1] : vector<8x128xf32> to vector<8xf32>
    %180 = vector.shape_cast %179 : vector<8xf32> to vector<8x1xf32>
    %181 = math.log %180 : vector<8x1xf32>
    %182 = arith.addf %175, %181 : vector<8x1xf32>
    %183 = vector.broadcast %182 : vector<8x1xf32> to vector<8x128xf32>
    %184 = arith.subf %173, %183 : vector<8x128xf32>
    %c0_62 = arith.constant 0 : index
    %c2 = arith.constant 2 : index
    %c0_63 = arith.constant 0 : index
    %185 = vector.load %arg7[%c0_62, %c2, %c0_63] : memref<8x8x128xf32, #tpu.memory_space<vmem>>, vector<8x1x128xf32>
    %186 = vector.shape_cast %185 : vector<8x1x128xf32> to vector<8x128xf32>
    %187 = vector.shape_cast %184 : vector<8x128xf32> to vector<8x1x128xf32>
    tpu.vector_store %arg7[%c0_62, %c2, %c0_63], %187 {strides = array<i32>} : memref<8x8x128xf32, #tpu.memory_space<vmem>>, vector<8x1x128xf32>,
    %188 = vector.broadcast %175 : vector<8x1xf32> to vector<8x128xf32>
    %189 = arith.cmpf oeq, %173, %188 : vector<8x128xf32>
    %c128_i32_64 = arith.constant 128 : i32
    %190 = vector.broadcast %c128_i32_64 : i32 to vector<8x128xi32>
    %191 = arith.select %189, %0, %190 : vector<8x128xi1>, vector<8x128xi32>
    %cst_65 = arith.constant dense<2147483647> : vector<8xi32>
    %192 = vector.multi_reduction <minsi>, %191, %cst_65 [1] : vector<8x128xi32> to vector<8xi32>
    %193 = vector.shape_cast %192 : vector<8xi32> to vector<8x1xi32>
    %194 = vector.broadcast %193 : vector<8x1xi32> to vector<8x128xi32>
    %195 = arith.cmpi eq, %0, %194 : vector<8x128xi32>
    %196 = arith.extui %195 : vector<8x128xi1> to vector<8x128xi32>
    %197 = arith.sitofp %196 : vector<8x128xi32> to vector<8x128xf32>
    %c0_66 = arith.constant 0 : index
    %c0_67 = arith.constant 0 : index
    %198 = vector.load %arg1[%c0_66, %c0_67] : memref<128x384xf32, #tpu.memory_space<vmem>>, vector<128x384xf32>
    %cst_68 = arith.constant dense<0.000000e+00> : vector<8x384xf32>
    %199 = tpu.matmul %197, %198, %cst_68 {dimension_numbers = #tpu.dot_dimension_numbers<[1], [0], [0], [1], [0, 0, 1, 1], [], []>} : vector<8x128xf32>, vector<128x384xf32>, vector<8x384xf32> -> vector<8x384xf32>
    %200 = arith.truncf %167 : vector<8x128xf32> to vector<8x128xbf16>
    %c0_69 = arith.constant 0 : index
    %c0_70 = arith.constant 0 : index
    %201 = vector.load %arg2[%c0_69, %c0_70] : memref<128x384xbf16, #tpu.memory_space<vmem>>, vector<128x384xbf16>
    %cst_71 = arith.constant dense<0.000000e+00> : vector<8x384xf32>
    %202 = tpu.matmul %200, %201, %cst_71 {dimension_numbers = #tpu.dot_dimension_numbers<[1], [0], [0], [1], [0, 0, 1, 1], [], []>} : vector<8x128xbf16>, vector<128x384xbf16>, vector<8x384xf32> -> vector<8x384xf32>
    %c0_72 = arith.constant 0 : index
    %c0_73 = arith.constant 0 : index
    %203 = vector.load %arg3[%c0_72, %c0_73] : memref<1x384xf32, #tpu.memory_space<vmem>>, vector<1x384xf32>
    %204 = vector.broadcast %203 : vector<1x384xf32> to vector<8x384xf32>
    %205 = arith.addf %202, %204 : vector<8x384xf32>
    %206 = vector.extract_strided_slice %199 {offsets = [0, 0], sizes = [8, 128], strides = [1, 1]} : vector<8x384xf32> to vector<8x128xf32>
    %207 = vector.extract_strided_slice %205 {offsets = [0, 0], sizes = [8, 128], strides = [1, 1]} : vector<8x384xf32> to vector<8x128xf32>
    %208 = arith.addf %206, %207 : vector<8x128xf32>
    %209 = arith.negf %208 : vector<8x128xf32>
    %210 = math.exp %209 : vector<8x128xf32>
    %cst_74 = arith.constant 1.000000e+00 : f32
    %211 = vector.broadcast %cst_74 : f32 to vector<8x128xf32>
    %212 = arith.addf %211, %210 : vector<8x128xf32>
    %213 = arith.divf %211, %212 : vector<8x128xf32>
    %214 = vector.extract_strided_slice %199 {offsets = [0, 128], sizes = [8, 128], strides = [1, 1]} : vector<8x384xf32> to vector<8x128xf32>
    %215 = vector.extract_strided_slice %205 {offsets = [0, 128], sizes = [8, 128], strides = [1, 1]} : vector<8x384xf32> to vector<8x128xf32>
    %216 = arith.addf %214, %215 : vector<8x128xf32>
    %217 = arith.negf %216 : vector<8x128xf32>
    %218 = math.exp %217 : vector<8x128xf32>
    %cst_75 = arith.constant 1.000000e+00 : f32
    %219 = vector.broadcast %cst_75 : f32 to vector<8x128xf32>
    %220 = arith.addf %219, %218 : vector<8x128xf32>
    %221 = arith.divf %219, %220 : vector<8x128xf32>
    %222 = vector.extract_strided_slice %199 {offsets = [0, 256], sizes = [8, 128], strides = [1, 1]} : vector<8x384xf32> to vector<8x128xf32>
    %223 = vector.extract_strided_slice %205 {offsets = [0, 256], sizes = [8, 128], strides = [1, 1]} : vector<8x384xf32> to vector<8x128xf32>
    %224 = arith.mulf %213, %223 : vector<8x128xf32>
    %225 = arith.addf %222, %224 : vector<8x128xf32>
    %226 = math.tanh %225 : vector<8x128xf32>
    %cst_76 = arith.constant 1.000000e+00 : f32
    %227 = vector.broadcast %cst_76 : f32 to vector<8x128xf32>
    %228 = arith.subf %227, %221 : vector<8x128xf32>
    %229 = arith.mulf %228, %226 : vector<8x128xf32>
    %230 = arith.mulf %221, %167 : vector<8x128xf32>
    %231 = arith.addf %229, %230 : vector<8x128xf32>
    %232 = arith.truncf %231 : vector<8x128xf32> to vector<8x128xbf16>
    %c0_77 = arith.constant 0 : index
    %c0_78 = arith.constant 0 : index
    %233 = vector.load %arg4[%c0_77, %c0_78] : memref<128x128xbf16, #tpu.memory_space<vmem>>, vector<128x128xbf16>
    %cst_79 = arith.constant dense<0.000000e+00> : vector<8x128xf32>
    %234 = tpu.matmul %232, %233, %cst_79 {dimension_numbers = #tpu.dot_dimension_numbers<[1], [0], [0], [1], [0, 0, 1, 1], [], []>} : vector<8x128xbf16>, vector<128x128xbf16>, vector<8x128xf32> -> vector<8x128xf32>
    %c0_80 = arith.constant 0 : index
    %c0_81 = arith.constant 0 : index
    %235 = vector.load %arg5[%c0_80, %c0_81] : memref<1x128xf32, #tpu.memory_space<vmem>>, vector<1x128xf32>
    %236 = vector.broadcast %235 : vector<1x128xf32> to vector<8x128xf32>
    %237 = arith.addf %234, %236 : vector<8x128xf32>
    %cst_82 = arith.constant dense<0xFF800000> : vector<8xf32>
    %238 = vector.multi_reduction <maximumf>, %237, %cst_82 [1] : vector<8x128xf32> to vector<8xf32>
    %239 = vector.shape_cast %238 : vector<8xf32> to vector<8x1xf32>
    %240 = vector.broadcast %239 : vector<8x1xf32> to vector<8x128xf32>
    %241 = arith.subf %237, %240 : vector<8x128xf32>
    %242 = math.exp %241 : vector<8x128xf32>
    %cst_83 = arith.constant dense<0.000000e+00> : vector<8xf32>
    %243 = vector.multi_reduction <add>, %242, %cst_83 [1] : vector<8x128xf32> to vector<8xf32>
    %244 = vector.shape_cast %243 : vector<8xf32> to vector<8x1xf32>
    %245 = math.log %244 : vector<8x1xf32>
    %246 = arith.addf %239, %245 : vector<8x1xf32>
    %247 = vector.broadcast %246 : vector<8x1xf32> to vector<8x128xf32>
    %248 = arith.subf %237, %247 : vector<8x128xf32>
    %c0_84 = arith.constant 0 : index
    %c3 = arith.constant 3 : index
    %c0_85 = arith.constant 0 : index
    %249 = vector.load %arg7[%c0_84, %c3, %c0_85] : memref<8x8x128xf32, #tpu.memory_space<vmem>>, vector<8x1x128xf32>
    %250 = vector.shape_cast %249 : vector<8x1x128xf32> to vector<8x128xf32>
    %251 = vector.shape_cast %248 : vector<8x128xf32> to vector<8x1x128xf32>
    tpu.vector_store %arg7[%c0_84, %c3, %c0_85], %251 {strides = array<i32>} : memref<8x8x128xf32, #tpu.memory_space<vmem>>, vector<8x1x128xf32>,
    %252 = vector.broadcast %239 : vector<8x1xf32> to vector<8x128xf32>
    %253 = arith.cmpf oeq, %237, %252 : vector<8x128xf32>
    %c128_i32_86 = arith.constant 128 : i32
    %254 = vector.broadcast %c128_i32_86 : i32 to vector<8x128xi32>
    %255 = arith.select %253, %0, %254 : vector<8x128xi1>, vector<8x128xi32>
    %cst_87 = arith.constant dense<2147483647> : vector<8xi32>
    %256 = vector.multi_reduction <minsi>, %255, %cst_87 [1] : vector<8x128xi32> to vector<8xi32>
    %257 = vector.shape_cast %256 : vector<8xi32> to vector<8x1xi32>
    %258 = vector.broadcast %257 : vector<8x1xi32> to vector<8x128xi32>
    %259 = arith.cmpi eq, %0, %258 : vector<8x128xi32>
    %260 = arith.extui %259 : vector<8x128xi1> to vector<8x128xi32>
    %261 = arith.sitofp %260 : vector<8x128xi32> to vector<8x128xf32>
    %c0_88 = arith.constant 0 : index
    %c0_89 = arith.constant 0 : index
    %262 = vector.load %arg1[%c0_88, %c0_89] : memref<128x384xf32, #tpu.memory_space<vmem>>, vector<128x384xf32>
    %cst_90 = arith.constant dense<0.000000e+00> : vector<8x384xf32>
    %263 = tpu.matmul %261, %262, %cst_90 {dimension_numbers = #tpu.dot_dimension_numbers<[1], [0], [0], [1], [0, 0, 1, 1], [], []>} : vector<8x128xf32>, vector<128x384xf32>, vector<8x384xf32> -> vector<8x384xf32>
    %264 = arith.truncf %231 : vector<8x128xf32> to vector<8x128xbf16>
    %c0_91 = arith.constant 0 : index
    %c0_92 = arith.constant 0 : index
    %265 = vector.load %arg2[%c0_91, %c0_92] : memref<128x384xbf16, #tpu.memory_space<vmem>>, vector<128x384xbf16>
    %cst_93 = arith.constant dense<0.000000e+00> : vector<8x384xf32>
    %266 = tpu.matmul %264, %265, %cst_93 {dimension_numbers = #tpu.dot_dimension_numbers<[1], [0], [0], [1], [0, 0, 1, 1], [], []>} : vector<8x128xbf16>, vector<128x384xbf16>, vector<8x384xf32> -> vector<8x384xf32>
    %c0_94 = arith.constant 0 : index
    %c0_95 = arith.constant 0 : index
    %267 = vector.load %arg3[%c0_94, %c0_95] : memref<1x384xf32, #tpu.memory_space<vmem>>, vector<1x384xf32>
    %268 = vector.broadcast %267 : vector<1x384xf32> to vector<8x384xf32>
    %269 = arith.addf %266, %268 : vector<8x384xf32>
    %270 = vector.extract_strided_slice %263 {offsets = [0, 0], sizes = [8, 128], strides = [1, 1]} : vector<8x384xf32> to vector<8x128xf32>
    %271 = vector.extract_strided_slice %269 {offsets = [0, 0], sizes = [8, 128], strides = [1, 1]} : vector<8x384xf32> to vector<8x128xf32>
    %272 = arith.addf %270, %271 : vector<8x128xf32>
    %273 = arith.negf %272 : vector<8x128xf32>
    %274 = math.exp %273 : vector<8x128xf32>
    %cst_96 = arith.constant 1.000000e+00 : f32
    %275 = vector.broadcast %cst_96 : f32 to vector<8x128xf32>
    %276 = arith.addf %275, %274 : vector<8x128xf32>
    %277 = arith.divf %275, %276 : vector<8x128xf32>
    %278 = vector.extract_strided_slice %263 {offsets = [0, 128], sizes = [8, 128], strides = [1, 1]} : vector<8x384xf32> to vector<8x128xf32>
    %279 = vector.extract_strided_slice %269 {offsets = [0, 128], sizes = [8, 128], strides = [1, 1]} : vector<8x384xf32> to vector<8x128xf32>
    %280 = arith.addf %278, %279 : vector<8x128xf32>
    %281 = arith.negf %280 : vector<8x128xf32>
    %282 = math.exp %281 : vector<8x128xf32>
    %cst_97 = arith.constant 1.000000e+00 : f32
    %283 = vector.broadcast %cst_97 : f32 to vector<8x128xf32>
    %284 = arith.addf %283, %282 : vector<8x128xf32>
    %285 = arith.divf %283, %284 : vector<8x128xf32>
    %286 = vector.extract_strided_slice %263 {offsets = [0, 256], sizes = [8, 128], strides = [1, 1]} : vector<8x384xf32> to vector<8x128xf32>
    %287 = vector.extract_strided_slice %269 {offsets = [0, 256], sizes = [8, 128], strides = [1, 1]} : vector<8x384xf32> to vector<8x128xf32>
    %288 = arith.mulf %277, %287 : vector<8x128xf32>
    %289 = arith.addf %286, %288 : vector<8x128xf32>
    %290 = math.tanh %289 : vector<8x128xf32>
    %cst_98 = arith.constant 1.000000e+00 : f32
    %291 = vector.broadcast %cst_98 : f32 to vector<8x128xf32>
    %292 = arith.subf %291, %285 : vector<8x128xf32>
    %293 = arith.mulf %292, %290 : vector<8x128xf32>
    %294 = arith.mulf %285, %231 : vector<8x128xf32>
    %295 = arith.addf %293, %294 : vector<8x128xf32>
    %296 = arith.truncf %295 : vector<8x128xf32> to vector<8x128xbf16>
    %c0_99 = arith.constant 0 : index
    %c0_100 = arith.constant 0 : index
    %297 = vector.load %arg4[%c0_99, %c0_100] : memref<128x128xbf16, #tpu.memory_space<vmem>>, vector<128x128xbf16>
    %cst_101 = arith.constant dense<0.000000e+00> : vector<8x128xf32>
    %298 = tpu.matmul %296, %297, %cst_101 {dimension_numbers = #tpu.dot_dimension_numbers<[1], [0], [0], [1], [0, 0, 1, 1], [], []>} : vector<8x128xbf16>, vector<128x128xbf16>, vector<8x128xf32> -> vector<8x128xf32>
    %c0_102 = arith.constant 0 : index
    %c0_103 = arith.constant 0 : index
    %299 = vector.load %arg5[%c0_102, %c0_103] : memref<1x128xf32, #tpu.memory_space<vmem>>, vector<1x128xf32>
    %300 = vector.broadcast %299 : vector<1x128xf32> to vector<8x128xf32>
    %301 = arith.addf %298, %300 : vector<8x128xf32>
    %cst_104 = arith.constant dense<0xFF800000> : vector<8xf32>
    %302 = vector.multi_reduction <maximumf>, %301, %cst_104 [1] : vector<8x128xf32> to vector<8xf32>
    %303 = vector.shape_cast %302 : vector<8xf32> to vector<8x1xf32>
    %304 = vector.broadcast %303 : vector<8x1xf32> to vector<8x128xf32>
    %305 = arith.subf %301, %304 : vector<8x128xf32>
    %306 = math.exp %305 : vector<8x128xf32>
    %cst_105 = arith.constant dense<0.000000e+00> : vector<8xf32>
    %307 = vector.multi_reduction <add>, %306, %cst_105 [1] : vector<8x128xf32> to vector<8xf32>
    %308 = vector.shape_cast %307 : vector<8xf32> to vector<8x1xf32>
    %309 = math.log %308 : vector<8x1xf32>
    %310 = arith.addf %303, %309 : vector<8x1xf32>
    %311 = vector.broadcast %310 : vector<8x1xf32> to vector<8x128xf32>
    %312 = arith.subf %301, %311 : vector<8x128xf32>
    %c0_106 = arith.constant 0 : index
    %c4 = arith.constant 4 : index
    %c0_107 = arith.constant 0 : index
    %313 = vector.load %arg7[%c0_106, %c4, %c0_107] : memref<8x8x128xf32, #tpu.memory_space<vmem>>, vector<8x1x128xf32>
    %314 = vector.shape_cast %313 : vector<8x1x128xf32> to vector<8x128xf32>
    %315 = vector.shape_cast %312 : vector<8x128xf32> to vector<8x1x128xf32>
    tpu.vector_store %arg7[%c0_106, %c4, %c0_107], %315 {strides = array<i32>} : memref<8x8x128xf32, #tpu.memory_space<vmem>>, vector<8x1x128xf32>,
    %316 = vector.broadcast %303 : vector<8x1xf32> to vector<8x128xf32>
    %317 = arith.cmpf oeq, %301, %316 : vector<8x128xf32>
    %c128_i32_108 = arith.constant 128 : i32
    %318 = vector.broadcast %c128_i32_108 : i32 to vector<8x128xi32>
    %319 = arith.select %317, %0, %318 : vector<8x128xi1>, vector<8x128xi32>
    %cst_109 = arith.constant dense<2147483647> : vector<8xi32>
    %320 = vector.multi_reduction <minsi>, %319, %cst_109 [1] : vector<8x128xi32> to vector<8xi32>
    %321 = vector.shape_cast %320 : vector<8xi32> to vector<8x1xi32>
    %322 = vector.broadcast %321 : vector<8x1xi32> to vector<8x128xi32>
    %323 = arith.cmpi eq, %0, %322 : vector<8x128xi32>
    %324 = arith.extui %323 : vector<8x128xi1> to vector<8x128xi32>
    %325 = arith.sitofp %324 : vector<8x128xi32> to vector<8x128xf32>
    %c0_110 = arith.constant 0 : index
    %c0_111 = arith.constant 0 : index
    %326 = vector.load %arg1[%c0_110, %c0_111] : memref<128x384xf32, #tpu.memory_space<vmem>>, vector<128x384xf32>
    %cst_112 = arith.constant dense<0.000000e+00> : vector<8x384xf32>
    %327 = tpu.matmul %325, %326, %cst_112 {dimension_numbers = #tpu.dot_dimension_numbers<[1], [0], [0], [1], [0, 0, 1, 1], [], []>} : vector<8x128xf32>, vector<128x384xf32>, vector<8x384xf32> -> vector<8x384xf32>
    %328 = arith.truncf %295 : vector<8x128xf32> to vector<8x128xbf16>
    %c0_113 = arith.constant 0 : index
    %c0_114 = arith.constant 0 : index
    %329 = vector.load %arg2[%c0_113, %c0_114] : memref<128x384xbf16, #tpu.memory_space<vmem>>, vector<128x384xbf16>
    %cst_115 = arith.constant dense<0.000000e+00> : vector<8x384xf32>
    %330 = tpu.matmul %328, %329, %cst_115 {dimension_numbers = #tpu.dot_dimension_numbers<[1], [0], [0], [1], [0, 0, 1, 1], [], []>} : vector<8x128xbf16>, vector<128x384xbf16>, vector<8x384xf32> -> vector<8x384xf32>
    %c0_116 = arith.constant 0 : index
    %c0_117 = arith.constant 0 : index
    %331 = vector.load %arg3[%c0_116, %c0_117] : memref<1x384xf32, #tpu.memory_space<vmem>>, vector<1x384xf32>
    %332 = vector.broadcast %331 : vector<1x384xf32> to vector<8x384xf32>
    %333 = arith.addf %330, %332 : vector<8x384xf32>
    %334 = vector.extract_strided_slice %327 {offsets = [0, 0], sizes = [8, 128], strides = [1, 1]} : vector<8x384xf32> to vector<8x128xf32>
    %335 = vector.extract_strided_slice %333 {offsets = [0, 0], sizes = [8, 128], strides = [1, 1]} : vector<8x384xf32> to vector<8x128xf32>
    %336 = arith.addf %334, %335 : vector<8x128xf32>
    %337 = arith.negf %336 : vector<8x128xf32>
    %338 = math.exp %337 : vector<8x128xf32>
    %cst_118 = arith.constant 1.000000e+00 : f32
    %339 = vector.broadcast %cst_118 : f32 to vector<8x128xf32>
    %340 = arith.addf %339, %338 : vector<8x128xf32>
    %341 = arith.divf %339, %340 : vector<8x128xf32>
    %342 = vector.extract_strided_slice %327 {offsets = [0, 128], sizes = [8, 128], strides = [1, 1]} : vector<8x384xf32> to vector<8x128xf32>
    %343 = vector.extract_strided_slice %333 {offsets = [0, 128], sizes = [8, 128], strides = [1, 1]} : vector<8x384xf32> to vector<8x128xf32>
    %344 = arith.addf %342, %343 : vector<8x128xf32>
    %345 = arith.negf %344 : vector<8x128xf32>
    %346 = math.exp %345 : vector<8x128xf32>
    %cst_119 = arith.constant 1.000000e+00 : f32
    %347 = vector.broadcast %cst_119 : f32 to vector<8x128xf32>
    %348 = arith.addf %347, %346 : vector<8x128xf32>
    %349 = arith.divf %347, %348 : vector<8x128xf32>
    %350 = vector.extract_strided_slice %327 {offsets = [0, 256], sizes = [8, 128], strides = [1, 1]} : vector<8x384xf32> to vector<8x128xf32>
    %351 = vector.extract_strided_slice %333 {offsets = [0, 256], sizes = [8, 128], strides = [1, 1]} : vector<8x384xf32> to vector<8x128xf32>
    %352 = arith.mulf %341, %351 : vector<8x128xf32>
    %353 = arith.addf %350, %352 : vector<8x128xf32>
    %354 = math.tanh %353 : vector<8x128xf32>
    %cst_120 = arith.constant 1.000000e+00 : f32
    %355 = vector.broadcast %cst_120 : f32 to vector<8x128xf32>
    %356 = arith.subf %355, %349 : vector<8x128xf32>
    %357 = arith.mulf %356, %354 : vector<8x128xf32>
    %358 = arith.mulf %349, %295 : vector<8x128xf32>
    %359 = arith.addf %357, %358 : vector<8x128xf32>
    %360 = arith.truncf %359 : vector<8x128xf32> to vector<8x128xbf16>
    %c0_121 = arith.constant 0 : index
    %c0_122 = arith.constant 0 : index
    %361 = vector.load %arg4[%c0_121, %c0_122] : memref<128x128xbf16, #tpu.memory_space<vmem>>, vector<128x128xbf16>
    %cst_123 = arith.constant dense<0.000000e+00> : vector<8x128xf32>
    %362 = tpu.matmul %360, %361, %cst_123 {dimension_numbers = #tpu.dot_dimension_numbers<[1], [0], [0], [1], [0, 0, 1, 1], [], []>} : vector<8x128xbf16>, vector<128x128xbf16>, vector<8x128xf32> -> vector<8x128xf32>
    %c0_124 = arith.constant 0 : index
    %c0_125 = arith.constant 0 : index
    %363 = vector.load %arg5[%c0_124, %c0_125] : memref<1x128xf32, #tpu.memory_space<vmem>>, vector<1x128xf32>
    %364 = vector.broadcast %363 : vector<1x128xf32> to vector<8x128xf32>
    %365 = arith.addf %362, %364 : vector<8x128xf32>
    %cst_126 = arith.constant dense<0xFF800000> : vector<8xf32>
    %366 = vector.multi_reduction <maximumf>, %365, %cst_126 [1] : vector<8x128xf32> to vector<8xf32>
    %367 = vector.shape_cast %366 : vector<8xf32> to vector<8x1xf32>
    %368 = vector.broadcast %367 : vector<8x1xf32> to vector<8x128xf32>
    %369 = arith.subf %365, %368 : vector<8x128xf32>
    %370 = math.exp %369 : vector<8x128xf32>
    %cst_127 = arith.constant dense<0.000000e+00> : vector<8xf32>
    %371 = vector.multi_reduction <add>, %370, %cst_127 [1] : vector<8x128xf32> to vector<8xf32>
    %372 = vector.shape_cast %371 : vector<8xf32> to vector<8x1xf32>
    %373 = math.log %372 : vector<8x1xf32>
    %374 = arith.addf %367, %373 : vector<8x1xf32>
    %375 = vector.broadcast %374 : vector<8x1xf32> to vector<8x128xf32>
    %376 = arith.subf %365, %375 : vector<8x128xf32>
    %c0_128 = arith.constant 0 : index
    %c5 = arith.constant 5 : index
    %c0_129 = arith.constant 0 : index
    %377 = vector.load %arg7[%c0_128, %c5, %c0_129] : memref<8x8x128xf32, #tpu.memory_space<vmem>>, vector<8x1x128xf32>
    %378 = vector.shape_cast %377 : vector<8x1x128xf32> to vector<8x128xf32>
    %379 = vector.shape_cast %376 : vector<8x128xf32> to vector<8x1x128xf32>
    tpu.vector_store %arg7[%c0_128, %c5, %c0_129], %379 {strides = array<i32>} : memref<8x8x128xf32, #tpu.memory_space<vmem>>, vector<8x1x128xf32>,
    %380 = vector.broadcast %367 : vector<8x1xf32> to vector<8x128xf32>
    %381 = arith.cmpf oeq, %365, %380 : vector<8x128xf32>
    %c128_i32_130 = arith.constant 128 : i32
    %382 = vector.broadcast %c128_i32_130 : i32 to vector<8x128xi32>
    %383 = arith.select %381, %0, %382 : vector<8x128xi1>, vector<8x128xi32>
    %cst_131 = arith.constant dense<2147483647> : vector<8xi32>
    %384 = vector.multi_reduction <minsi>, %383, %cst_131 [1] : vector<8x128xi32> to vector<8xi32>
    %385 = vector.shape_cast %384 : vector<8xi32> to vector<8x1xi32>
    %386 = vector.broadcast %385 : vector<8x1xi32> to vector<8x128xi32>
    %387 = arith.cmpi eq, %0, %386 : vector<8x128xi32>
    %388 = arith.extui %387 : vector<8x128xi1> to vector<8x128xi32>
    %389 = arith.sitofp %388 : vector<8x128xi32> to vector<8x128xf32>
    %c0_132 = arith.constant 0 : index
    %c0_133 = arith.constant 0 : index
    %390 = vector.load %arg1[%c0_132, %c0_133] : memref<128x384xf32, #tpu.memory_space<vmem>>, vector<128x384xf32>
    %cst_134 = arith.constant dense<0.000000e+00> : vector<8x384xf32>
    %391 = tpu.matmul %389, %390, %cst_134 {dimension_numbers = #tpu.dot_dimension_numbers<[1], [0], [0], [1], [0, 0, 1, 1], [], []>} : vector<8x128xf32>, vector<128x384xf32>, vector<8x384xf32> -> vector<8x384xf32>
    %392 = arith.truncf %359 : vector<8x128xf32> to vector<8x128xbf16>
    %c0_135 = arith.constant 0 : index
    %c0_136 = arith.constant 0 : index
    %393 = vector.load %arg2[%c0_135, %c0_136] : memref<128x384xbf16, #tpu.memory_space<vmem>>, vector<128x384xbf16>
    %cst_137 = arith.constant dense<0.000000e+00> : vector<8x384xf32>
    %394 = tpu.matmul %392, %393, %cst_137 {dimension_numbers = #tpu.dot_dimension_numbers<[1], [0], [0], [1], [0, 0, 1, 1], [], []>} : vector<8x128xbf16>, vector<128x384xbf16>, vector<8x384xf32> -> vector<8x384xf32>
    %c0_138 = arith.constant 0 : index
    %c0_139 = arith.constant 0 : index
    %395 = vector.load %arg3[%c0_138, %c0_139] : memref<1x384xf32, #tpu.memory_space<vmem>>, vector<1x384xf32>
    %396 = vector.broadcast %395 : vector<1x384xf32> to vector<8x384xf32>
    %397 = arith.addf %394, %396 : vector<8x384xf32>
    %398 = vector.extract_strided_slice %391 {offsets = [0, 0], sizes = [8, 128], strides = [1, 1]} : vector<8x384xf32> to vector<8x128xf32>
    %399 = vector.extract_strided_slice %397 {offsets = [0, 0], sizes = [8, 128], strides = [1, 1]} : vector<8x384xf32> to vector<8x128xf32>
    %400 = arith.addf %398, %399 : vector<8x128xf32>
    %401 = arith.negf %400 : vector<8x128xf32>
    %402 = math.exp %401 : vector<8x128xf32>
    %cst_140 = arith.constant 1.000000e+00 : f32
    %403 = vector.broadcast %cst_140 : f32 to vector<8x128xf32>
    %404 = arith.addf %403, %402 : vector<8x128xf32>
    %405 = arith.divf %403, %404 : vector<8x128xf32>
    %406 = vector.extract_strided_slice %391 {offsets = [0, 128], sizes = [8, 128], strides = [1, 1]} : vector<8x384xf32> to vector<8x128xf32>
    %407 = vector.extract_strided_slice %397 {offsets = [0, 128], sizes = [8, 128], strides = [1, 1]} : vector<8x384xf32> to vector<8x128xf32>
    %408 = arith.addf %406, %407 : vector<8x128xf32>
    %409 = arith.negf %408 : vector<8x128xf32>
    %410 = math.exp %409 : vector<8x128xf32>
    %cst_141 = arith.constant 1.000000e+00 : f32
    %411 = vector.broadcast %cst_141 : f32 to vector<8x128xf32>
    %412 = arith.addf %411, %410 : vector<8x128xf32>
    %413 = arith.divf %411, %412 : vector<8x128xf32>
    %414 = vector.extract_strided_slice %391 {offsets = [0, 256], sizes = [8, 128], strides = [1, 1]} : vector<8x384xf32> to vector<8x128xf32>
    %415 = vector.extract_strided_slice %397 {offsets = [0, 256], sizes = [8, 128], strides = [1, 1]} : vector<8x384xf32> to vector<8x128xf32>
    %416 = arith.mulf %405, %415 : vector<8x128xf32>
    %417 = arith.addf %414, %416 : vector<8x128xf32>
    %418 = math.tanh %417 : vector<8x128xf32>
    %cst_142 = arith.constant 1.000000e+00 : f32
    %419 = vector.broadcast %cst_142 : f32 to vector<8x128xf32>
    %420 = arith.subf %419, %413 : vector<8x128xf32>
    %421 = arith.mulf %420, %418 : vector<8x128xf32>
    %422 = arith.mulf %413, %359 : vector<8x128xf32>
    %423 = arith.addf %421, %422 : vector<8x128xf32>
    %424 = arith.truncf %423 : vector<8x128xf32> to vector<8x128xbf16>
    %c0_143 = arith.constant 0 : index
    %c0_144 = arith.constant 0 : index
    %425 = vector.load %arg4[%c0_143, %c0_144] : memref<128x128xbf16, #tpu.memory_space<vmem>>, vector<128x128xbf16>
    %cst_145 = arith.constant dense<0.000000e+00> : vector<8x128xf32>
    %426 = tpu.matmul %424, %425, %cst_145 {dimension_numbers = #tpu.dot_dimension_numbers<[1], [0], [0], [1], [0, 0, 1, 1], [], []>} : vector<8x128xbf16>, vector<128x128xbf16>, vector<8x128xf32> -> vector<8x128xf32>
    %c0_146 = arith.constant 0 : index
    %c0_147 = arith.constant 0 : index
    %427 = vector.load %arg5[%c0_146, %c0_147] : memref<1x128xf32, #tpu.memory_space<vmem>>, vector<1x128xf32>
    %428 = vector.broadcast %427 : vector<1x128xf32> to vector<8x128xf32>
    %429 = arith.addf %426, %428 : vector<8x128xf32>
    %cst_148 = arith.constant dense<0xFF800000> : vector<8xf32>
    %430 = vector.multi_reduction <maximumf>, %429, %cst_148 [1] : vector<8x128xf32> to vector<8xf32>
    %431 = vector.shape_cast %430 : vector<8xf32> to vector<8x1xf32>
    %432 = vector.broadcast %431 : vector<8x1xf32> to vector<8x128xf32>
    %433 = arith.subf %429, %432 : vector<8x128xf32>
    %434 = math.exp %433 : vector<8x128xf32>
    %cst_149 = arith.constant dense<0.000000e+00> : vector<8xf32>
    %435 = vector.multi_reduction <add>, %434, %cst_149 [1] : vector<8x128xf32> to vector<8xf32>
    %436 = vector.shape_cast %435 : vector<8xf32> to vector<8x1xf32>
    %437 = math.log %436 : vector<8x1xf32>
    %438 = arith.addf %431, %437 : vector<8x1xf32>
    %439 = vector.broadcast %438 : vector<8x1xf32> to vector<8x128xf32>
    %440 = arith.subf %429, %439 : vector<8x128xf32>
    %c0_150 = arith.constant 0 : index
    %c6 = arith.constant 6 : index
    %c0_151 = arith.constant 0 : index
    %441 = vector.load %arg7[%c0_150, %c6, %c0_151] : memref<8x8x128xf32, #tpu.memory_space<vmem>>, vector<8x1x128xf32>
    %442 = vector.shape_cast %441 : vector<8x1x128xf32> to vector<8x128xf32>
    %443 = vector.shape_cast %440 : vector<8x128xf32> to vector<8x1x128xf32>
    tpu.vector_store %arg7[%c0_150, %c6, %c0_151], %443 {strides = array<i32>} : memref<8x8x128xf32, #tpu.memory_space<vmem>>, vector<8x1x128xf32>,
    %444 = vector.broadcast %431 : vector<8x1xf32> to vector<8x128xf32>
    %445 = arith.cmpf oeq, %429, %444 : vector<8x128xf32>
    %c128_i32_152 = arith.constant 128 : i32
    %446 = vector.broadcast %c128_i32_152 : i32 to vector<8x128xi32>
    %447 = arith.select %445, %0, %446 : vector<8x128xi1>, vector<8x128xi32>
    %cst_153 = arith.constant dense<2147483647> : vector<8xi32>
    %448 = vector.multi_reduction <minsi>, %447, %cst_153 [1] : vector<8x128xi32> to vector<8xi32>
    %449 = vector.shape_cast %448 : vector<8xi32> to vector<8x1xi32>
    %450 = vector.broadcast %449 : vector<8x1xi32> to vector<8x128xi32>
    %451 = arith.cmpi eq, %0, %450 : vector<8x128xi32>
    %452 = arith.extui %451 : vector<8x128xi1> to vector<8x128xi32>
    %453 = arith.sitofp %452 : vector<8x128xi32> to vector<8x128xf32>
    %c0_154 = arith.constant 0 : index
    %c0_155 = arith.constant 0 : index
    %454 = vector.load %arg1[%c0_154, %c0_155] : memref<128x384xf32, #tpu.memory_space<vmem>>, vector<128x384xf32>
    %cst_156 = arith.constant dense<0.000000e+00> : vector<8x384xf32>
    %455 = tpu.matmul %453, %454, %cst_156 {dimension_numbers = #tpu.dot_dimension_numbers<[1], [0], [0], [1], [0, 0, 1, 1], [], []>} : vector<8x128xf32>, vector<128x384xf32>, vector<8x384xf32> -> vector<8x384xf32>
    %456 = arith.truncf %423 : vector<8x128xf32> to vector<8x128xbf16>
    %c0_157 = arith.constant 0 : index
    %c0_158 = arith.constant 0 : index
    %457 = vector.load %arg2[%c0_157, %c0_158] : memref<128x384xbf16, #tpu.memory_space<vmem>>, vector<128x384xbf16>
    %cst_159 = arith.constant dense<0.000000e+00> : vector<8x384xf32>
    %458 = tpu.matmul %456, %457, %cst_159 {dimension_numbers = #tpu.dot_dimension_numbers<[1], [0], [0], [1], [0, 0, 1, 1], [], []>} : vector<8x128xbf16>, vector<128x384xbf16>, vector<8x384xf32> -> vector<8x384xf32>
    %c0_160 = arith.constant 0 : index
    %c0_161 = arith.constant 0 : index
    %459 = vector.load %arg3[%c0_160, %c0_161] : memref<1x384xf32, #tpu.memory_space<vmem>>, vector<1x384xf32>
    %460 = vector.broadcast %459 : vector<1x384xf32> to vector<8x384xf32>
    %461 = arith.addf %458, %460 : vector<8x384xf32>
    %462 = vector.extract_strided_slice %455 {offsets = [0, 0], sizes = [8, 128], strides = [1, 1]} : vector<8x384xf32> to vector<8x128xf32>
    %463 = vector.extract_strided_slice %461 {offsets = [0, 0], sizes = [8, 128], strides = [1, 1]} : vector<8x384xf32> to vector<8x128xf32>
    %464 = arith.addf %462, %463 : vector<8x128xf32>
    %465 = arith.negf %464 : vector<8x128xf32>
    %466 = math.exp %465 : vector<8x128xf32>
    %cst_162 = arith.constant 1.000000e+00 : f32
    %467 = vector.broadcast %cst_162 : f32 to vector<8x128xf32>
    %468 = arith.addf %467, %466 : vector<8x128xf32>
    %469 = arith.divf %467, %468 : vector<8x128xf32>
    %470 = vector.extract_strided_slice %455 {offsets = [0, 128], sizes = [8, 128], strides = [1, 1]} : vector<8x384xf32> to vector<8x128xf32>
    %471 = vector.extract_strided_slice %461 {offsets = [0, 128], sizes = [8, 128], strides = [1, 1]} : vector<8x384xf32> to vector<8x128xf32>
    %472 = arith.addf %470, %471 : vector<8x128xf32>
    %473 = arith.negf %472 : vector<8x128xf32>
    %474 = math.exp %473 : vector<8x128xf32>
    %cst_163 = arith.constant 1.000000e+00 : f32
    %475 = vector.broadcast %cst_163 : f32 to vector<8x128xf32>
    %476 = arith.addf %475, %474 : vector<8x128xf32>
    %477 = arith.divf %475, %476 : vector<8x128xf32>
    %478 = vector.extract_strided_slice %455 {offsets = [0, 256], sizes = [8, 128], strides = [1, 1]} : vector<8x384xf32> to vector<8x128xf32>
    %479 = vector.extract_strided_slice %461 {offsets = [0, 256], sizes = [8, 128], strides = [1, 1]} : vector<8x384xf32> to vector<8x128xf32>
    %480 = arith.mulf %469, %479 : vector<8x128xf32>
    %481 = arith.addf %478, %480 : vector<8x128xf32>
    %482 = math.tanh %481 : vector<8x128xf32>
    %cst_164 = arith.constant 1.000000e+00 : f32
    %483 = vector.broadcast %cst_164 : f32 to vector<8x128xf32>
    %484 = arith.subf %483, %477 : vector<8x128xf32>
    %485 = arith.mulf %484, %482 : vector<8x128xf32>
    %486 = arith.mulf %477, %423 : vector<8x128xf32>
    %487 = arith.addf %485, %486 : vector<8x128xf32>
    %488 = arith.truncf %487 : vector<8x128xf32> to vector<8x128xbf16>
    %c0_165 = arith.constant 0 : index
    %c0_166 = arith.constant 0 : index
    %489 = vector.load %arg4[%c0_165, %c0_166] : memref<128x128xbf16, #tpu.memory_space<vmem>>, vector<128x128xbf16>
    %cst_167 = arith.constant dense<0.000000e+00> : vector<8x128xf32>
    %490 = tpu.matmul %488, %489, %cst_167 {dimension_numbers = #tpu.dot_dimension_numbers<[1], [0], [0], [1], [0, 0, 1, 1], [], []>} : vector<8x128xbf16>, vector<128x128xbf16>, vector<8x128xf32> -> vector<8x128xf32>
    %c0_168 = arith.constant 0 : index
    %c0_169 = arith.constant 0 : index
    %491 = vector.load %arg5[%c0_168, %c0_169] : memref<1x128xf32, #tpu.memory_space<vmem>>, vector<1x128xf32>
    %492 = vector.broadcast %491 : vector<1x128xf32> to vector<8x128xf32>
    %493 = arith.addf %490, %492 : vector<8x128xf32>
    %cst_170 = arith.constant dense<0xFF800000> : vector<8xf32>
    %494 = vector.multi_reduction <maximumf>, %493, %cst_170 [1] : vector<8x128xf32> to vector<8xf32>
    %495 = vector.shape_cast %494 : vector<8xf32> to vector<8x1xf32>
    %496 = vector.broadcast %495 : vector<8x1xf32> to vector<8x128xf32>
    %497 = arith.subf %493, %496 : vector<8x128xf32>
    %498 = math.exp %497 : vector<8x128xf32>
    %cst_171 = arith.constant dense<0.000000e+00> : vector<8xf32>
    %499 = vector.multi_reduction <add>, %498, %cst_171 [1] : vector<8x128xf32> to vector<8xf32>
    %500 = vector.shape_cast %499 : vector<8xf32> to vector<8x1xf32>
    %501 = math.log %500 : vector<8x1xf32>
    %502 = arith.addf %495, %501 : vector<8x1xf32>
    %503 = vector.broadcast %502 : vector<8x1xf32> to vector<8x128xf32>
    %504 = arith.subf %493, %503 : vector<8x128xf32>
    %c0_172 = arith.constant 0 : index
    %c7 = arith.constant 7 : index
    %c0_173 = arith.constant 0 : index
    %505 = vector.load %arg7[%c0_172, %c7, %c0_173] : memref<8x8x128xf32, #tpu.memory_space<vmem>>, vector<8x1x128xf32>
    %506 = vector.shape_cast %505 : vector<8x1x128xf32> to vector<8x128xf32>
    %507 = vector.shape_cast %504 : vector<8x128xf32> to vector<8x1x128xf32>
    tpu.vector_store %arg7[%c0_172, %c7, %c0_173], %507 {strides = array<i32>} : memref<8x8x128xf32, #tpu.memory_space<vmem>>, vector<8x1x128xf32>,
    %c0_174 = arith.constant 0 : index
    %c0_175 = arith.constant 0 : index
    %508 = vector.load %arg8[%c0_174, %c0_175] : memref<8x128xf32, #tpu.memory_space<vmem>>, vector<8x128xf32>
    tpu.vector_store %arg8[%c0_174, %c0_175], %487 {strides = array<i32>} : memref<8x128xf32, #tpu.memory_space<vmem>>, vector<8x128xf32>,
    return
  }
  func.func @transform_0(%arg0: i32) -> (i32, i32) {
    %c0_i32 = arith.constant 0 : i32
    %c0_i32_0 = arith.constant 0 : i32
    %c0_i32_1 = arith.constant 0 : i32
    return %c0_i32, %c0_i32_0 : i32, i32
  }
  func.func @transform_1(%arg0: i32) -> (i32, i32) {
    %c0_i32 = arith.constant 0 : i32
    %c0_i32_0 = arith.constant 0 : i32
    %c0_i32_1 = arith.constant 0 : i32
    return %c0_i32, %c0_i32_0 : i32, i32
  }
  func.func @transform_2(%arg0: i32) -> (i32, i32) {
    %c0_i32 = arith.constant 0 : i32
    %c0_i32_0 = arith.constant 0 : i32
    %c0_i32_1 = arith.constant 0 : i32
    return %c0_i32, %c0_i32_0 : i32, i32
  }
  func.func @transform_3(%arg0: i32) -> (i32, i32) {
    %c0_i32 = arith.constant 0 : i32
    %c0_i32_0 = arith.constant 0 : i32
    %c0_i32_1 = arith.constant 0 : i32
    return %c0_i32, %c0_i32_0 : i32, i32
  }
  func.func @transform_4(%arg0: i32) -> (i32, i32) {
    %c0_i32 = arith.constant 0 : i32
    %c0_i32_0 = arith.constant 0 : i32
    %c0_i32_1 = arith.constant 0 : i32
    return %c0_i32, %c0_i32_0 : i32, i32
  }
  func.func @transform_5(%arg0: i32) -> (i32, i32) {
    %c0_i32 = arith.constant 0 : i32
    %c0_i32_0 = arith.constant 0 : i32
    return %arg0, %c0_i32 : i32, i32
  }
  func.func @transform_6(%arg0: i32) -> (i32, i32, i32) {
    %c0_i32 = arith.constant 0 : i32
    %c0_i32_0 = arith.constant 0 : i32
    %c0_i32_1 = arith.constant 0 : i32
    return %arg0, %c0_i32, %c0_i32_0 : i32, i32, i32
  }
  func.func @transform_7(%arg0: i32) -> (i32, i32) {
    %c0_i32 = arith.constant 0 : i32
    %c0_i32_0 = arith.constant 0 : i32
    return %arg0, %c0_i32 : i32, i32
  }
}

</mosaic_0001>

<bundles_post_ra>
// kernel: tpu_custom_call.1
= control target key start
LH: loop header
LB: loop body
LE: loop exit
PB: predicated region body
PF: predicated region fallthrough
CT: control target
= control target key end

     0   :  { %13 = vsyncpa [#allocation3], 0  ;;  %s9125_s0 = inlined_call_operand.hbm [shape: f32[128,384], index: 0, kind: input, shape index: {}]   ;;  %s9126_s1 = inlined_call_operand.hbm [shape: bf16[128,384], index: 1, kind: input, shape index: {}]   ;;  %s9127_s2 = inlined_call_operand.hbm [shape: f32[1,384], index: 2, kind: input, shape index: {}]   ;;  %s9128_s3 = inlined_call_operand.hbm [shape: bf16[128,128], index: 3, kind: input, shape index: {}]   ;;  %s9129_s4 = inlined_call_operand.hbm [shape: f32[1,128], index: 4, kind: input, shape index: {}]   ;;  %s9130_s5 = inlined_call_operand.hbm [shape: f32[8,128], index: 5, kind: input, shape index: {}]   ;;  %s9131_s6 = inlined_call_operand.hbm [shape: f32[8,8,128], index: 6, kind: output, shape index: {0}]   ;;  %s9132_s7 = inlined_call_operand.hbm [shape: f32[8,128], index: 7, kind: output, shape index: {1}]  }
   0x1   :  { %14 = vsyncpa [#allocation6], 0 }
   0x2   :  { %15 = vsyncpa [#allocation9], 0 }
   0x3   :  { %16 = vsyncpa [#allocation12], 0 }
   0x4   :  { %17 = vsyncpa [#allocation4], 0 }
   0x5   :  { %18 = vsyncpa [#allocation15], 0  ;;  %s7745_s24 = smov [#allocation5]   ;;  %s7557_s28 = scalar_lea.hbm %s9126_s1, 3072 }
   0x6   :  { %s36_s25 = sshll.u32 %s7745_s24, 4  ;;  %p7558_p0 = scmp.ne.s32.totalorder %s9126_s1, %s7557_s28  ;;  %s37_s25 = int_to_ptr.vmem [resolvable:$true] %s36_s25 }
   0x7   :  { %p7561_p1 = scmp.lt.u32.totalorder %s7557_s28, %s9126_s1 }
   0x9   :  { %p7563_p2 = pnand %p7561_p1, %p7558_p0 }
   0xb   :  { %7566 = shalt.err (!%p7563_p2)
}
   0xc   :  { %s7567_s10 = scalar_lea.vmem %s37_s25, 3072  ;;  %p7572_p4 = scmp.lt.s32.totalorder %s37_s25, %s37_s25 }
   0xd   :  { %p7568_p3 = scmp.ne.s32.totalorder %s37_s25, %s7567_s10  ;;  %p7573_p5 = scmp.lt.s32.totalorder %s7567_s10, %s7567_s10 }
   0xf   :  { %p7574_p6 = por %p7573_p5, %p7572_p4 }
  0x11   :  { %p7575_p7 = pnand %p7574_p6, %p7568_p3 }
  0x13   :  { %7578 = shalt.err (!%p7575_p7)
}
  0x14   :  { %s7746_s11 = smov 192   ;;  %s7747_s12 = smov 12  }
  0x15   :  { %42 = dma.hbm_to_vmem [thread:$0]  %s9126_s1, 3072, %s37_s25, [#allocation6], %s7746_s11, %s7746_s11, %s7747_s12  }
  0x16   :  { %s7748_s15 = smov [#allocation8]   ;;  %s7579_s19 = scalar_lea.hbm %s9128_s3, 1024 }
  0x17   :  { %s58_s16 = sshll.u32 %s7748_s15, 4  ;;  %p7580_p8 = scmp.ne.s32.totalorder %s9128_s3, %s7579_s19  ;;  %s59_s16 = int_to_ptr.vmem [resolvable:$true] %s58_s16 }
  0x18   :  { %p7583_p9 = scmp.lt.u32.totalorder %s7579_s19, %s9128_s3 }
  0x1a   :  { %p7585_p10 = pnand %p7583_p9, %p7580_p8 }
  0x1c   :  { %7588 = shalt.err (!%p7585_p10)
}
  0x1d   :  { %s7589_s24 = scalar_lea.vmem %s59_s16, 1024  ;;  %p7594_p12 = scmp.lt.s32.totalorder %s59_s16, %s59_s16 }
  0x1e   :  { %p7590_p11 = scmp.ne.s32.totalorder %s59_s16, %s7589_s24  ;;  %p7595_p13 = scmp.lt.s32.totalorder %s7589_s24, %s7589_s24 }
  0x20   :  { %p7596_p0 = por %p7595_p13, %p7594_p12 }
  0x22   :  { %p7597_p1 = pnand %p7596_p0, %p7590_p11 }
  0x24   :  { %7600 = shalt.err (!%p7597_p1)
}
  0x25   :  { %s7749_s1 = smov 64   ;;  %s7750_s25 = smov 4  }
  0x26   :  { %64 = dma.hbm_to_vmem [thread:$0]  %s9128_s3, 1024, %s59_s16, [#allocation9], %s7749_s1, %s7749_s1, %s7750_s25  }
  0x27   :  { %s7751_s28 = smov [#allocation2]   ;;  %s7601_s9 = scalar_lea.hbm %s9125_s0, 6144 }
  0x28   :  { %s24_s29 = sshll.u32 %s7751_s28, 4  ;;  %p7602_p2 = scmp.ne.s32.totalorder %s9125_s0, %s7601_s9  ;;  %s25_s29 = int_to_ptr.vmem [resolvable:$true] %s24_s29 }
  0x29   :  { %p7605_p3 = scmp.lt.u32.totalorder %s7601_s9, %s9125_s0 }
  0x2b   :  { %p7607_p4 = pnand %p7605_p3, %p7602_p2 }
  0x2d   :  { %7610 = shalt.err (!%p7607_p4)
}
  0x2e   :  { %s7611_s14 = scalar_lea.vmem %s25_s29, 6144  ;;  %p7616_p6 = scmp.lt.s32.totalorder %s25_s29, %s25_s29 }
  0x2f   :  { %p7612_p5 = scmp.ne.s32.totalorder %s25_s29, %s7611_s14  ;;  %p7617_p7 = scmp.lt.s32.totalorder %s7611_s14, %s7611_s14 }
  0x31   :  { %p7618_p8 = por %p7617_p7, %p7616_p6 }
  0x33   :  { %p7619_p9 = pnand %p7618_p8, %p7612_p5 }
  0x35   :  { %7622 = shalt.err (!%p7619_p9)
}
  0x36   :  { %s7752_s3 = smov 384   ;;  %s7753_s15 = smov 24  }
  0x37   :  { %30 = dma.hbm_to_vmem [thread:$0]  %s9125_s0, 6144, %s25_s29, [#allocation3], %s7752_s3, %s7752_s3, %s7753_s15  }
  0x38   :  { %s7754_s18 = smov [#allocation7]   ;;  %s7755_s20 = smov [#allocation10]  }
  0x39   :  { %s49_s19 = sshll.u32 %s7754_s18, 4  ;;  %s71_s21 = sshll.u32 %s7755_s20, 4  ;;  %s50_s19 = int_to_ptr.vmem [resolvable:$true] %s49_s19  ;;  %s72_s21 = int_to_ptr.vmem [resolvable:$true] %s71_s21 }
  0x3a   :  { %s7623_s24 = scalar_lea.hbm %s9127_s2, 48 }
  0x3b   :  { %p7624_p10 = scmp.ne.s32.totalorder %s9127_s2, %s7623_s24  ;;  %p7627_p11 = scmp.lt.u32.totalorder %s7623_s24, %s9127_s2 }
  0x3d   :  { %p7629_p12 = pnand %p7627_p11, %p7624_p10 }
  0x3f   :  { %7632 = shalt.err (!%p7629_p12)
}
  0x40   :  { %s7633_s0 = scalar_lea.vmem %s50_s19, 48  ;;  %s7637_s28 = scalar_lea.vmem %s50_s19, 64 }
  0x41   :  { %p7634_p13 = scmp.ne.s32.totalorder %s50_s19, %s7633_s0  ;;  %p7638_p0 = scmp.lt.s32.totalorder %s50_s19, %s50_s19 }
  0x42   :  { %p7639_p1 = scmp.lt.s32.totalorder %s7637_s28, %s7633_s0 }
  0x44   :  { %p7640_p2 = por %p7639_p1, %p7638_p0 }
  0x46   :  { %p7641_p3 = pnand %p7640_p2, %p7634_p13 }
  0x48   :  { %7644 = shalt.err (!%p7641_p3)
}
  0x49   :  { %52 = dma.hbm_to_vmem [thread:$0]  %s9127_s2, 48, %s50_s19, [#allocation6]  }
  0x4a   :  { %s7645_s10 = scalar_lea.hbm %s9129_s4, 16 }
  0x4b   :  { %p7646_p4 = scmp.ne.s32.totalorder %s9129_s4, %s7645_s10  ;;  %p7649_p5 = scmp.lt.u32.totalorder %s7645_s10, %s9129_s4 }
  0x4d   :  { %p7651_p6 = pnand %p7649_p5, %p7646_p4 }
  0x4f   :  { %7654 = shalt.err (!%p7651_p6)
}
  0x50   :  { %s7655_s3 = scalar_lea.vmem %s72_s21, 16  ;;  %s7659_s15 = scalar_lea.vmem %s72_s21, 32 }
  0x51   :  { %p7656_p7 = scmp.ne.s32.totalorder %s72_s21, %s7655_s3  ;;  %p7660_p8 = scmp.lt.s32.totalorder %s72_s21, %s72_s21 }
  0x52   :  { %p7661_p9 = scmp.lt.s32.totalorder %s7659_s15, %s7655_s3 }
  0x54   :  { %p7662_p10 = por %p7661_p9, %p7660_p8 }
  0x56   :  { %p7663_p11 = pnand %p7662_p10, %p7656_p7 }
  0x58   :  { %7666 = shalt.err (!%p7663_p11)
}
  0x59   :  { %74 = dma.hbm_to_vmem [thread:$0]  %s9129_s4, 16, %s72_s21, [#allocation9]  }
  0x5a   :  { %s7756_s17 = smov [#allocation11]   ;;  %s7667_s22 = scalar_lea.hbm %s9130_s5, 128 }
  0x5b   :  { %s81_s18 = sshll.u32 %s7756_s17, 4  ;;  %p7668_p12 = scmp.ne.s32.totalorder %s9130_s5, %s7667_s22  ;;  %s82_s18 = int_to_ptr.vmem [resolvable:$true] %s81_s18 }
  0x5c   :  { %p7671_p13 = scmp.lt.u32.totalorder %s7667_s22, %s9130_s5 }
  0x5e   :  { %p7673_p0 = pnand %p7671_p13, %p7668_p12 }
  0x60   :  { %7676 = shalt.err (!%p7673_p0)
}
  0x61   :  { %s7677_s26 = scalar_lea.vmem %s82_s18, 128  ;;  %p7682_p2 = scmp.lt.s32.totalorder %s82_s18, %s82_s18 }
  0x62   :  { %p7678_p1 = scmp.ne.s32.totalorder %s82_s18, %s7677_s26  ;;  %p7683_p3 = scmp.lt.s32.totalorder %s7677_s26, %s7677_s26 }
  0x64   :  { %p7684_p4 = por %p7683_p3, %p7682_p2 }
  0x66   :  { %p7685_p5 = pnand %p7684_p4, %p7678_p1 }
  0x68   :  { %7688 = shalt.err (!%p7685_p5)
}
  0x69   :  { %84 = dma.hbm_to_vmem [thread:$0]  %s9130_s5, 128, %s82_s18, [#allocation12]  }
  0x6a   :  { %7733 = dma.done.wait [#allocation3], 6144  }
  0x6b   :  { %7734 = vsyncadd [#allocation3], 4294961152 }
  0x6c   :  { %7735 = dma.done.wait [#allocation6], 3120  }
  0x6d   :  { %7736 = vsyncadd [#allocation6], 4294964176 }
  0x6e   :  { %7737 = dma.done.wait [#allocation9], 1040  }
  0x6f   :  { %7738 = vsyncadd [#allocation9], 4294966256 }
  0x70   :  { %7739 = dma.done.wait [#allocation12], 128  }
  0x71   :  { %7740 = vsyncadd [#allocation12], 4294967168  ;;  %v9137_v0 = vmov 0.0|0.0   ;;  %v9139_v1 = vmov 0.0   ;;  %vm7759_vm0 = vmmov 0   ;;  %v111_v2 = vld [vmem:[#allocation2 + $0x8] sm:$0xff]  ;;  %v104_v62 = vlaneseq }
  0x72   :  { %6783 = vmatprep.subr.bf16.mxu1 %v9137_v0  ;;  %222 = vmatprep.mubr.f32.mxu0 %v9139_v1  ;;  %v114_v3 = vld [vmem:[#allocation2 + $0x20] sm:$0xff]  ;;  %v113_v6 = vld [vmem:[#allocation2 + $0x18] sm:$0xff]  ;;  %v120_v8 = vld [vmem:[#allocation2 + $0x50] sm:$0xff]  ;;  %s7763_s5 = smov [#allocation14]  }
  0x73   :  { %6183 = vmatprep.mubr.msk.f32.mxu1 %vm7759_vm0, %v9139_v1  ;;  %v110_v4 = vld [vmem:[#allocation2] sm:$0xff]  ;;  %v7883_v5 = vpack.c.bf16 %v114_v3, %v111_v2  ;;  %v117_v7 = vld [vmem:[#allocation2 + $0x38] sm:$0xff]  ;;  %v116_v11 = vld [vmem:[#allocation2 + $0x30] sm:$0xff]  ;;  %s5519_s27 = sshll.u32 %s7763_s5, 4  ;;  %s5520_s27 = int_to_ptr.vmem [resolvable:$true] %s5519_s27 }
  0x74   :  { %v7885_v9 = vpack.c.bf16 %v113_v6, %v110_v4  ;;  %v7887_v10 = vpack.c.bf16 %v120_v8, %v117_v7  ;;  %v119_v12 = vld [vmem:[#allocation2 + $0x48] sm:$0xff]  ;;  %v126_v14 = vld [vmem:[#allocation2 + $0x80] sm:$0xff]  ;;  %v125_v18 = vld [vmem:[#allocation2 + $0x78] sm:$0xff]  ;;  %v7948_v7 = vand.u32 127, %v104_v62  ;;  %s7689_s0 = scalar_lea.vmem %s5520_s27, 128  ;;  %p7694_p7 = scmp.lt.s32.totalorder %s5520_s27, %s5520_s27 }
  0x75   :  { %v123_v13 = vld [vmem:[#allocation2 + $0x68] sm:$0xff]  ;;  %6752 = vmatprep.subr.bf16.mxu0 %v7883_v5  ;;  %v7891_v15 = vpack.c.bf16 %v119_v12, %v116_v11  ;;  %v122_v17 = vld [vmem:[#allocation2 + $0x60] sm:$0xff]  ;;  %v129_v19 = vld [vmem:[#allocation2 + $0x98] sm:$0xff]  ;;  %p7690_p6 = scmp.ne.s32.totalorder %s5520_s27, %s7689_s0  ;;  %p7695_p8 = scmp.lt.s32.totalorder %s7689_s0, %s7689_s0 }
  0x76   :  { %6754 = vmatpush1.bf16.msra.mxu0 %v7885_v9  ;;  %v7894_v16 = vpack.c.bf16 %v126_v14, %v123_v13  ;;  %v132_v20 = vld [vmem:[#allocation2 + $0xb0] sm:$0xff]  ;;  %v7897_v21 = vpack.c.bf16 %v125_v18, %v122_v17  ;;  %v131_v24 = vld [vmem:[#allocation2 + $0xa8] sm:$0xff]  ;;  %v138_v28 = vld [vmem:[#allocation2 + $0xe0] sm:$0xff]  ;;  %vm107_vm1 = vcmp.eq.s32.totalorder %v7948_v7, 1 }
  0x77   :  { %6756 = vmatprep.subr.bf16.mxu0 %v7887_v10  ;;  %v128_v22 = vld [vmem:[#allocation2 + $0x90] sm:$0xff]  ;;  %v7900_v23 = vpack.c.bf16 %v132_v20, %v129_v19  ;;  %v115_v26 = vld [vmem:[#allocation2 + $0x28] sm:$0xff]  ;;  %v134_v30 = vld [vmem:[#allocation2 + $0xc0] sm:$0xff]  ;;  %p7696_p9 = por %p7695_p8, %p7694_p7 }
  0x78   :  { %v112_v25 = vld [vmem:[#allocation2 + $0x10] sm:$0xff]  ;;  %v135_v27 = vld [vmem:[#allocation2 + $0xc8] sm:$0xff]  ;;  %v118_v31 = vld [vmem:[#allocation2 + $0x40] sm:$0xff]  ;;  %v7905_v33 = vpack.c.bf16 %v131_v24, %v128_v22  ;;  %v9135_v24 = vmov 1.0  }
  0x79   :  { %v7902_v29 = vpack.c.bf16 %v115_v26, %v112_v25  ;;  %v121_v32 = vld [vmem:[#allocation2 + $0x58] sm:$0xff]  ;;  %v7911_v36 = vpack.c.bf16 %v138_v28, %v135_v27  ;;  %v124_v38 = vld [vmem:[#allocation2 + $0x70] sm:$0xff]  ;;  %v127_v39 = vld [vmem:[#allocation2 + $0x88] sm:$0xff]  ;;  %p7697_p10 = pnand %p7696_p9, %p7690_p6 }
  0x7a   :  { %6758 = vmatpush1.bf16.msra.mxu0 %v7891_v15  ;;  %v137_v34 = vld [vmem:[#allocation2 + $0xd8] sm:$0xff]  ;;  %v7908_v35 = vpack.c.bf16 %v121_v32, %v118_v31  ;;  %v144_v40 = vld [vmem:[#allocation2 + $0x110] sm:$0xff]  ;;  %v143_v43 = vld [vmem:[#allocation2 + $0x108] sm:$0xff]  ;;  %v7918_v44 = vpack.c.bf16 %v127_v39, %v124_v38 }
  0x7b   :  { %6760 = vmatprep.subr.bf16.mxu0 %v7894_v16  ;;  %6785 = vmatpush3.bf16.msra.mxu1 %v7902_v29  ;;  %v141_v37 = vld [vmem:[#allocation2 + $0xf8] sm:$0xff]  ;;  %v140_v41 = vld [vmem:[#allocation2 + $0xf0] sm:$0xff]  ;;  %v7915_v42 = vpack.c.bf16 %v137_v34, %v134_v30  ;;  %v147_v46 = vld [vmem:[#allocation2 + $0x128] sm:$0xff]  ;;  %v9133_v30 = vmov 0  }
  0x7c   :  { %6786 = vmatprep.subr.bf16.mxu1 %v9137_v0  ;;  %v7921_v45 = vpack.c.bf16 %v144_v40, %v141_v37  ;;  %v130_v47 = vld [vmem:[#allocation2 + $0xa0] sm:$0xff]  ;;  %v133_v48 = vld [vmem:[#allocation2 + $0xb8] sm:$0xff]  ;;  %v7925_v51 = vpack.c.bf16 %v143_v43, %v140_v41  ;;  %v136_v56 = vld [vmem:[#allocation2 + $0xd0] sm:$0xff] }
  0x7d   :  { %v150_v49 = vld [vmem:[#allocation2 + $0x140] sm:$0xff]  ;;  %v149_v52 = vld [vmem:[#allocation2 + $0x138] sm:$0xff]  ;;  %v7928_v53 = vpack.c.bf16 %v133_v48, %v130_v47  ;;  %v139_v57 = vld [vmem:[#allocation2 + $0xe8] sm:$0xff] }
  0x7e   :  { %6762 = vmatpush1.bf16.msra.mxu0 %v7897_v21  ;;  %v146_v50 = vld [vmem:[#allocation2 + $0x120] sm:$0xff]  ;;  %v7931_v54 = vpack.c.bf16 %v150_v49, %v147_v46  ;;  %v153_v55 = vld [vmem:[#allocation2 + $0x158] sm:$0xff]  ;;  %v156_v58 = vld [vmem:[#allocation2 + $0x170] sm:$0xff]  ;;  %v7938_v63 = vpack.c.bf16 %v139_v57, %v136_v56 }
  0x7f   :  { %6764 = vmatprep.subr.bf16.mxu0 %v7900_v23  ;;  %6788 = vmatpush3.bf16.msra.mxu1 %v7908_v35  ;;  %v152_v59 = vld [vmem:[#allocation2 + $0x150] sm:$0xff]  ;;  %v155_v60 = vld [vmem:[#allocation2 + $0x168] sm:$0xff]  ;;  %v7935_v61 = vpack.c.bf16 %v149_v52, %v146_v50  ;;  %v142_v2 = vld [vmem:[#allocation2 + $0x100] sm:$0xff]  ;;  %v7941_v3 = vpack.c.bf16 %v156_v58, %v153_v55 }
  0x80   :  { %6789 = vmatprep.subr.bf16.mxu1 %v9137_v0  ;;  %v145_v4 = vld [vmem:[#allocation2 + $0x118] sm:$0xff]  ;;  %v7945_v6 = vpack.c.bf16 %v155_v60, %v152_v59  ;;  %v7950_v8 = vld [vmem:[#allocation5 + $0x4] ss:$12 sps:$4 sm:$0xff]   ;;  %v151_v13 = vld [vmem:[#allocation2 + $0x148] sm:$0xff] }
  0x81   :  { %v7953_v11 = vpack.c.bf16 %v145_v4, %v142_v2  ;;  %v148_v12 = vld [vmem:[#allocation2 + $0x130] sm:$0xff]  ;;  %v7957_v14 = vld [vmem:[#allocation5] ss:$12 sps:$4 sm:$0xff]   ;;  %v7959_v17 = vld [vmem:[#allocation5 + $0x1c] ss:$12 sps:$4 sm:$0xff]  }
  0x82   :  { %6766 = vmatpush1.bf16.msra.mxu0 %v7905_v33  ;;  %v7964_v18 = vpack.c.bf16 %v151_v13, %v148_v12  ;;  %v154_v19 = vld [vmem:[#allocation2 + $0x160] sm:$0xff]  ;;  %v157_v20 = vld [vmem:[#allocation2 + $0x178] sm:$0xff]  ;;  %v7242_v28 = vld [vmem:[#allocation5 + $0x8] ss:$12 sps:$4 sm:$0xff]  }
  0x83   :  { %6768 = vmatprep.subr.bf16.mxu0 %v7911_v36  ;;  %6791 = vmatpush3.bf16.msra.mxu1 %v7918_v44  ;;  %v7968_v22 = vld [vmem:[#allocation5 + $0x18] ss:$12 sps:$4 sm:$0xff]   ;;  %v7973_v25 = vld [vmem:[#allocation5 + $0x34] ss:$12 sps:$4 sm:$0xff]   ;;  %v7977_v26 = vpack.c.bf16 %v157_v20, %v154_v19  ;;  %v7981_v27 = vld [vmem:[#allocation5 + $0x30] ss:$12 sps:$4 sm:$0xff]  }
  0x84   :  { %6792 = vmatprep.subr.bf16.mxu1 %v9137_v0  ;;  %v7984_v31 = vld [vmem:[#allocation5 + $0x4c] ss:$12 sps:$4 sm:$0xff]   ;;  %v7990_v32 = vld [vmem:[#allocation5 + $0x48] ss:$12 sps:$4 sm:$0xff]   ;;  %v7992_v37 = vld [vmem:[#allocation5 + $0x64] ss:$12 sps:$4 sm:$0xff]  }
  0x85   :  { %v7246_v34 = vld [vmem:[#allocation5 + $0x20] ss:$12 sps:$4 sm:$0xff]   ;;  %v7247_v39 = vld [vmem:[#allocation5 + $0x38] ss:$12 sps:$4 sm:$0xff]   ;;  %v8004_v40 = vld [vmem:[#allocation5 + $0x7c] ss:$12 sps:$4 sm:$0xff]  }
  0x86   :  { %6770 = vmatpush1.bf16.msra.mxu0 %v7915_v42  ;;  %v8000_v38 = vld [vmem:[#allocation5 + $0x60] ss:$12 sps:$4 sm:$0xff]   ;;  %v8009_v41 = vld [vmem:[#allocation5 + $0x78] ss:$12 sps:$4 sm:$0xff]   ;;  %v7248_v43 = vld [vmem:[#allocation5 + $0x50] ss:$12 sps:$4 sm:$0xff]  }
  0x87   :  { %6772 = vmatprep.subr.bf16.mxu0 %v7921_v45  ;;  %6794 = vmatpush3.bf16.msra.mxu1 %v7928_v53  ;;  %v8011_v46 = vld [vmem:[#allocation5 + $0x94] ss:$12 sps:$4 sm:$0xff]   ;;  %v8016_v47 = vld [vmem:[#allocation5 + $0x90] ss:$12 sps:$4 sm:$0xff]   ;;  %v8018_v49 = vld [vmem:[#allocation5 + $0xac] ss:$12 sps:$4 sm:$0xff]  }
  0x88   :  { %6795 = vmatprep.subr.bf16.mxu1 %v9137_v0  ;;  %v7249_v48 = vld [vmem:[#allocation5 + $0x68] ss:$12 sps:$4 sm:$0xff]   ;;  %v7250_v55 = vld [vmem:[#allocation5 + $0x80] ss:$12 sps:$4 sm:$0xff]   ;;  %v7251_v56 = vld [vmem:[#allocation5 + $0x98] ss:$12 sps:$4 sm:$0xff]  }
  0x89   :  { %v8023_v50 = vld [vmem:[#allocation5 + $0xa8] ss:$12 sps:$4 sm:$0xff]   ;;  %v7252_v58 = vld [vmem:[#allocation5 + $0xb0] ss:$12 sps:$4 sm:$0xff]   ;;  %v332_v60 = vld [vmem:[#allocation7] sm:$0x7] }
  0x8a   :  { %6774 = vmatpush1.bf16.msra.mxu0 %v7925_v51  ;;  %v8025_v52 = vld [vmem:[#allocation11] sm:$0xff] }
  0x8b   :  { %6776 = vmatprep.subr.bf16.mxu0 %v7931_v54  ;;  %6797 = vmatpush3.bf16.msra.mxu1 %v7938_v63  ;;  %v299_v57 = vpack.c.bf16 %v8025_v52, %v8025_v52 }
  0x8c   :  { %6798 = vmatprep.subr.bf16.mxu1 %v9137_v0 }
  0x8e   :  { %6778 = vmatpush1.bf16.msra.mxu0 %v7935_v61 }
  0x8f   :  { %6780 = vmatprep.subr.bf16.mxu0 %v7941_v3  ;;  %6800 = vmatpush3.bf16.msra.mxu1 %v7953_v11 }
  0x90   :  { %6801 = vmatprep.subr.bf16.mxu1 %v9137_v0 }
  0x92   :  { %6782 = vmatpush1.bf16.msra.mxu0 %v7945_v6 }
  0x93   :  { %477 = vmatprep.subr.bf16.mxu0 %v7950_v8  ;;  %6803 = vmatpush3.bf16.msra.mxu1 %v7964_v18 }
  0x94   :  { %6804 = vmatprep.subr.bf16.mxu1 %v9137_v0 }
  0x95   :  { %5536 = vmatmul.mubr.msk.f32.vlgmr.msra.gmra.mrb[0].mxu0 %vm107_vm1, %v9135_v24 }
  0x96   :  { %478 = vmatpush1.bf16.msra.mxu0 %v7957_v14  ;;  %509 = vmatprep.mubr.bf16.mxu0 %v9133_v30 }
  0x97   :  { %479 = vmatprep.subr.bf16.mxu0 %v7959_v17  ;;  %6806 = vmatpush3.bf16.msra.mxu1 %v7977_v26 }
  0x98   :  { %6186 = vmatprep.subr.bf16.mxu1 %v9139_v1 }
  0x9a   :  { %480 = vmatpush1.bf16.msra.mxu0 %v7968_v22  ;;  %6184 = vmatmul.mubr.msk.f32.vlgmr.msra.gmra.mrb[0].mxu1 %vm107_vm1, %v9135_v24 }
  0x9b   :  { %481 = vmatprep.subr.bf16.mxu0 %v7973_v25  ;;  %6187 = vmatpush3.bf16.msra.mxu1 %v7242_v28 }
  0x9c   :  { %6188 = vmatprep.subr.bf16.mxu1 %v9139_v1  ;;  %6202 = vmatprep.mubr.msk.bf16.mxu1 %vm7759_vm0, %v9139_v1 }
  0x9e   :  { %482 = vmatpush1.bf16.msra.mxu0 %v7981_v27 }
  0x9f   :  { %483 = vmatprep.subr.bf16.mxu0 %v7984_v31  ;;  %6189 = vmatpush3.bf16.msra.mxu1 %v7246_v34 }
  0xa0   :  { %6190 = vmatprep.subr.bf16.mxu1 %v9139_v1 }
  0xa2   :  { %484 = vmatpush1.bf16.msra.mxu0 %v7990_v32 }
  0xa3   :  { %485 = vmatprep.subr.bf16.mxu0 %v7992_v37  ;;  %6191 = vmatpush3.bf16.msra.mxu1 %v7247_v39 }
  0xa4   :  { %6192 = vmatprep.subr.bf16.mxu1 %v9139_v1 }
  0xa6   :  { %486 = vmatpush1.bf16.msra.mxu0 %v8000_v38 }
  0xa7   :  { %487 = vmatprep.subr.bf16.mxu0 %v8004_v40  ;;  %6193 = vmatpush3.bf16.msra.mxu1 %v7248_v43 }
  0xa8   :  { %6194 = vmatprep.subr.bf16.mxu1 %v9139_v1 }
  0xaa   :  { %488 = vmatpush1.bf16.msra.mxu0 %v8009_v41 }
  0xab   :  { %489 = vmatprep.subr.bf16.mxu0 %v8011_v46  ;;  %6195 = vmatpush3.bf16.msra.mxu1 %v7249_v48 }
  0xac   :  { %6196 = vmatprep.subr.bf16.mxu1 %v9139_v1 }
  0xae   :  { %490 = vmatpush1.bf16.msra.mxu0 %v8016_v47 }
  0xaf   :  { %491 = vmatprep.subr.bf16.mxu0 %v8018_v49  ;;  %6197 = vmatpush3.bf16.msra.mxu1 %v7250_v55 }
  0xb0   :  { %6198 = vmatprep.subr.bf16.mxu1 %v9139_v1 }
  0xb2   :  { %492 = vmatpush1.bf16.msra.mxu0 %v8023_v50 }
  0xb3   :  { %6206 = vmatprep.subr.bf16.mxu0 %v9139_v1  ;;  %6199 = vmatpush3.bf16.msra.mxu1 %v7251_v56 }
  0xb4   :  { %6200 = vmatprep.subr.bf16.mxu1 %v9139_v1 }
  0xb5   :  { %510 = vmatmul.mubr.bf16.vlgmr.msra.gmra.mrb[4].mxu0 %v299_v57 }
  0xb6   :  { %6222 = vmatprep.mubr.msk.bf16.mxu0 %vm7759_vm0, %v9139_v1 }
  0xb7   :  { %6201 = vmatpush3.bf16.msra.mxu1 %v7252_v58 }
  0xb8   :  { %6808 = vmatprep.subr.bf16.mxu1 %v7883_v5  ;;  %v7253_v5 = vld [vmem:[#allocation8] sm:$0xff]  }
  0xb9   :  { %6207 = vmatpush3.bf16.msra.mxu0 %v7253_v5 }
  0xba   :  { %6203 = vmatmul.mubr.bf16.vlgmr.msra.gmra.mrb[4].mxu1 %v299_v57  ;;  %6208 = vmatprep.subr.bf16.mxu0 %v9139_v1 }
  0xbb   :  { %6810 = vmatpush1.bf16.msra.mxu1 %v7885_v9  ;;  %899 = vmatprep.mubr.f32.mxu1 %v9139_v1  ;;  %v7254_v9 = vld [vmem:[#allocation8 + $0x8] sm:$0xff]  }
  0xbc   :  { %6812 = vmatprep.subr.bf16.mxu1 %v7887_v10  ;;  %v7255_v10 = vld [vmem:[#allocation8 + $0x10] sm:$0xff]  }
  0xbd   :  { %6209 = vmatpush3.bf16.msra.mxu0 %v7254_v9 }
  0xbe   :  { %6210 = vmatprep.subr.bf16.mxu0 %v9139_v1 }
  0xbf   :  { %6814 = vmatpush1.bf16.msra.mxu1 %v7891_v15  ;;  %v7256_v15 = vld [vmem:[#allocation8 + $0x18] sm:$0xff]  }
  0xc0   :  { %6816 = vmatprep.subr.bf16.mxu1 %v7894_v16  ;;  %v7257_v16 = vld [vmem:[#allocation8 + $0x20] sm:$0xff]  }
  0xc1   :  { %6211 = vmatpush3.bf16.msra.mxu0 %v7255_v10 }
  0xc2   :  { %6212 = vmatprep.subr.bf16.mxu0 %v9139_v1 }
  0xc3   :  { %6818 = vmatpush1.bf16.msra.mxu1 %v7897_v21  ;;  %v7258_v21 = vld [vmem:[#allocation8 + $0x28] sm:$0xff]  }
  0xc4   :  { %6820 = vmatprep.subr.bf16.mxu1 %v7900_v23  ;;  %v7259_v23 = vld [vmem:[#allocation8 + $0x30] sm:$0xff]  }
  0xc5   :  { %6213 = vmatpush3.bf16.msra.mxu0 %v7256_v15 }
  0xc6   :  { %6214 = vmatprep.subr.bf16.mxu0 %v9139_v1 }
  0xc7   :  { %6822 = vmatpush1.bf16.msra.mxu1 %v7905_v33  ;;  %v7260_v33 = vld [vmem:[#allocation8 + $0x38] sm:$0xff]  }
  0xc8   :  { %6824 = vmatprep.subr.bf16.mxu1 %v7911_v36 }
  0xc9   :  { %6215 = vmatpush3.bf16.msra.mxu0 %v7257_v16 }
  0xca   :  { %6216 = vmatprep.subr.bf16.mxu0 %v9139_v1 }
  0xcb   :  { %6826 = vmatpush1.bf16.msra.mxu1 %v7915_v42 }
  0xcc   :  { %6828 = vmatprep.subr.bf16.mxu1 %v7921_v45 }
  0xcd   :  { %6217 = vmatpush3.bf16.msra.mxu0 %v7258_v21 }
  0xce   :  { %6218 = vmatprep.subr.bf16.mxu0 %v9139_v1 }
  0xcf   :  { %6830 = vmatpush1.bf16.msra.mxu1 %v7925_v51 }
  0xd0   :  { %6832 = vmatprep.subr.bf16.mxu1 %v7931_v54  ;;  %v8065_v54 = vshrl.u32 %v104_v62, 7 }
  0xd1   :  { %6219 = vmatpush3.bf16.msra.mxu0 %v7259_v23 }
  0xd2   :  { %6220 = vmatprep.subr.bf16.mxu0 %v9139_v1  ;;  %v8068_v59 = vsub.s32 0, %v8065_v54  ;;  %v8076_v58 = vsub.s32 2, %v8065_v54 }
  0xd3   :  { %6834 = vmatpush1.bf16.msra.mxu1 %v7935_v61  ;;  %v8071_v61 = vsub.s32 1, %v8065_v54 }
  0xd4   :  { %6836 = vmatprep.subr.bf16.mxu1 %v7941_v3  ;;  %v337_v2 = vrot.slane %v332_v60, %v8068_v59  ;;  %v345_v5 = vrot.slane %v332_v60, %v8076_v58 }
  0xd5   :  { %6221 = vmatpush3.bf16.msra.mxu0 %v7260_v33  ;;  %v341_v3 = vrot.slane %v332_v60, %v8071_v61 }
  0xd6   :  { %6839 = vmatprep.subr.bf16.mxu0 %v9137_v0 }
  0xd7   :  { %6838 = vmatpush1.bf16.msra.mxu1 %v7945_v6 }
  0xd8   :  { %1153 = vmatprep.subr.bf16.mxu1 %v7950_v8 }
 0x168   :  { %v224_v36 = vpop.f32.mrb[0].mxu0 }
 0x169   :  { %v226_v42 = vpop.f32.mrb[1].mxu0 }
 0x16d   :  { %v295_v45 = vpop.f32.mrb[0].mxu1 }
 0x16e   :  { %v6185_v51 = vpop.f32.mrb[1].mxu1 }
 0x188   :  { %v511_v4 = vpop.f32.mrb[4].mxu0 }
 0x189   :  { %v512_v6 = vadd.f32 %v511_v4, %v337_v2  ;;  %v513_v8 = vpop.f32.mrb[5].mxu0 }
 0x18a   :  { %v514_v12 = vadd.f32 %v513_v8, %v341_v3  ;;  %v515_v13 = vpop.f32.mrb[6].mxu0 }
 0x18b   :  { %v558_v19 = vadd.f32 %v512_v6, %v224_v36  ;;  %v516_v20 = vpop.f32.mrb[7].mxu0 }
 0x18c   :  { %v565_v62 = vadd.f32 %v514_v12, %v226_v42 }
 0x18d   :  { %v5562_v28 = vmul.f32 -1.442695, %v558_v19  ;;  %v552_v34 = vpop.f32.mrb[4].mxu1 }
 0x18e   :  { %v6204_v39 = vpop.f32.mrb[5].mxu1  ;;  %v5563_v43 = vmul.f32 -1.442695, %v565_v62  ;;  %v553_v15 = vadd.f32 %v552_v34, %v345_v5  ;;  %v7261_v34 = vld [vmem:[#allocation5 + $0x8] ss:$12 sps:$4 sm:$0xff]  }
 0x18f   :  { %7445 = vpow2.f32 %v5562_v28  ;;  %v555_v48 = vpop.f32.mrb[6].mxu1  ;;  %v7262_v39 = vld [vmem:[#allocation5 + $0x20] ss:$12 sps:$4 sm:$0xff]  }
 0x190   :  { %v6205_v55 = vpop.f32.mrb[7].mxu1  ;;  %7447 = vpow2.f32 %v5563_v43  ;;  %v7263_v43 = vld [vmem:[#allocation5 + $0x38] ss:$12 sps:$4 sm:$0xff]  }
 0x199   :  { %v7446_v56 = vpop.eup %7445 }
 0x19a   :  { %v562_v57 = vadd.f32 1.0, %v7446_v56  ;;  %v7448_v9 = vpop.eup %7447  ;;  %v1008_v56 = vld [vmem:[#allocation7] sm:$0x7] }
 0x19b   :  { %v569_v10 = vadd.f32 1.0, %v7448_v9  ;;  %v1017_v5 = vrot.slane %v1008_v56, %v8071_v61 }
 0x19c   :  { %7449 = vrcp.f32 %v562_v57  ;;  %v1013_v57 = vrot.slane %v1008_v56, %v8068_v59 }
 0x19d   :  { %7451 = vrcp.f32 %v569_v10 }
 0x1a6   :  { %v7450_v16 = vpop.eup %7449 }
 0x1a7   :  { %v572_v21 = vmul.f32 %v7450_v16, %v553_v15  ;;  %v7452_v33 = vpop.eup %7451 }
 0x1a8   :  { %v575_v36 = vsub.f32 1.0, %v7452_v33  ;;  %v577_v2 = vmul.f32 %v7452_v33, %v8025_v52 }
 0x1a9   :  { %v573_v23 = vadd.f32 %v572_v21, %v295_v45 }
 0x1ab   :  { %7453 = vtanh.f32 %v573_v23 }
 0x1b5   :  { %v7454_v42 = vpop.eup %7453 }
 0x1b6   :  { %v576_v51 = vmul.f32 %v7454_v42, %v575_v36 }
 0x1b8   :  { %v8080_v3 = vadd.f32 %v577_v2, %v576_v51 }
 0x1ba   :  { %v8084_v4 = vpack.c.bf16 %v8080_v3, %v8080_v3 }
 0x1bc   :  { %6223 = vmatmul.mubr.bf16.vlgmr.msra.gmra.mrb[8].mxu0 %v8084_v4 }
 0x1bd   :  { %6841 = vmatpush3.bf16.msra.mxu0 %v7902_v29  ;;  %6258 = vmatprep.mubr.msk.f32.mxu0 %vm7759_vm0, %v9139_v1  ;;  %v8105_v29 = vld [vmem:[#allocation10] ss:$0 sm:$0xff] }
 0x1be   :  { %6842 = vmatprep.subr.bf16.mxu0 %v9137_v0 }
 0x1c1   :  { %6844 = vmatpush3.bf16.msra.mxu0 %v7908_v35 }
 0x1c2   :  { %6845 = vmatprep.subr.bf16.mxu0 %v9137_v0 }
 0x1c5   :  { %6847 = vmatpush3.bf16.msra.mxu0 %v7918_v44 }
 0x1c6   :  { %6848 = vmatprep.subr.bf16.mxu0 %v9137_v0 }
 0x1c9   :  { %6850 = vmatpush3.bf16.msra.mxu0 %v7928_v53 }
 0x1ca   :  { %6851 = vmatprep.subr.bf16.mxu0 %v9137_v0 }
 0x1cd   :  { %6853 = vmatpush3.bf16.msra.mxu0 %v7938_v63 }
 0x1ce   :  { %6854 = vmatprep.subr.bf16.mxu0 %v9137_v0 }
 0x1d1   :  { %6856 = vmatpush3.bf16.msra.mxu0 %v7953_v11 }
 0x1d2   :  { %6857 = vmatprep.subr.bf16.mxu0 %v9137_v0 }
 0x1d5   :  { %6859 = vmatpush3.bf16.msra.mxu0 %v7964_v18 }
 0x1d6   :  { %6860 = vmatprep.subr.bf16.mxu0 %v9137_v0 }
 0x1d9   :  { %6862 = vmatpush3.bf16.msra.mxu0 %v7977_v26 }
 0x1da   :  { %6261 = vmatprep.subr.bf16.mxu0 %v9139_v1 }
 0x28f   :  { %v685_v35 = vpop.f32.mrb[8].mxu0 }
 0x290   :  { %v8108_v44 = vadd.f32 %v8105_v29, %v685_v35  ;;  %v6224_v53 = vpop.f32.mrb[9].mxu0 }
 0x291   :  { %v688_v63 = vpop.f32.mrb[10].mxu0 }
 0x292   :  { %691 = vmax.xlane.f32.xlu0 %v8108_v44  ;;  %v6225_v11 = vpop.f32.mrb[11].mxu0 }
 0x31f   :  { %v8111_v52 = vpop.xlane.xlu0 %691 }
 0x320   :  { %vm768_vm2 = vcmp.eq.f32.partialorder %v8108_v44, %v8111_v52 }
 0x321   :  { %v769_v18 = vsel %vm768_vm2, %v7948_v7, 128 }
 0x322   :  { %v771_v26 = vshra.s32 %v769_v18, 16  ;;  %v770_v60 = vand.u32 65535, %v769_v18 }
 0x324   :  { %v773_v45 = vcvt.s32.f32 %v771_v26  ;;  %v772_v8 = vcvt.s32.f32 %v770_v60  ;;  %v1021_v26 = vrot.slane %v1008_v56, %v8076_v58  ;;  %v1469_v56 = vld [vmem:[#allocation2 + $0x30] sm:$0xff] }
 0x326   :  { %774 = vmin.xlane.f32.xlu0 %v773_v45 }
 0x3b3   :  { %v775_v6 = vpop.xlane.xlu0 %774 }
 0x3b4   :  { %vm776_vm3 = vcmp.eq.f32.partialorder %v773_v45, %v775_v6  ;;  %v781_v13 = vcvt.f32.s32 %v775_v6 }
 0x3b5   :  { %v777_v12 = vsel %vm776_vm3, %v772_v8, inf }
 0x3b6   :  { %778 = vmin.xlane.f32.xlu1 %v777_v12  ;;  %v782_v20 = vshll.u32 %v781_v13, 16 }
 0x443   :  { %v779_v19 = vpop.xlane.xlu1 %778 }
 0x444   :  { %v780_v62 = vcvt.f32.s32 %v779_v19 }
 0x446   :  { %v783_v28 = vadd.s32 %v782_v20, %v780_v62 }
 0x448   :  { %vm784_vm4 = vcmp.eq.s32.totalorder %v7948_v7, %v783_v28 }
 0x449   :  { %5578 = vmatmul.mubr.msk.f32.vlgmr.msra.gmra.mrb[2].mxu1 %vm784_vm4, %v9135_v24  ;;  %6259 = vmatmul.mubr.msk.f32.vlgmr.msra.gmra.mrb[2].mxu0 %vm784_vm4, %v9135_v24 }
 0x44a   :  { %1154 = vmatpush1.bf16.msra.mxu1 %v7957_v14  ;;  %6262 = vmatpush3.bf16.msra.mxu0 %v7261_v34  ;;  %v7264_v14 = vld [vmem:[#allocation5 + $0x50] ss:$12 sps:$4 sm:$0xff]  }
 0x44b   :  { %1155 = vmatprep.subr.bf16.mxu1 %v7959_v17  ;;  %6263 = vmatprep.subr.bf16.mxu0 %v9139_v1  ;;  %v7265_v17 = vld [vmem:[#allocation5 + $0x68] ss:$12 sps:$4 sm:$0xff]  }
 0x44c   :  { %1185 = vmatprep.mubr.bf16.mxu1 %v9133_v30  ;;  %6277 = vmatprep.mubr.msk.bf16.mxu0 %vm7759_vm0, %v9139_v1 }
 0x44e   :  { %1156 = vmatpush1.bf16.msra.mxu1 %v7968_v22  ;;  %6264 = vmatpush3.bf16.msra.mxu0 %v7262_v39  ;;  %v7266_v22 = vld [vmem:[#allocation5 + $0x80] ss:$12 sps:$4 sm:$0xff]  }
 0x44f   :  { %1157 = vmatprep.subr.bf16.mxu1 %v7973_v25  ;;  %6265 = vmatprep.subr.bf16.mxu0 %v9139_v1  ;;  %v7267_v25 = vld [vmem:[#allocation5 + $0x98] ss:$12 sps:$4 sm:$0xff]  }
 0x452   :  { %1158 = vmatpush1.bf16.msra.mxu1 %v7981_v27  ;;  %6266 = vmatpush3.bf16.msra.mxu0 %v7263_v43  ;;  %v7268_v27 = vld [vmem:[#allocation5 + $0xb0] ss:$12 sps:$4 sm:$0xff]  }
 0x453   :  { %1159 = vmatprep.subr.bf16.mxu1 %v7984_v31  ;;  %6267 = vmatprep.subr.bf16.mxu0 %v9139_v1  ;;  %v7269_v31 = vld [vmem:[#allocation8] sm:$0xff]  }
 0x456   :  { %1160 = vmatpush1.bf16.msra.mxu1 %v7990_v32  ;;  %6268 = vmatpush3.bf16.msra.mxu0 %v7264_v14  ;;  %v7270_v32 = vld [vmem:[#allocation8 + $0x8] sm:$0xff]  }
 0x457   :  { %1161 = vmatprep.subr.bf16.mxu1 %v7992_v37  ;;  %6269 = vmatprep.subr.bf16.mxu0 %v9139_v1  ;;  %v7271_v37 = vld [vmem:[#allocation8 + $0x10] sm:$0xff]  }
 0x45a   :  { %1162 = vmatpush1.bf16.msra.mxu1 %v8000_v38  ;;  %6270 = vmatpush3.bf16.msra.mxu0 %v7265_v17  ;;  %v7272_v38 = vld [vmem:[#allocation8 + $0x18] sm:$0xff]  }
 0x45b   :  { %1163 = vmatprep.subr.bf16.mxu1 %v8004_v40  ;;  %6271 = vmatprep.subr.bf16.mxu0 %v9139_v1  ;;  %v7273_v40 = vld [vmem:[#allocation8 + $0x20] sm:$0xff]  }
 0x45e   :  { %1164 = vmatpush1.bf16.msra.mxu1 %v8009_v41  ;;  %6272 = vmatpush3.bf16.msra.mxu0 %v7266_v22  ;;  %v7274_v41 = vld [vmem:[#allocation8 + $0x28] sm:$0xff]  }
 0x45f   :  { %1165 = vmatprep.subr.bf16.mxu1 %v8011_v46  ;;  %6273 = vmatprep.subr.bf16.mxu0 %v9139_v1  ;;  %v7275_v46 = vld [vmem:[#allocation8 + $0x30] sm:$0xff]  }
 0x462   :  { %1166 = vmatpush1.bf16.msra.mxu1 %v8016_v47  ;;  %6274 = vmatpush3.bf16.msra.mxu0 %v7267_v25  ;;  %v7276_v47 = vld [vmem:[#allocation8 + $0x38] sm:$0xff]  }
 0x463   :  { %1167 = vmatprep.subr.bf16.mxu1 %v8018_v49  ;;  %6275 = vmatprep.subr.bf16.mxu0 %v9139_v1 }
 0x466   :  { %1168 = vmatpush1.bf16.msra.mxu1 %v8023_v50  ;;  %6276 = vmatpush3.bf16.msra.mxu0 %v7268_v27 }
 0x467   :  { %6281 = vmatprep.subr.bf16.mxu1 %v9139_v1 }
 0x469   :  { %1186 = vmatmul.mubr.bf16.vlgmr.msra.gmra.mrb[8].mxu1 %v8084_v4  ;;  %6278 = vmatmul.mubr.bf16.vlgmr.msra.gmra.mrb[12].mxu0 %v8084_v4 }
 0x46a   :  { %6297 = vmatprep.mubr.msk.bf16.mxu1 %vm7759_vm0, %v9139_v1  ;;  %1575 = vmatprep.mubr.f32.mxu0 %v9139_v1 }
 0x46b   :  { %6282 = vmatpush3.bf16.msra.mxu1 %v7269_v31 }
 0x46c   :  { %6283 = vmatprep.subr.bf16.mxu1 %v9139_v1 }
 0x46f   :  { %6284 = vmatpush3.bf16.msra.mxu1 %v7270_v32 }
 0x470   :  { %6285 = vmatprep.subr.bf16.mxu1 %v9139_v1 }
 0x473   :  { %6286 = vmatpush3.bf16.msra.mxu1 %v7271_v37  ;;  %v1467_v37 = vld [vmem:[#allocation2 + $0x20] sm:$0xff] }
 0x474   :  { %6287 = vmatprep.subr.bf16.mxu1 %v9139_v1 }
 0x477   :  { %6288 = vmatpush3.bf16.msra.mxu1 %v7272_v38  ;;  %v1463_v38 = vld [vmem:[#allocation2] sm:$0xff] }
 0x478   :  { %6289 = vmatprep.subr.bf16.mxu1 %v9139_v1 }
 0x47b   :  { %6290 = vmatpush3.bf16.msra.mxu1 %v7273_v40 }
 0x47c   :  { %6291 = vmatprep.subr.bf16.mxu1 %v9139_v1 }
 0x47f   :  { %6292 = vmatpush3.bf16.msra.mxu1 %v7274_v41  ;;  %v1466_v41 = vld [vmem:[#allocation2 + $0x18] sm:$0xff] }
 0x480   :  { %6293 = vmatprep.subr.bf16.mxu1 %v9139_v1 }
 0x483   :  { %6294 = vmatpush3.bf16.msra.mxu1 %v7275_v46  ;;  %v1465_v46 = vld [vmem:[#allocation2 + $0x10] sm:$0xff] }
 0x484   :  { %6295 = vmatprep.subr.bf16.mxu1 %v9139_v1 }
 0x487   :  { %6296 = vmatpush3.bf16.msra.mxu1 %v7276_v47  ;;  %v1468_v47 = vld [vmem:[#allocation2 + $0x28] sm:$0xff] }
 0x488   :  { %6895 = vmatprep.subr.bf16.mxu1 %v9137_v0 }
 0x51c   :  { %v901_v49 = vpop.f32.mrb[2].mxu1  ;;  %v972_v50 = vpop.f32.mrb[2].mxu0 }
 0x51d   :  { %v903_v48 = vpop.f32.mrb[3].mxu1  ;;  %v6260_v55 = vpop.f32.mrb[3].mxu0 }
 0x51e   :  { %v1473_v55 = vld [vmem:[#allocation2 + $0x50] sm:$0xff] }
 0x53c   :  { %v1187_v9 = vpop.f32.mrb[8].mxu1  ;;  %v1228_v10 = vpop.f32.mrb[12].mxu0 }
 0x53d   :  { %v1188_v15 = vadd.f32 %v1187_v9, %v1013_v57  ;;  %v1189_v16 = vpop.f32.mrb[9].mxu1  ;;  %v6279_v21 = vpop.f32.mrb[13].mxu0  ;;  %v1229_v60 = vadd.f32 %v1228_v10, %v1021_v26  ;;  %v1471_v9 = vld [vmem:[#allocation2 + $0x40] sm:$0xff]  ;;  %v1474_v10 = vld [vmem:[#allocation2 + $0x58] sm:$0xff]  ;;  %v1484_v26 = vld [vmem:[#allocation2 + $0xa8] sm:$0xff] }
 0x53e   :  { %v1190_v23 = vadd.f32 %v1189_v16, %v1017_v5  ;;  %v1191_v33 = vpop.f32.mrb[10].mxu1  ;;  %v1231_v36 = vpop.f32.mrb[14].mxu0  ;;  %v1472_v5 = vld [vmem:[#allocation2 + $0x48] sm:$0xff]  ;;  %v8199_v16 = vpack.c.bf16 %v1474_v10, %v1471_v9  ;;  %v1502_v10 = vld [vmem:[#allocation2 + $0x138] sm:$0xff] }
 0x53f   :  { %v1234_v42 = vadd.f32 %v1188_v15, %v901_v49  ;;  %v1192_v51 = vpop.f32.mrb[11].mxu1  ;;  %v6280_v2 = vpop.f32.mrb[15].mxu0  ;;  %v8188_v49 = vpack.c.bf16 %v1466_v41, %v1463_v38  ;;  %v8197_v15 = vpack.c.bf16 %v1472_v5, %v1469_v56  ;;  %v1476_v21 = vld [vmem:[#allocation2 + $0x68] sm:$0xff]  ;;  %v1475_v33 = vld [vmem:[#allocation2 + $0x60] sm:$0xff] }
 0x540   :  { %v1241_v4 = vadd.f32 %v1190_v23, %v903_v48  ;;  %v1470_v48 = vld [vmem:[#allocation2 + $0x38] sm:$0xff]  ;;  %v1479_v23 = vld [vmem:[#allocation2 + $0x80] sm:$0xff]  ;;  %v1477_v51 = vld [vmem:[#allocation2 + $0x70] sm:$0xff] }
 0x541   :  { %v5604_v35 = vmul.f32 -1.442695, %v1234_v42  ;;  %v8193_v57 = vpack.c.bf16 %v1473_v55, %v1470_v48  ;;  %v8203_v36 = vpack.c.bf16 %v1479_v23, %v1476_v21  ;;  %v1478_v42 = vld [vmem:[#allocation2 + $0x78] sm:$0xff]  ;;  %v1480_v2 = vld [vmem:[#allocation2 + $0x88] sm:$0xff]  ;;  %v1495_v41 = vld [vmem:[#allocation2 + $0x100] sm:$0xff] }
 0x542   :  { %v5605_v53 = vmul.f32 -1.442695, %v1241_v4  ;;  %v1482_v4 = vld [vmem:[#allocation2 + $0x98] sm:$0xff]  ;;  %v1496_v38 = vld [vmem:[#allocation2 + $0x108] sm:$0xff]  ;;  %v1503_v48 = vld [vmem:[#allocation2 + $0x140] sm:$0xff] }
 0x543   :  { %7455 = vpow2.f32 %v5604_v35  ;;  %v1485_v35 = vld [vmem:[#allocation2 + $0xb0] sm:$0xff]  ;;  %v1499_v5 = vld [vmem:[#allocation2 + $0x120] sm:$0xff]  ;;  %v1504_v23 = vld [vmem:[#allocation2 + $0x148] sm:$0xff] }
 0x544   :  { %7457 = vpow2.f32 %v5605_v53  ;;  %v8207_v53 = vpack.c.bf16 %v1478_v42, %v1475_v33  ;;  %v1501_v21 = vld [vmem:[#allocation2 + $0x130] sm:$0xff]  ;;  %v8247_v33 = vpack.c.bf16 %v1502_v10, %v1499_v5 }
 0x545   :  { %v8249_v42 = vpack.c.bf16 %v1504_v23, %v1501_v21  ;;  %v8283_v5 = vld [vmem:[#allocation5 + $0x34] ss:$12 sps:$4 sm:$0xff]   ;;  %v8289_v10 = vld [vmem:[#allocation5 + $0x30] ss:$12 sps:$4 sm:$0xff]   ;;  %v7288_v21 = vld [vmem:[#allocation5 + $0x38] ss:$12 sps:$4 sm:$0xff]  }
 0x546   :  { %v8293_v23 = vld [vmem:[#allocation5 + $0x4c] ss:$12 sps:$4 sm:$0xff]  }
 0x54d   :  { %v7456_v63 = vpop.eup %7455 }
 0x54e   :  { %v1238_v11 = vadd.f32 1.0, %v7456_v63  ;;  %v7458_v18 = vpop.eup %7457  ;;  %v8209_v63 = vpack.c.bf16 %v1480_v2, %v1477_v51 }
 0x54f   :  { %v1245_v45 = vadd.f32 1.0, %v7458_v18  ;;  %v8213_v18 = vpack.c.bf16 %v1485_v35, %v1482_v4 }
 0x550   :  { %7459 = vrcp.f32 %v1238_v11  ;;  %v1481_v11 = vld [vmem:[#allocation2 + $0x90] sm:$0xff] }
 0x551   :  { %7461 = vrcp.f32 %v1245_v45  ;;  %v1483_v45 = vld [vmem:[#allocation2 + $0xa0] sm:$0xff] }
 0x55a   :  { %v7460_v6 = vpop.eup %7459 }
 0x55b   :  { %v1248_v8 = vmul.f32 %v7460_v6, %v1229_v60  ;;  %v7462_v13 = vpop.eup %7461  ;;  %v1486_v60 = vld [vmem:[#allocation2 + $0xb8] sm:$0xff]  ;;  %v1488_v6 = vld [vmem:[#allocation2 + $0xc8] sm:$0xff] }
 0x55c   :  { %v1251_v19 = vsub.f32 1.0, %v7462_v13  ;;  %v1253_v28 = vmul.f32 %v7462_v13, %v8080_v3  ;;  %v8219_v13 = vpack.c.bf16 %v1486_v60, %v1483_v45  ;;  %v1505_v60 = vld [vmem:[#allocation2 + $0x150] sm:$0xff] }
 0x55d   :  { %v1249_v12 = vadd.f32 %v1248_v8, %v972_v50  ;;  %v8190_v50 = vpack.c.bf16 %v1468_v47, %v1465_v46  ;;  %v1491_v8 = vld [vmem:[#allocation2 + $0xe0] sm:$0xff]  ;;  %v1498_v46 = vld [vmem:[#allocation2 + $0x118] sm:$0xff]  ;;  %v1500_v47 = vld [vmem:[#allocation2 + $0x128] sm:$0xff] }
 0x55e   :  { %v8239_v56 = vpack.c.bf16 %v1498_v46, %v1495_v41  ;;  %v8243_v9 = vpack.c.bf16 %v1503_v48, %v1500_v47  ;;  %v7280_v41 = vld [vmem:[#allocation5 + $0x8] ss:$12 sps:$4 sm:$0xff]   ;;  %v8279_v47 = vld [vmem:[#allocation5 + $0x18] ss:$12 sps:$4 sm:$0xff]   ;;  %v7284_v48 = vld [vmem:[#allocation5 + $0x20] ss:$12 sps:$4 sm:$0xff]  }
 0x55f   :  { %7463 = vtanh.f32 %v1249_v12  ;;  %v8217_v12 = vpack.c.bf16 %v1484_v26, %v1481_v11  ;;  %v1506_v11 = vld [vmem:[#allocation2 + $0x158] sm:$0xff]  ;;  %v1509_v26 = vld [vmem:[#allocation2 + $0x170] sm:$0xff] }
 0x560   :  { %v8258_v45 = vpack.c.bf16 %v1509_v26, %v1506_v11  ;;  %v8273_v46 = vld [vmem:[#allocation5 + $0x1c] ss:$12 sps:$4 sm:$0xff]  }
 0x561   :  { %v7296_v11 = vld [vmem:[#allocation5 + $0x68] ss:$12 sps:$4 sm:$0xff]  }
 0x562   :  { %v8307_v26 = vld [vmem:[#allocation5 + $0x7c] ss:$12 sps:$4 sm:$0xff]  }
 0x569   :  { %v7464_v20 = vpop.eup %7463 }
 0x56a   :  { %v1252_v62 = vmul.f32 %v7464_v20, %v1251_v19  ;;  %v1487_v19 = vld [vmem:[#allocation2 + $0xc0] sm:$0xff]  ;;  %v8223_v20 = vpack.c.bf16 %v1491_v8, %v1488_v6  ;;  %v1508_v6 = vld [vmem:[#allocation2 + $0x168] sm:$0xff] }
 0x56b   :  { %v1507_v8 = vld [vmem:[#allocation2 + $0x160] sm:$0xff] }
 0x56c   :  { %v8162_v34 = vadd.f32 %v1253_v28, %v1252_v62  ;;  %v1490_v62 = vld [vmem:[#allocation2 + $0xd8] sm:$0xff]  ;;  %v1489_v28 = vld [vmem:[#allocation2 + $0xd0] sm:$0xff] }
 0x56e   :  { %v8166_v39 = vpack.c.bf16 %v8162_v34, %v8162_v34 }
 0x570   :  { %6298 = vmatmul.mubr.bf16.vlgmr.msra.gmra.mrb[12].mxu1 %v8166_v39 }
 0x571   :  { %6333 = vmatprep.mubr.msk.f32.mxu1 %vm7759_vm0, %v9139_v1  ;;  %6897 = vmatpush3.bf16.msra.mxu1 %v8190_v50 }
 0x572   :  { %6898 = vmatprep.subr.bf16.mxu1 %v9137_v0 }
 0x575   :  { %6900 = vmatpush3.bf16.msra.mxu1 %v8199_v16 }
 0x576   :  { %6901 = vmatprep.subr.bf16.mxu1 %v9137_v0 }
 0x579   :  { %6903 = vmatpush3.bf16.msra.mxu1 %v8209_v63 }
 0x57a   :  { %6904 = vmatprep.subr.bf16.mxu1 %v9137_v0 }
 0x57d   :  { %6906 = vmatpush3.bf16.msra.mxu1 %v8219_v13 }
 0x57e   :  { %6907 = vmatprep.subr.bf16.mxu1 %v9137_v0 }
 0x643   :  { %v1361_v43 = vpop.f32.mrb[12].mxu1 }
 0x644   :  { %v8172_v14 = vadd.f32 %v8105_v29, %v1361_v43  ;;  %v6299_v17 = vpop.f32.mrb[13].mxu1  ;;  %v1464_v29 = vld [vmem:[#allocation2 + $0x8] sm:$0xff] }
 0x645   :  { %v1364_v22 = vpop.f32.mrb[14].mxu1  ;;  %v8186_v40 = vpack.c.bf16 %v1467_v37, %v1464_v29  ;;  %v1492_v43 = vld [vmem:[#allocation2 + $0xe8] sm:$0xff]  ;;  %v1494_v17 = vld [vmem:[#allocation2 + $0xf8] sm:$0xff]  ;;  %v1493_v29 = vld [vmem:[#allocation2 + $0xf0] sm:$0xff] }
 0x646   :  { %1367 = vmax.xlane.f32.xlu1 %v8172_v14  ;;  %v6300_v3 = vpop.f32.mrb[15].mxu1  ;;  %v1497_v22 = vld [vmem:[#allocation2 + $0x110] sm:$0xff]  ;;  %v8237_v55 = vpack.c.bf16 %v1496_v38, %v1493_v29  ;;  %v8271_v38 = vld [vmem:[#allocation5] ss:$12 sps:$4 sm:$0xff]  }
 0x647   :  { %6864 = vmatprep.subr.bf16.mxu0 %v8186_v40  ;;  %v8227_v3 = vpack.c.bf16 %v1490_v62, %v1487_v19  ;;  %v8233_v37 = vpack.c.bf16 %v1497_v22, %v1494_v17  ;;  %v8260_v19 = vpack.c.bf16 %v1508_v6, %v1505_v60  ;;  %v1510_v62 = vld [vmem:[#allocation2 + $0x178] sm:$0xff]  ;;  %v7300_v6 = vld [vmem:[#allocation5 + $0x80] ss:$12 sps:$4 sm:$0xff]  }
 0x648   :  { %6866 = vmatpush1.bf16.msra.mxu0 %v8188_v49  ;;  %v8310_v60 = vld [vmem:[#allocation5 + $0x78] ss:$12 sps:$4 sm:$0xff]  }
 0x649   :  { %6868 = vmatprep.subr.bf16.mxu0 %v8193_v57 }
 0x64c   :  { %6870 = vmatpush1.bf16.msra.mxu0 %v8197_v15 }
 0x64d   :  { %6872 = vmatprep.subr.bf16.mxu0 %v8203_v36 }
 0x650   :  { %6874 = vmatpush1.bf16.msra.mxu0 %v8207_v53 }
 0x651   :  { %6876 = vmatprep.subr.bf16.mxu0 %v8213_v18 }
 0x654   :  { %6878 = vmatpush1.bf16.msra.mxu0 %v8217_v12 }
 0x655   :  { %6880 = vmatprep.subr.bf16.mxu0 %v8223_v20 }
 0x658   :  { %6882 = vmatpush1.bf16.msra.mxu0 %v8227_v3 }
 0x659   :  { %6884 = vmatprep.subr.bf16.mxu0 %v8233_v37 }
 0x65c   :  { %6886 = vmatpush1.bf16.msra.mxu0 %v8237_v55 }
 0x65d   :  { %6888 = vmatprep.subr.bf16.mxu0 %v8243_v9 }
 0x660   :  { %6890 = vmatpush1.bf16.msra.mxu0 %v8247_v33 }
 0x661   :  { %6892 = vmatprep.subr.bf16.mxu0 %v8258_v45 }
 0x664   :  { %6894 = vmatpush1.bf16.msra.mxu0 %v8260_v19 }
 0x6d3   :  { %v8175_v25 = vpop.xlane.xlu1 %1367 }
 0x6d4   :  { %vm1444_vm5 = vcmp.eq.f32.partialorder %v8172_v14, %v8175_v25 }
 0x6d5   :  { %v8180_v27 = vsel %vm1444_vm5, %v7948_v7, 128 }
 0x6d6   :  { %v1447_v31 = vshra.s32 %v8180_v27, 16  ;;  %v1446_v51 = vand.u32 65535, %v8180_v27  ;;  %v8267_v27 = vld [vmem:[#allocation5 + $0x4] ss:$12 sps:$4 sm:$0xff]  }
 0x6d7   :  { %1829 = vmatprep.subr.bf16.mxu0 %v8267_v27 }
 0x6d8   :  { %v8183_v32 = vcvt.s32.f32 %v1447_v31  ;;  %v8229_v31 = vpack.c.bf16 %v1492_v43, %v1489_v28  ;;  %v1448_v4 = vcvt.s32.f32 %v1446_v51  ;;  %v8263_v28 = vpack.c.bf16 %v1510_v62, %v1507_v8  ;;  %v8296_v51 = vld [vmem:[#allocation5 + $0x48] ss:$12 sps:$4 sm:$0xff]   ;;  %v8317_v62 = vld [vmem:[#allocation5 + $0x90] ss:$12 sps:$4 sm:$0xff]  }
 0x6d9   :  { %v8314_v8 = vld [vmem:[#allocation5 + $0x94] ss:$12 sps:$4 sm:$0xff]  }
 0x6da   :  { %1450 = vmin.xlane.f32.xlu0 %v8183_v32  ;;  %6909 = vmatpush3.bf16.msra.mxu1 %v8229_v31 }
 0x6db   :  { %6910 = vmatprep.subr.bf16.mxu1 %v9137_v0 }
 0x6de   :  { %6912 = vmatpush3.bf16.msra.mxu1 %v8239_v56 }
 0x6df   :  { %6913 = vmatprep.subr.bf16.mxu1 %v9137_v0 }
 0x6e2   :  { %6915 = vmatpush3.bf16.msra.mxu1 %v8249_v42 }
 0x6e3   :  { %6916 = vmatprep.subr.bf16.mxu1 %v9137_v0 }
 0x6e6   :  { %6918 = vmatpush3.bf16.msra.mxu1 %v8263_v28 }
 0x6e7   :  { %6336 = vmatprep.subr.bf16.mxu1 %v9139_v1 }
 0x767   :  { %v1451_v2 = vpop.xlane.xlu0 %1450 }
 0x768   :  { %vm1452_vm6 = vcmp.eq.f32.partialorder %v8183_v32, %v1451_v2  ;;  %v1457_v32 = vcvt.f32.s32 %v1451_v2  ;;  %v7292_v2 = vld [vmem:[#allocation5 + $0x50] ss:$12 sps:$4 sm:$0xff]  }
 0x769   :  { %v1453_v35 = vsel %vm1452_vm6, %v1448_v4, inf  ;;  %v8300_v4 = vld [vmem:[#allocation5 + $0x64] ss:$12 sps:$4 sm:$0xff]  }
 0x76a   :  { %1454 = vmin.xlane.f32.xlu1 %v1453_v35  ;;  %v1458_v17 = vshll.u32 %v1457_v32, 16  ;;  %v8303_v35 = vld [vmem:[#allocation5 + $0x60] ss:$12 sps:$4 sm:$0xff]   ;;  %v7304_v32 = vld [vmem:[#allocation5 + $0x98] ss:$12 sps:$4 sm:$0xff]  }
 0x7f7   :  { %v1455_v43 = vpop.xlane.xlu1 %1454 }
 0x7f8   :  { %v1456_v22 = vcvt.f32.s32 %v1455_v43  ;;  %v8321_v43 = vld [vmem:[#allocation5 + $0xac] ss:$12 sps:$4 sm:$0xff]  }
 0x7fa   :  { %v1459_v29 = vadd.s32 %v1458_v17, %v1456_v22  ;;  %v8324_v17 = vld [vmem:[#allocation5 + $0xa8] ss:$12 sps:$4 sm:$0xff]   ;;  %v7308_v22 = vld [vmem:[#allocation5 + $0xb0] ss:$12 sps:$4 sm:$0xff]  }
 0x7fc   :  { %vm1460_vm7 = vcmp.eq.s32.totalorder %v7948_v7, %v1459_v29 }
 0x7fd   :  { %5620 = vmatmul.mubr.msk.f32.vlgmr.msra.gmra.mrb[16].mxu0 %vm1460_vm7, %v9135_v24  ;;  %6334 = vmatmul.mubr.msk.f32.vlgmr.msra.gmra.mrb[16].mxu1 %vm1460_vm7, %v9135_v24 }
 0x7fe   :  { %1830 = vmatpush1.bf16.msra.mxu0 %v8271_v38  ;;  %6337 = vmatpush3.bf16.msra.mxu1 %v7280_v41 }
 0x7ff   :  { %1831 = vmatprep.subr.bf16.mxu0 %v8273_v46  ;;  %6338 = vmatprep.subr.bf16.mxu1 %v9139_v1 }
 0x800   :  { %1861 = vmatprep.mubr.bf16.mxu0 %v9133_v30  ;;  %6352 = vmatprep.mubr.msk.bf16.mxu1 %vm7759_vm0, %v9139_v1 }
 0x802   :  { %1832 = vmatpush1.bf16.msra.mxu0 %v8279_v47  ;;  %6339 = vmatpush3.bf16.msra.mxu1 %v7284_v48 }
 0x803   :  { %1833 = vmatprep.subr.bf16.mxu0 %v8283_v5  ;;  %6340 = vmatprep.subr.bf16.mxu1 %v9139_v1 }
 0x806   :  { %1834 = vmatpush1.bf16.msra.mxu0 %v8289_v10  ;;  %6341 = vmatpush3.bf16.msra.mxu1 %v7288_v21 }
 0x807   :  { %1835 = vmatprep.subr.bf16.mxu0 %v8293_v23  ;;  %6342 = vmatprep.subr.bf16.mxu1 %v9139_v1 }
 0x80a   :  { %1836 = vmatpush1.bf16.msra.mxu0 %v8296_v51  ;;  %6343 = vmatpush3.bf16.msra.mxu1 %v7292_v2 }
 0x80b   :  { %1837 = vmatprep.subr.bf16.mxu0 %v8300_v4  ;;  %6344 = vmatprep.subr.bf16.mxu1 %v9139_v1 }
 0x80e   :  { %1838 = vmatpush1.bf16.msra.mxu0 %v8303_v35  ;;  %6345 = vmatpush3.bf16.msra.mxu1 %v7296_v11 }
 0x80f   :  { %1839 = vmatprep.subr.bf16.mxu0 %v8307_v26  ;;  %6346 = vmatprep.subr.bf16.mxu1 %v9139_v1 }
 0x812   :  { %1840 = vmatpush1.bf16.msra.mxu0 %v8310_v60  ;;  %6347 = vmatpush3.bf16.msra.mxu1 %v7300_v6 }
 0x813   :  { %1841 = vmatprep.subr.bf16.mxu0 %v8314_v8  ;;  %6348 = vmatprep.subr.bf16.mxu1 %v9139_v1 }
 0x816   :  { %1842 = vmatpush1.bf16.msra.mxu0 %v8317_v62  ;;  %6349 = vmatpush3.bf16.msra.mxu1 %v7304_v32 }
 0x817   :  { %1843 = vmatprep.subr.bf16.mxu0 %v8321_v43  ;;  %6350 = vmatprep.subr.bf16.mxu1 %v9139_v1 }
 0x81a   :  { %1844 = vmatpush1.bf16.msra.mxu0 %v8324_v17  ;;  %6351 = vmatpush3.bf16.msra.mxu1 %v7308_v22 }
 0x81b   :  { %6356 = vmatprep.subr.bf16.mxu0 %v9139_v1  ;;  %6920 = vmatprep.subr.bf16.mxu1 %v8186_v40  ;;  %v7310_v40 = vld [vmem:[#allocation8 + $0x8] sm:$0xff]  }
 0x81d   :  { %1862 = vmatmul.mubr.bf16.vlgmr.msra.gmra.mrb[20].mxu0 %v8166_v39  ;;  %6353 = vmatmul.mubr.bf16.vlgmr.msra.gmra.mrb[20].mxu1 %v8166_v39  ;;  %v7309_v39 = vld [vmem:[#allocation8] sm:$0xff]  }
 0x81e   :  { %6372 = vmatprep.mubr.msk.bf16.mxu0 %vm7759_vm0, %v9139_v1  ;;  %6922 = vmatpush1.bf16.msra.mxu1 %v8188_v49  ;;  %v7311_v49 = vld [vmem:[#allocation8 + $0x10] sm:$0xff]  }
 0x81f   :  { %6924 = vmatprep.subr.bf16.mxu1 %v8193_v57  ;;  %2251 = vmatprep.mubr.f32.mxu1 %v9139_v1  ;;  %v7312_v57 = vld [vmem:[#allocation8 + $0x18] sm:$0xff]  }
 0x820   :  { %6357 = vmatpush3.bf16.msra.mxu0 %v7309_v39 }
 0x821   :  { %6358 = vmatprep.subr.bf16.mxu0 %v9139_v1 }
 0x822   :  { %6926 = vmatpush1.bf16.msra.mxu1 %v8197_v15  ;;  %v7313_v15 = vld [vmem:[#allocation8 + $0x20] sm:$0xff]  }
 0x823   :  { %6928 = vmatprep.subr.bf16.mxu1 %v8203_v36  ;;  %v7314_v36 = vld [vmem:[#allocation8 + $0x28] sm:$0xff]  }
 0x824   :  { %6359 = vmatpush3.bf16.msra.mxu0 %v7310_v40 }
 0x825   :  { %6360 = vmatprep.subr.bf16.mxu0 %v9139_v1 }
 0x826   :  { %6930 = vmatpush1.bf16.msra.mxu1 %v8207_v53  ;;  %v7315_v53 = vld [vmem:[#allocation8 + $0x30] sm:$0xff]  }
 0x827   :  { %6932 = vmatprep.subr.bf16.mxu1 %v8213_v18  ;;  %v7316_v18 = vld [vmem:[#allocation8 + $0x38] sm:$0xff]  }
 0x828   :  { %6361 = vmatpush3.bf16.msra.mxu0 %v7311_v49 }
 0x829   :  { %6362 = vmatprep.subr.bf16.mxu0 %v9139_v1 }
 0x82a   :  { %6934 = vmatpush1.bf16.msra.mxu1 %v8217_v12 }
 0x82b   :  { %6936 = vmatprep.subr.bf16.mxu1 %v8223_v20 }
 0x82c   :  { %6363 = vmatpush3.bf16.msra.mxu0 %v7312_v57 }
 0x82d   :  { %6364 = vmatprep.subr.bf16.mxu0 %v9139_v1 }
 0x82e   :  { %6938 = vmatpush1.bf16.msra.mxu1 %v8227_v3 }
 0x82f   :  { %6940 = vmatprep.subr.bf16.mxu1 %v8233_v37 }
 0x830   :  { %6365 = vmatpush3.bf16.msra.mxu0 %v7313_v15 }
 0x831   :  { %6366 = vmatprep.subr.bf16.mxu0 %v9139_v1 }
 0x832   :  { %6942 = vmatpush1.bf16.msra.mxu1 %v8237_v55  ;;  %v1684_v55 = vld [vmem:[#allocation7] sm:$0x7] }
 0x833   :  { %6944 = vmatprep.subr.bf16.mxu1 %v8243_v9  ;;  %v1689_v9 = vrot.slane %v1684_v55, %v8068_v59 }
 0x834   :  { %6367 = vmatpush3.bf16.msra.mxu0 %v7314_v36  ;;  %v1697_v36 = vrot.slane %v1684_v55, %v8076_v58 }
 0x835   :  { %6368 = vmatprep.subr.bf16.mxu0 %v9139_v1 }
 0x836   :  { %6946 = vmatpush1.bf16.msra.mxu1 %v8247_v33  ;;  %v1693_v33 = vrot.slane %v1684_v55, %v8071_v61 }
 0x837   :  { %6948 = vmatprep.subr.bf16.mxu1 %v8258_v45 }
 0x838   :  { %6369 = vmatpush3.bf16.msra.mxu0 %v7315_v53 }
 0x839   :  { %6370 = vmatprep.subr.bf16.mxu0 %v9139_v1 }
 0x83a   :  { %6950 = vmatpush1.bf16.msra.mxu1 %v8260_v19 }
 0x83b   :  { %2505 = vmatprep.subr.bf16.mxu1 %v8267_v27 }
 0x83c   :  { %6371 = vmatpush3.bf16.msra.mxu0 %v7316_v18 }
 0x83d   :  { %6951 = vmatprep.subr.bf16.mxu0 %v9137_v0 }
 0x8d0   :  { %v1577_v12 = vpop.f32.mrb[16].mxu0  ;;  %v1648_v20 = vpop.f32.mrb[16].mxu1 }
 0x8d1   :  { %v1579_v3 = vpop.f32.mrb[17].mxu0  ;;  %v6335_v37 = vpop.f32.mrb[17].mxu1 }
 0x8f0   :  { %v1863_v45 = vpop.f32.mrb[20].mxu0  ;;  %v1904_v19 = vpop.f32.mrb[20].mxu1 }
 0x8f1   :  { %v1864_v27 = vadd.f32 %v1863_v45, %v1689_v9  ;;  %v1865_v29 = vpop.f32.mrb[21].mxu0  ;;  %v6354_v41 = vpop.f32.mrb[21].mxu1  ;;  %v1905_v18 = vadd.f32 %v1904_v19, %v1697_v36 }
 0x8f2   :  { %v1866_v48 = vadd.f32 %v1865_v29, %v1693_v33  ;;  %v1867_v21 = vpop.f32.mrb[22].mxu0  ;;  %v1907_v2 = vpop.f32.mrb[22].mxu1 }
 0x8f3   :  { %v1910_v11 = vadd.f32 %v1864_v27, %v1577_v12  ;;  %v1868_v6 = vpop.f32.mrb[23].mxu0  ;;  %v6355_v32 = vpop.f32.mrb[23].mxu1 }
 0x8f4   :  { %v1917_v22 = vadd.f32 %v1866_v48, %v1579_v3 }
 0x8f5   :  { %v5646_v39 = vmul.f32 -1.442695, %v1910_v11 }
 0x8f6   :  { %v5647_v40 = vmul.f32 -1.442695, %v1917_v22 }
 0x8f7   :  { %7465 = vpow2.f32 %v5646_v39 }
 0x8f8   :  { %7467 = vpow2.f32 %v5647_v40  ;;  %v7317_v40 = vld [vmem:[#allocation5 + $0x8] ss:$12 sps:$4 sm:$0xff]  }
 0x901   :  { %v7466_v49 = vpop.eup %7465 }
 0x902   :  { %v1914_v57 = vadd.f32 1.0, %v7466_v49  ;;  %v7468_v15 = vpop.eup %7467  ;;  %v7318_v49 = vld [vmem:[#allocation5 + $0x20] ss:$12 sps:$4 sm:$0xff]  }
 0x903   :  { %v1921_v53 = vadd.f32 1.0, %v7468_v15 }
 0x904   :  { %7469 = vrcp.f32 %v1914_v57  ;;  %v7319_v57 = vld [vmem:[#allocation5 + $0x38] ss:$12 sps:$4 sm:$0xff]  }
 0x905   :  { %7471 = vrcp.f32 %v1921_v53  ;;  %v2360_v53 = vld [vmem:[#allocation7] sm:$0x7] }
 0x90e   :  { %v7470_v37 = vpop.eup %7469 }
 0x90f   :  { %v1924_v9 = vmul.f32 %v7470_v37, %v1905_v18  ;;  %v7472_v12 = vpop.eup %7471  ;;  %v2365_v18 = vrot.slane %v2360_v53, %v8068_v59  ;;  %v2369_v37 = vrot.slane %v2360_v53, %v8071_v61 }
 0x910   :  { %v1927_v45 = vsub.f32 1.0, %v7472_v12  ;;  %v1929_v29 = vmul.f32 %v7472_v12, %v8162_v34  ;;  %v8389_v34 = vld [vmem:[#allocation10] ss:$0 sm:$0xff] }
 0x911   :  { %v1925_v33 = vadd.f32 %v1924_v9, %v1648_v20 }
 0x913   :  { %7473 = vtanh.f32 %v1925_v33 }
 0x91d   :  { %v7474_v3 = vpop.eup %7473 }
 0x91e   :  { %v1928_v27 = vmul.f32 %v7474_v3, %v1927_v45 }
 0x920   :  { %v8364_v41 = vadd.f32 %v1929_v29, %v1928_v27 }
 0x922   :  { %v8368_v48 = vpack.c.bf16 %v8364_v41, %v8364_v41 }
 0x924   :  { %6373 = vmatmul.mubr.bf16.vlgmr.msra.gmra.mrb[24].mxu0 %v8368_v48 }
 0x925   :  { %6953 = vmatpush3.bf16.msra.mxu0 %v8190_v50  ;;  %6408 = vmatprep.mubr.msk.f32.mxu0 %vm7759_vm0, %v9139_v1 }
 0x926   :  { %6954 = vmatprep.subr.bf16.mxu0 %v9137_v0 }
 0x929   :  { %6956 = vmatpush3.bf16.msra.mxu0 %v8199_v16 }
 0x92a   :  { %6957 = vmatprep.subr.bf16.mxu0 %v9137_v0 }
 0x92d   :  { %6959 = vmatpush3.bf16.msra.mxu0 %v8209_v63 }
 0x92e   :  { %6960 = vmatprep.subr.bf16.mxu0 %v9137_v0 }
 0x931   :  { %6962 = vmatpush3.bf16.msra.mxu0 %v8219_v13 }
 0x932   :  { %6963 = vmatprep.subr.bf16.mxu0 %v9137_v0 }
 0x935   :  { %6965 = vmatpush3.bf16.msra.mxu0 %v8229_v31 }
 0x936   :  { %6966 = vmatprep.subr.bf16.mxu0 %v9137_v0 }
 0x939   :  { %6968 = vmatpush3.bf16.msra.mxu0 %v8239_v56 }
 0x93a   :  { %6969 = vmatprep.subr.bf16.mxu0 %v9137_v0 }
 0x93d   :  { %6971 = vmatpush3.bf16.msra.mxu0 %v8249_v42 }
 0x93e   :  { %6972 = vmatprep.subr.bf16.mxu0 %v9137_v0 }
 0x941   :  { %6974 = vmatpush3.bf16.msra.mxu0 %v8263_v28 }
 0x942   :  { %6411 = vmatprep.subr.bf16.mxu0 %v9139_v1 }
 0x9f7   :  { %v2037_v50 = vpop.f32.mrb[24].mxu0 }
 0x9f8   :  { %v8392_v16 = vadd.f32 %v8389_v34, %v2037_v50  ;;  %v6374_v63 = vpop.f32.mrb[25].mxu0 }
 0x9f9   :  { %v2040_v13 = vpop.f32.mrb[26].mxu0 }
 0x9fa   :  { %2043 = vmax.xlane.f32.xlu0 %v8392_v16  ;;  %v6375_v31 = vpop.f32.mrb[27].mxu0 }
 0xa87   :  { %v8395_v56 = vpop.xlane.xlu0 %2043 }
 0xa88   :  { %vm2120_vm8 = vcmp.eq.f32.partialorder %v8392_v16, %v8395_v56 }
 0xa89   :  { %v2121_v42 = vsel %vm2120_vm8, %v7948_v7, 128 }
 0xa8a   :  { %v2123_v28 = vshra.s32 %v2121_v42, 16  ;;  %v2122_v55 = vand.u32 65535, %v2121_v42 }
 0xa8c   :  { %v2125_v20 = vcvt.s32.f32 %v2123_v28  ;;  %v2124_v21 = vcvt.s32.f32 %v2122_v55 }
 0xa8e   :  { %2126 = vmin.xlane.f32.xlu1 %v2125_v20 }
 0xb1b   :  { %v2127_v19 = vpop.xlane.xlu1 %2126 }
 0xb1c   :  { %vm2128_vm9 = vcmp.eq.f32.partialorder %v2125_v20, %v2127_v19  ;;  %v2133_v11 = vcvt.f32.s32 %v2127_v19 }
 0xb1d   :  { %v2129_v2 = vsel %vm2128_vm9, %v2124_v21, inf  ;;  %v2373_v21 = vrot.slane %v2360_v53, %v8076_v58 }
 0xb1e   :  { %2130 = vmin.xlane.f32.xlu0 %v2129_v2  ;;  %v2134_v32 = vshll.u32 %v2133_v11, 16 }
 0xbab   :  { %v2131_v6 = vpop.xlane.xlu0 %2130 }
 0xbac   :  { %v2132_v22 = vcvt.f32.s32 %v2131_v6 }
 0xbae   :  { %v2135_v39 = vadd.s32 %v2134_v32, %v2132_v22 }
 0xbb0   :  { %vm2136_vm10 = vcmp.eq.s32.totalorder %v7948_v7, %v2135_v39 }
 0xbb1   :  { %5662 = vmatmul.mubr.msk.f32.vlgmr.msra.gmra.mrb[18].mxu1 %vm2136_vm10, %v9135_v24  ;;  %6409 = vmatmul.mubr.msk.f32.vlgmr.msra.gmra.mrb[18].mxu0 %vm2136_vm10, %v9135_v24 }
 0xbb2   :  { %2506 = vmatpush1.bf16.msra.mxu1 %v8271_v38  ;;  %6412 = vmatpush3.bf16.msra.mxu0 %v7317_v40  ;;  %v7320_v38 = vld [vmem:[#allocation5 + $0x50] ss:$12 sps:$4 sm:$0xff]  }
 0xbb3   :  { %2507 = vmatprep.subr.bf16.mxu1 %v8273_v46  ;;  %6413 = vmatprep.subr.bf16.mxu0 %v9139_v1  ;;  %v7321_v46 = vld [vmem:[#allocation5 + $0x68] ss:$12 sps:$4 sm:$0xff]  }
 0xbb4   :  { %2537 = vmatprep.mubr.bf16.mxu1 %v9133_v30  ;;  %6427 = vmatprep.mubr.msk.bf16.mxu0 %vm7759_vm0, %v9139_v1 }
 0xbb6   :  { %2508 = vmatpush1.bf16.msra.mxu1 %v8279_v47  ;;  %6414 = vmatpush3.bf16.msra.mxu0 %v7318_v49  ;;  %v7322_v47 = vld [vmem:[#allocation5 + $0x80] ss:$12 sps:$4 sm:$0xff]  }
 0xbb7   :  { %2509 = vmatprep.subr.bf16.mxu1 %v8283_v5  ;;  %6415 = vmatprep.subr.bf16.mxu0 %v9139_v1  ;;  %v7323_v5 = vld [vmem:[#allocation5 + $0x98] ss:$12 sps:$4 sm:$0xff]  }
 0xbba   :  { %2510 = vmatpush1.bf16.msra.mxu1 %v8289_v10  ;;  %6416 = vmatpush3.bf16.msra.mxu0 %v7319_v57  ;;  %v7324_v10 = vld [vmem:[#allocation5 + $0xb0] ss:$12 sps:$4 sm:$0xff]  }
 0xbbb   :  { %2511 = vmatprep.subr.bf16.mxu1 %v8293_v23  ;;  %6417 = vmatprep.subr.bf16.mxu0 %v9139_v1  ;;  %v7325_v23 = vld [vmem:[#allocation8] sm:$0xff]  }
 0xbbe   :  { %2512 = vmatpush1.bf16.msra.mxu1 %v8296_v51  ;;  %6418 = vmatpush3.bf16.msra.mxu0 %v7320_v38  ;;  %v7326_v51 = vld [vmem:[#allocation8 + $0x8] sm:$0xff]  }
 0xbbf   :  { %2513 = vmatprep.subr.bf16.mxu1 %v8300_v4  ;;  %6419 = vmatprep.subr.bf16.mxu0 %v9139_v1  ;;  %v7327_v4 = vld [vmem:[#allocation8 + $0x10] sm:$0xff]  }
 0xbc2   :  { %2514 = vmatpush1.bf16.msra.mxu1 %v8303_v35  ;;  %6420 = vmatpush3.bf16.msra.mxu0 %v7321_v46  ;;  %v7328_v35 = vld [vmem:[#allocation8 + $0x18] sm:$0xff]  }
 0xbc3   :  { %2515 = vmatprep.subr.bf16.mxu1 %v8307_v26  ;;  %6421 = vmatprep.subr.bf16.mxu0 %v9139_v1  ;;  %v7329_v26 = vld [vmem:[#allocation8 + $0x20] sm:$0xff]  }
 0xbc6   :  { %2516 = vmatpush1.bf16.msra.mxu1 %v8310_v60  ;;  %6422 = vmatpush3.bf16.msra.mxu0 %v7322_v47  ;;  %v7330_v60 = vld [vmem:[#allocation8 + $0x28] sm:$0xff]  }
 0xbc7   :  { %2517 = vmatprep.subr.bf16.mxu1 %v8314_v8  ;;  %6423 = vmatprep.subr.bf16.mxu0 %v9139_v1  ;;  %v7331_v8 = vld [vmem:[#allocation8 + $0x30] sm:$0xff]  }
 0xbca   :  { %2518 = vmatpush1.bf16.msra.mxu1 %v8317_v62  ;;  %6424 = vmatpush3.bf16.msra.mxu0 %v7323_v5  ;;  %v7332_v62 = vld [vmem:[#allocation8 + $0x38] sm:$0xff]  }
 0xbcb   :  { %2519 = vmatprep.subr.bf16.mxu1 %v8321_v43  ;;  %6425 = vmatprep.subr.bf16.mxu0 %v9139_v1 }
 0xbce   :  { %2520 = vmatpush1.bf16.msra.mxu1 %v8324_v17  ;;  %6426 = vmatpush3.bf16.msra.mxu0 %v7324_v10 }
 0xbcf   :  { %6431 = vmatprep.subr.bf16.mxu1 %v9139_v1 }
 0xbd1   :  { %2538 = vmatmul.mubr.bf16.vlgmr.msra.gmra.mrb[24].mxu1 %v8368_v48  ;;  %6428 = vmatmul.mubr.bf16.vlgmr.msra.gmra.mrb[28].mxu0 %v8368_v48 }
 0xbd2   :  { %6447 = vmatprep.mubr.msk.bf16.mxu1 %vm7759_vm0, %v9139_v1  ;;  %2927 = vmatprep.mubr.f32.mxu0 %v9139_v1 }
 0xbd3   :  { %6432 = vmatpush3.bf16.msra.mxu1 %v7325_v23 }
 0xbd4   :  { %6433 = vmatprep.subr.bf16.mxu1 %v9139_v1 }
 0xbd7   :  { %6434 = vmatpush3.bf16.msra.mxu1 %v7326_v51 }
 0xbd8   :  { %6435 = vmatprep.subr.bf16.mxu1 %v9139_v1 }
 0xbdb   :  { %6436 = vmatpush3.bf16.msra.mxu1 %v7327_v4 }
 0xbdc   :  { %6437 = vmatprep.subr.bf16.mxu1 %v9139_v1 }
 0xbdf   :  { %6438 = vmatpush3.bf16.msra.mxu1 %v7328_v35 }
 0xbe0   :  { %6439 = vmatprep.subr.bf16.mxu1 %v9139_v1 }
 0xbe3   :  { %6440 = vmatpush3.bf16.msra.mxu1 %v7329_v26 }
 0xbe4   :  { %6441 = vmatprep.subr.bf16.mxu1 %v9139_v1 }
 0xbe7   :  { %6442 = vmatpush3.bf16.msra.mxu1 %v7330_v60 }
 0xbe8   :  { %6443 = vmatprep.subr.bf16.mxu1 %v9139_v1 }
 0xbeb   :  { %6444 = vmatpush3.bf16.msra.mxu1 %v7331_v8  ;;  %v2819_v8 = vld [vmem:[#allocation2 + $0x20] sm:$0xff] }
 0xbec   :  { %6445 = vmatprep.subr.bf16.mxu1 %v9139_v1 }
 0xbef   :  { %6446 = vmatpush3.bf16.msra.mxu1 %v7332_v62  ;;  %v2815_v62 = vld [vmem:[#allocation2] sm:$0xff] }
 0xbf0   :  { %7007 = vmatprep.subr.bf16.mxu1 %v9137_v0 }
 0xc84   :  { %v2253_v43 = vpop.f32.mrb[18].mxu1  ;;  %v2324_v17 = vpop.f32.mrb[18].mxu0 }
 0xc85   :  { %v2255_v15 = vpop.f32.mrb[19].mxu1  ;;  %v6410_v36 = vpop.f32.mrb[19].mxu0 }
 0xc86   :  { %v2820_v36 = vld [vmem:[#allocation2 + $0x28] sm:$0xff] }
 0xca4   :  { %v2539_v9 = vpop.f32.mrb[24].mxu1  ;;  %v2580_v33 = vpop.f32.mrb[28].mxu0 }
 0xca5   :  { %v2540_v12 = vadd.f32 %v2539_v9, %v2365_v18  ;;  %v2541_v45 = vpop.f32.mrb[25].mxu1  ;;  %v6429_v3 = vpop.f32.mrb[29].mxu0  ;;  %v2581_v11 = vadd.f32 %v2580_v33, %v2373_v21  ;;  %v2825_v9 = vld [vmem:[#allocation2 + $0x50] sm:$0xff] }
 0xca6   :  { %v2542_v27 = vadd.f32 %v2541_v45, %v2369_v37  ;;  %v2543_v29 = vpop.f32.mrb[26].mxu1  ;;  %v2583_v48 = vpop.f32.mrb[30].mxu0  ;;  %v2822_v37 = vld [vmem:[#allocation2 + $0x38] sm:$0xff]  ;;  %v2821_v33 = vld [vmem:[#allocation2 + $0x30] sm:$0xff]  ;;  %v2824_v45 = vld [vmem:[#allocation2 + $0x48] sm:$0xff] }
 0xca7   :  { %v2586_v50 = vadd.f32 %v2540_v12, %v2253_v43  ;;  %v2544_v63 = vpop.f32.mrb[27].mxu1  ;;  %v6430_v13 = vpop.f32.mrb[31].mxu0  ;;  %v8477_v12 = vpack.c.bf16 %v2825_v9, %v2822_v37  ;;  %v2823_v3 = vld [vmem:[#allocation2 + $0x40] sm:$0xff]  ;;  %v8481_v29 = vpack.c.bf16 %v2824_v45, %v2821_v33  ;;  %v2848_v37 = vld [vmem:[#allocation2 + $0x108] sm:$0xff]  ;;  %v2850_v33 = vld [vmem:[#allocation2 + $0x118] sm:$0xff] }
 0xca8   :  { %v2593_v31 = vadd.f32 %v2542_v27, %v2255_v15  ;;  %v2817_v15 = vld [vmem:[#allocation2 + $0x10] sm:$0xff]  ;;  %v2826_v27 = vld [vmem:[#allocation2 + $0x58] sm:$0xff]  ;;  %v2831_v63 = vld [vmem:[#allocation2 + $0x80] sm:$0xff] }
 0xca9   :  { %v5688_v42 = vmul.f32 -1.442695, %v2586_v50  ;;  %v8474_v18 = vpack.c.bf16 %v2820_v36, %v2817_v15  ;;  %v8483_v48 = vpack.c.bf16 %v2826_v27, %v2823_v3  ;;  %v2828_v50 = vld [vmem:[#allocation2 + $0x68] sm:$0xff]  ;;  %v2827_v13 = vld [vmem:[#allocation2 + $0x60] sm:$0xff]  ;;  %v2845_v15 = vld [vmem:[#allocation2 + $0xf0] sm:$0xff] }
 0xcaa   :  { %v5689_v28 = vmul.f32 -1.442695, %v2593_v31  ;;  %v8487_v31 = vpack.c.bf16 %v2831_v63, %v2828_v50  ;;  %v2847_v9 = vld [vmem:[#allocation2 + $0x100] sm:$0xff]  ;;  %v2852_v45 = vld [vmem:[#allocation2 + $0x128] sm:$0xff]  ;;  %v8521_v27 = vpack.c.bf16 %v2848_v37, %v2845_v15 }
 0xcab   :  { %7475 = vpow2.f32 %v5688_v42  ;;  %v2830_v42 = vld [vmem:[#allocation2 + $0x78] sm:$0xff]  ;;  %v2855_v3 = vld [vmem:[#allocation2 + $0x140] sm:$0xff]  ;;  %v8523_v50 = vpack.c.bf16 %v2850_v33, %v2847_v9 }
 0xcac   :  { %7477 = vpow2.f32 %v5689_v28  ;;  %v2829_v28 = vld [vmem:[#allocation2 + $0x70] sm:$0xff]  ;;  %v8491_v21 = vpack.c.bf16 %v2830_v42, %v2827_v13  ;;  %v2851_v63 = vld [vmem:[#allocation2 + $0x120] sm:$0xff]  ;;  %v8527_v13 = vpack.c.bf16 %v2855_v3, %v2852_v45  ;;  %v2854_v42 = vld [vmem:[#allocation2 + $0x138] sm:$0xff] }
 0xcad   :  { %v8555_v3 = vld [vmem:[#allocation5] ss:$12 sps:$4 sm:$0xff]  }
 0xcb5   :  { %v7476_v20 = vpop.eup %7475 }
 0xcb6   :  { %v2590_v55 = vadd.f32 1.0, %v7476_v20  ;;  %v7478_v19 = vpop.eup %7477  ;;  %v2832_v20 = vld [vmem:[#allocation2 + $0x88] sm:$0xff] }
 0xcb7   :  { %v2597_v2 = vadd.f32 1.0, %v7478_v19  ;;  %v2837_v19 = vld [vmem:[#allocation2 + $0xb0] sm:$0xff] }
 0xcb8   :  { %7479 = vrcp.f32 %v2590_v55  ;;  %v2834_v55 = vld [vmem:[#allocation2 + $0x98] sm:$0xff] }
 0xcb9   :  { %7481 = vrcp.f32 %v2597_v2  ;;  %v8493_v2 = vpack.c.bf16 %v2832_v20, %v2829_v28  ;;  %v2853_v28 = vld [vmem:[#allocation2 + $0x130] sm:$0xff]  ;;  %v2856_v20 = vld [vmem:[#allocation2 + $0x148] sm:$0xff] }
 0xcc2   :  { %v7480_v6 = vpop.eup %7479 }
 0xcc3   :  { %v2600_v32 = vmul.f32 %v7480_v6, %v2581_v11  ;;  %v7482_v39 = vpop.eup %7481  ;;  %v2833_v11 = vld [vmem:[#allocation2 + $0x90] sm:$0xff]  ;;  %v8497_v6 = vpack.c.bf16 %v2837_v19, %v2834_v55  ;;  %v8531_v55 = vpack.c.bf16 %v2854_v42, %v2851_v63  ;;  %v8533_v19 = vpack.c.bf16 %v2856_v20, %v2853_v28  ;;  %v8557_v42 = vld [vmem:[#allocation5 + $0x1c] ss:$12 sps:$4 sm:$0xff]   ;;  %v8563_v28 = vld [vmem:[#allocation5 + $0x18] ss:$12 sps:$4 sm:$0xff]  }
 0xcc4   :  { %v2603_v40 = vsub.f32 1.0, %v7482_v39  ;;  %v2605_v38 = vmul.f32 %v7482_v39, %v8364_v41  ;;  %v2838_v39 = vld [vmem:[#allocation2 + $0xb8] sm:$0xff]  ;;  %v7336_v63 = vld [vmem:[#allocation5 + $0x8] ss:$12 sps:$4 sm:$0xff]   ;;  %v7340_v20 = vld [vmem:[#allocation5 + $0x20] ss:$12 sps:$4 sm:$0xff]  }
 0xcc5   :  { %v2601_v22 = vadd.f32 %v2600_v32, %v2324_v17  ;;  %v2818_v17 = vld [vmem:[#allocation2 + $0x18] sm:$0xff]  ;;  %v2836_v32 = vld [vmem:[#allocation2 + $0xa8] sm:$0xff] }
 0xcc6   :  { %v8472_v53 = vpack.c.bf16 %v2818_v17, %v2815_v62 }
 0xcc7   :  { %7483 = vtanh.f32 %v2601_v22  ;;  %v2835_v22 = vld [vmem:[#allocation2 + $0xa0] sm:$0xff] }
 0xcd1   :  { %v7484_v49 = vpop.eup %7483 }
 0xcd2   :  { %v2604_v57 = vmul.f32 %v7484_v49, %v2603_v40  ;;  %v2840_v40 = vld [vmem:[#allocation2 + $0xc8] sm:$0xff]  ;;  %v2843_v49 = vld [vmem:[#allocation2 + $0xe0] sm:$0xff] }
 0xcd4   :  { %v8446_v46 = vadd.f32 %v2605_v38, %v2604_v57  ;;  %v8501_v57 = vpack.c.bf16 %v2836_v32, %v2833_v11  ;;  %v8503_v38 = vpack.c.bf16 %v2838_v39, %v2835_v22 }
 0xcd6   :  { %v8450_v47 = vpack.c.bf16 %v8446_v46, %v8446_v46 }
 0xcd8   :  { %6448 = vmatmul.mubr.bf16.vlgmr.msra.gmra.mrb[28].mxu1 %v8450_v47 }
 0xcd9   :  { %6483 = vmatprep.mubr.msk.f32.mxu1 %vm7759_vm0, %v9139_v1  ;;  %7009 = vmatpush3.bf16.msra.mxu1 %v8474_v18 }
 0xcda   :  { %7010 = vmatprep.subr.bf16.mxu1 %v9137_v0 }
 0xcdd   :  { %7012 = vmatpush3.bf16.msra.mxu1 %v8483_v48 }
 0xcde   :  { %7013 = vmatprep.subr.bf16.mxu1 %v9137_v0 }
 0xce1   :  { %7015 = vmatpush3.bf16.msra.mxu1 %v8493_v2 }
 0xce2   :  { %7016 = vmatprep.subr.bf16.mxu1 %v9137_v0 }
 0xce5   :  { %7018 = vmatpush3.bf16.msra.mxu1 %v8503_v38 }
 0xce6   :  { %7019 = vmatprep.subr.bf16.mxu1 %v9137_v0 }
 0xdab   :  { %v2713_v5 = vpop.f32.mrb[28].mxu1 }
 0xdac   :  { %v8456_v10 = vadd.f32 %v8389_v34, %v2713_v5  ;;  %v6449_v23 = vpop.f32.mrb[29].mxu1  ;;  %v2816_v34 = vld [vmem:[#allocation2 + $0x8] sm:$0xff]  ;;  %v2839_v5 = vld [vmem:[#allocation2 + $0xc0] sm:$0xff] }
 0xdad   :  { %v2716_v51 = vpop.f32.mrb[30].mxu1  ;;  %v8470_v43 = vpack.c.bf16 %v2819_v8, %v2816_v34  ;;  %v8507_v23 = vpack.c.bf16 %v2843_v49, %v2840_v40  ;;  %v2846_v34 = vld [vmem:[#allocation2 + $0xf8] sm:$0xff]  ;;  %v2849_v8 = vld [vmem:[#allocation2 + $0x110] sm:$0xff] }
 0xdae   :  { %9147 = vst [vmem:[#allocation22_spill] sm:$0xff] %v8456_v10  ;;  %2719 = vmax.xlane.f32.xlu1 %v8456_v10  ;;  %v6450_v41 = vpop.f32.mrb[31].mxu1  ;;  %v2842_v51 = vld [vmem:[#allocation2 + $0xd8] sm:$0xff]  ;;  %v8517_v36 = vpack.c.bf16 %v2849_v8, %v2846_v34  ;;  %v2861_v49 = vld [vmem:[#allocation2 + $0x170] sm:$0xff] }
 0xdaf   :  { %6976 = vmatprep.subr.bf16.mxu0 %v8470_v43  ;;  %v2841_v41 = vld [vmem:[#allocation2 + $0xd0] sm:$0xff]  ;;  %v8511_v62 = vpack.c.bf16 %v2842_v51, %v2839_v5  ;;  %v2858_v40 = vld [vmem:[#allocation2 + $0x158] sm:$0xff] }
 0xdb0   :  { %6978 = vmatpush1.bf16.msra.mxu0 %v8472_v53  ;;  %v8542_v5 = vpack.c.bf16 %v2861_v49, %v2858_v40  ;;  %v2857_v51 = vld [vmem:[#allocation2 + $0x150] sm:$0xff]  ;;  %v2862_v8 = vld [vmem:[#allocation2 + $0x178] sm:$0xff] }
 0xdb1   :  { %6980 = vmatprep.subr.bf16.mxu0 %v8477_v12  ;;  %v8580_v40 = vld [vmem:[#allocation5 + $0x48] ss:$12 sps:$4 sm:$0xff]   ;;  %v7348_v49 = vld [vmem:[#allocation5 + $0x50] ss:$12 sps:$4 sm:$0xff]  }
 0xdb4   :  { %6982 = vmatpush1.bf16.msra.mxu0 %v8481_v29 }
 0xdb5   :  { %6984 = vmatprep.subr.bf16.mxu0 %v8487_v31 }
 0xdb8   :  { %6986 = vmatpush1.bf16.msra.mxu0 %v8491_v21 }
 0xdb9   :  { %6988 = vmatprep.subr.bf16.mxu0 %v8497_v6 }
 0xdbc   :  { %6990 = vmatpush1.bf16.msra.mxu0 %v8501_v57 }
 0xdbd   :  { %6992 = vmatprep.subr.bf16.mxu0 %v8507_v23 }
 0xdc0   :  { %6994 = vmatpush1.bf16.msra.mxu0 %v8511_v62 }
 0xdc1   :  { %6996 = vmatprep.subr.bf16.mxu0 %v8517_v36 }
 0xdc4   :  { %6998 = vmatpush1.bf16.msra.mxu0 %v8521_v27 }
 0xdc5   :  { %7000 = vmatprep.subr.bf16.mxu0 %v8527_v13 }
 0xdc8   :  { %7002 = vmatpush1.bf16.msra.mxu0 %v8531_v55 }
 0xdc9   :  { %7004 = vmatprep.subr.bf16.mxu0 %v8542_v5 }
 0xe3b   :  { %v8459_v4 = vpop.xlane.xlu1 %2719 }
 0xe3c   :  { %vm2796_vm11 = vcmp.eq.f32.partialorder %v8456_v10, %v8459_v4 }
 0xe3d   :  { %v8464_v35 = vsel %vm2796_vm11, %v7948_v7, 128 }
 0xe3e   :  { %v2799_v26 = vshra.s32 %v8464_v35, 16  ;;  %v2798_v11 = vand.u32 65535, %v8464_v35  ;;  %v8551_v35 = vld [vmem:[#allocation5 + $0x4] ss:$12 sps:$4 sm:$0xff]  }
 0xe40   :  { %v8467_v60 = vcvt.s32.f32 %v2799_v26  ;;  %v2844_v26 = vld [vmem:[#allocation2 + $0xe8] sm:$0xff]  ;;  %v2800_v22 = vcvt.s32.f32 %v2798_v11  ;;  %v8567_v11 = vld [vmem:[#allocation5 + $0x34] ss:$12 sps:$4 sm:$0xff]  }
 0xe41   :  { %v8513_v17 = vpack.c.bf16 %v2844_v26, %v2841_v41  ;;  %v2860_v41 = vld [vmem:[#allocation2 + $0x168] sm:$0xff]  ;;  %v2859_v26 = vld [vmem:[#allocation2 + $0x160] sm:$0xff] }
 0xe42   :  { %2802 = vmin.xlane.f32.xlu0 %v8467_v60  ;;  %v8544_v34 = vpack.c.bf16 %v2860_v41, %v2857_v51  ;;  %v8547_v15 = vpack.c.bf16 %v2862_v8, %v2859_v26  ;;  %v8584_v51 = vld [vmem:[#allocation5 + $0x64] ss:$12 sps:$4 sm:$0xff]   ;;  %v8587_v41 = vld [vmem:[#allocation5 + $0x60] ss:$12 sps:$4 sm:$0xff]   ;;  %v7352_v26 = vld [vmem:[#allocation5 + $0x68] ss:$12 sps:$4 sm:$0xff]  }
 0xe43   :  { %7021 = vmatpush3.bf16.msra.mxu1 %v8513_v17  ;;  %v8591_v8 = vld [vmem:[#allocation5 + $0x7c] ss:$12 sps:$4 sm:$0xff]  }
 0xe44   :  { %7022 = vmatprep.subr.bf16.mxu1 %v9137_v0  ;;  %7006 = vmatpush1.bf16.msra.mxu0 %v8544_v34 }
 0xe45   :  { %3181 = vmatprep.subr.bf16.mxu0 %v8551_v35 }
 0xe47   :  { %7024 = vmatpush3.bf16.msra.mxu1 %v8523_v50 }
 0xe48   :  { %7025 = vmatprep.subr.bf16.mxu1 %v9137_v0 }
 0xe4b   :  { %7027 = vmatpush3.bf16.msra.mxu1 %v8533_v19 }
 0xe4c   :  { %7028 = vmatprep.subr.bf16.mxu1 %v9137_v0 }
 0xe4f   :  { %7030 = vmatpush3.bf16.msra.mxu1 %v8547_v15 }
 0xe50   :  { %6486 = vmatprep.subr.bf16.mxu1 %v9139_v1 }
 0xecf   :  { %v2803_v32 = vpop.xlane.xlu0 %2802 }
 0xed0   :  { %vm2804_vm12 = vcmp.eq.f32.partialorder %v8467_v60, %v2803_v32  ;;  %v2809_v60 = vcvt.f32.s32 %v2803_v32  ;;  %v8573_v32 = vld [vmem:[#allocation5 + $0x30] ss:$12 sps:$4 sm:$0xff]  }
 0xed1   :  { %v2805_v39 = vsel %vm2804_vm12, %v2800_v22, inf  ;;  %v7344_v22 = vld [vmem:[#allocation5 + $0x38] ss:$12 sps:$4 sm:$0xff]  }
 0xed2   :  { %2806 = vmin.xlane.f32.xlu1 %v2805_v39  ;;  %v2810_v9 = vshll.u32 %v2809_v60, 16  ;;  %v8577_v39 = vld [vmem:[#allocation5 + $0x4c] ss:$12 sps:$4 sm:$0xff]  }
 0xed3   :  { %v8594_v60 = vld [vmem:[#allocation5 + $0x78] ss:$12 sps:$4 sm:$0xff]  }
 0xf5f   :  { %v2807_v37 = vpop.xlane.xlu1 %2806 }
 0xf60   :  { %v2808_v33 = vcvt.f32.s32 %v2807_v37  ;;  %v7356_v37 = vld [vmem:[#allocation5 + $0x80] ss:$12 sps:$4 sm:$0xff]  }
 0xf62   :  { %v2811_v45 = vadd.s32 %v2810_v9, %v2808_v33  ;;  %v8598_v9 = vld [vmem:[#allocation5 + $0x94] ss:$12 sps:$4 sm:$0xff]   ;;  %v8601_v33 = vld [vmem:[#allocation5 + $0x90] ss:$12 sps:$4 sm:$0xff]  }
 0xf64   :  { %vm2812_vm13 = vcmp.eq.s32.totalorder %v7948_v7, %v2811_v45  ;;  %v7360_v45 = vld [vmem:[#allocation5 + $0x98] ss:$12 sps:$4 sm:$0xff]  }
 0xf65   :  { %5704 = vmatmul.mubr.msk.f32.vlgmr.msra.gmra.mrb[32].mxu0 %vm2812_vm13, %v9135_v24  ;;  %6484 = vmatmul.mubr.msk.f32.vlgmr.msra.gmra.mrb[32].mxu1 %vm2812_vm13, %v9135_v24 }
 0xf66   :  { %3182 = vmatpush1.bf16.msra.mxu0 %v8555_v3  ;;  %6487 = vmatpush3.bf16.msra.mxu1 %v7336_v63  ;;  %v8605_v63 = vld [vmem:[#allocation5 + $0xac] ss:$12 sps:$4 sm:$0xff]  }
 0xf67   :  { %3183 = vmatprep.subr.bf16.mxu0 %v8557_v42  ;;  %6488 = vmatprep.subr.bf16.mxu1 %v9139_v1 }
 0xf68   :  { %3213 = vmatprep.mubr.bf16.mxu0 %v9133_v30  ;;  %6502 = vmatprep.mubr.msk.bf16.mxu1 %vm7759_vm0, %v9139_v1 }
 0xf6a   :  { %3184 = vmatpush1.bf16.msra.mxu0 %v8563_v28  ;;  %6489 = vmatpush3.bf16.msra.mxu1 %v7340_v20  ;;  %v8608_v20 = vld [vmem:[#allocation5 + $0xa8] ss:$12 sps:$4 sm:$0xff]  }
 0xf6b   :  { %3185 = vmatprep.subr.bf16.mxu0 %v8567_v11  ;;  %6490 = vmatprep.subr.bf16.mxu1 %v9139_v1 }
 0xf6e   :  { %3186 = vmatpush1.bf16.msra.mxu0 %v8573_v32  ;;  %6491 = vmatpush3.bf16.msra.mxu1 %v7344_v22  ;;  %v7364_v22 = vld [vmem:[#allocation5 + $0xb0] ss:$12 sps:$4 sm:$0xff]  }
 0xf6f   :  { %3187 = vmatprep.subr.bf16.mxu0 %v8577_v39  ;;  %6492 = vmatprep.subr.bf16.mxu1 %v9139_v1 }
 0xf72   :  { %3188 = vmatpush1.bf16.msra.mxu0 %v8580_v40  ;;  %6493 = vmatpush3.bf16.msra.mxu1 %v7348_v49 }
 0xf73   :  { %3189 = vmatprep.subr.bf16.mxu0 %v8584_v51  ;;  %6494 = vmatprep.subr.bf16.mxu1 %v9139_v1 }
 0xf76   :  { %3190 = vmatpush1.bf16.msra.mxu0 %v8587_v41  ;;  %6495 = vmatpush3.bf16.msra.mxu1 %v7352_v26 }
 0xf77   :  { %3191 = vmatprep.subr.bf16.mxu0 %v8591_v8  ;;  %6496 = vmatprep.subr.bf16.mxu1 %v9139_v1 }
 0xf7a   :  { %3192 = vmatpush1.bf16.msra.mxu0 %v8594_v60  ;;  %6497 = vmatpush3.bf16.msra.mxu1 %v7356_v37 }
 0xf7b   :  { %3193 = vmatprep.subr.bf16.mxu0 %v8598_v9  ;;  %6498 = vmatprep.subr.bf16.mxu1 %v9139_v1 }
 0xf7e   :  { %3194 = vmatpush1.bf16.msra.mxu0 %v8601_v33  ;;  %6499 = vmatpush3.bf16.msra.mxu1 %v7360_v45 }
 0xf7f   :  { %3195 = vmatprep.subr.bf16.mxu0 %v8605_v63  ;;  %6500 = vmatprep.subr.bf16.mxu1 %v9139_v1 }
 0xf82   :  { %3196 = vmatpush1.bf16.msra.mxu0 %v8608_v20  ;;  %6501 = vmatpush3.bf16.msra.mxu1 %v7364_v22 }
 0xf83   :  { %6506 = vmatprep.subr.bf16.mxu0 %v9139_v1  ;;  %7032 = vmatprep.subr.bf16.mxu1 %v8470_v43  ;;  %v7366_v43 = vld [vmem:[#allocation8 + $0x8] sm:$0xff]  }
 0xf85   :  { %3214 = vmatmul.mubr.bf16.vlgmr.msra.gmra.mrb[36].mxu0 %v8450_v47  ;;  %6503 = vmatmul.mubr.bf16.vlgmr.msra.gmra.mrb[36].mxu1 %v8450_v47  ;;  %v7365_v47 = vld [vmem:[#allocation8] sm:$0xff]  }
 0xf86   :  { %6522 = vmatprep.mubr.msk.bf16.mxu0 %vm7759_vm0, %v9139_v1  ;;  %7034 = vmatpush1.bf16.msra.mxu1 %v8472_v53  ;;  %v7367_v53 = vld [vmem:[#allocation8 + $0x10] sm:$0xff]  }
 0xf87   :  { %7036 = vmatprep.subr.bf16.mxu1 %v8477_v12  ;;  %3603 = vmatprep.mubr.f32.mxu1 %v9139_v1  ;;  %v7368_v12 = vld [vmem:[#allocation8 + $0x18] sm:$0xff]  }
 0xf88   :  { %6507 = vmatpush3.bf16.msra.mxu0 %v7365_v47 }
 0xf89   :  { %6508 = vmatprep.subr.bf16.mxu0 %v9139_v1 }
 0xf8a   :  { %7038 = vmatpush1.bf16.msra.mxu1 %v8481_v29  ;;  %v7369_v29 = vld [vmem:[#allocation8 + $0x20] sm:$0xff]  }
 0xf8b   :  { %7040 = vmatprep.subr.bf16.mxu1 %v8487_v31  ;;  %v7370_v31 = vld [vmem:[#allocation8 + $0x28] sm:$0xff]  }
 0xf8c   :  { %6509 = vmatpush3.bf16.msra.mxu0 %v7366_v43 }
 0xf8d   :  { %6510 = vmatprep.subr.bf16.mxu0 %v9139_v1 }
 0xf8e   :  { %7042 = vmatpush1.bf16.msra.mxu1 %v8491_v21  ;;  %v7371_v21 = vld [vmem:[#allocation8 + $0x30] sm:$0xff]  }
 0xf8f   :  { %7044 = vmatprep.subr.bf16.mxu1 %v8497_v6  ;;  %v7372_v6 = vld [vmem:[#allocation8 + $0x38] sm:$0xff]  }
 0xf90   :  { %6511 = vmatpush3.bf16.msra.mxu0 %v7367_v53 }
 0xf91   :  { %6512 = vmatprep.subr.bf16.mxu0 %v9139_v1 }
 0xf92   :  { %7046 = vmatpush1.bf16.msra.mxu1 %v8501_v57 }
 0xf93   :  { %7048 = vmatprep.subr.bf16.mxu1 %v8507_v23 }
 0xf94   :  { %6513 = vmatpush3.bf16.msra.mxu0 %v7368_v12 }
 0xf95   :  { %6514 = vmatprep.subr.bf16.mxu0 %v9139_v1 }
 0xf96   :  { %7050 = vmatpush1.bf16.msra.mxu1 %v8511_v62 }
 0xf97   :  { %7052 = vmatprep.subr.bf16.mxu1 %v8517_v36 }
 0xf98   :  { %6515 = vmatpush3.bf16.msra.mxu0 %v7369_v29 }
 0xf99   :  { %6516 = vmatprep.subr.bf16.mxu0 %v9139_v1 }
 0xf9a   :  { %7054 = vmatpush1.bf16.msra.mxu1 %v8521_v27  ;;  %v3036_v27 = vld [vmem:[#allocation7] sm:$0x7] }
 0xf9b   :  { %7056 = vmatprep.subr.bf16.mxu1 %v8527_v13  ;;  %v3041_v13 = vrot.slane %v3036_v27, %v8068_v59  ;;  %v3049_v30 = vrot.slane %v3036_v27, %v8076_v58 }
 0xf9c   :  { %6517 = vmatpush3.bf16.msra.mxu0 %v7370_v31 }
 0xf9d   :  { %6518 = vmatprep.subr.bf16.mxu0 %v9139_v1 }
 0xf9e   :  { %7058 = vmatpush1.bf16.msra.mxu1 %v8531_v55  ;;  %v3045_v55 = vrot.slane %v3036_v27, %v8071_v61 }
 0xf9f   :  { %7060 = vmatprep.subr.bf16.mxu1 %v8542_v5 }
 0xfa0   :  { %6519 = vmatpush3.bf16.msra.mxu0 %v7371_v21 }
 0xfa1   :  { %6520 = vmatprep.subr.bf16.mxu0 %v9139_v1 }
 0xfa2   :  { %7062 = vmatpush1.bf16.msra.mxu1 %v8544_v34 }
 0xfa3   :  { %3857 = vmatprep.subr.bf16.mxu1 %v8551_v35 }
 0xfa4   :  { %6521 = vmatpush3.bf16.msra.mxu0 %v7372_v6 }
 0xfa5   :  { %7063 = vmatprep.subr.bf16.mxu0 %v9137_v0 }
0x1038   :  { %v2929_v57 = vpop.f32.mrb[32].mxu0  ;;  %v3000_v23 = vpop.f32.mrb[32].mxu1 }
0x1039   :  { %v2931_v62 = vpop.f32.mrb[33].mxu0  ;;  %v6485_v36 = vpop.f32.mrb[33].mxu1 }
0x1058   :  { %v3215_v5 = vpop.f32.mrb[36].mxu0  ;;  %v3256_v34 = vpop.f32.mrb[36].mxu1 }
0x1059   :  { %v3216_v35 = vadd.f32 %v3215_v5, %v3041_v13  ;;  %v3217_v49 = vpop.f32.mrb[37].mxu0  ;;  %v6504_v26 = vpop.f32.mrb[37].mxu1  ;;  %v3257_v5 = vadd.f32 %v3256_v34, %v3049_v30  ;;  %v8673_v30 = vld [vmem:[#allocation10] ss:$0 sm:$0xff] }
0x105a   :  { %v3218_v37 = vadd.f32 %v3217_v49, %v3045_v55  ;;  %v3219_v45 = vpop.f32.mrb[38].mxu0  ;;  %v3259_v22 = vpop.f32.mrb[38].mxu1 }
0x105b   :  { %v3262_v47 = vadd.f32 %v3216_v35, %v2929_v57  ;;  %v3220_v43 = vpop.f32.mrb[39].mxu0  ;;  %v6505_v53 = vpop.f32.mrb[39].mxu1 }
0x105c   :  { %v3269_v12 = vadd.f32 %v3218_v37, %v2931_v62 }
0x105d   :  { %v5730_v29 = vmul.f32 -1.442695, %v3262_v47 }
0x105e   :  { %v5731_v31 = vmul.f32 -1.442695, %v3269_v12 }
0x105f   :  { %7485 = vpow2.f32 %v5730_v29 }
0x1060   :  { %7487 = vpow2.f32 %v5731_v31 }
0x1069   :  { %v7486_v21 = vpop.eup %7485 }
0x106a   :  { %v3266_v6 = vadd.f32 1.0, %v7486_v21  ;;  %v7488_v36 = vpop.eup %7487 }
0x106b   :  { %v3273_v13 = vadd.f32 1.0, %v7488_v36  ;;  %v7374_v36 = vld [vmem:[#allocation5 + $0x20] ss:$12 sps:$4 sm:$0xff]  }
0x106c   :  { %7489 = vrcp.f32 %v3266_v6  ;;  %v7373_v6 = vld [vmem:[#allocation5 + $0x8] ss:$12 sps:$4 sm:$0xff]  }
0x106d   :  { %7491 = vrcp.f32 %v3273_v13  ;;  %v9148_v13 = vmov 0  }
0x1076   :  { %v7490_v26 = vpop.eup %7489 }
0x1077   :  { %v3276_v55 = vmul.f32 %v7490_v26, %v3257_v5  ;;  %v7492_v57 = vpop.eup %7491  ;;  %v7375_v5 = vld [vmem:[#allocation5 + $0x38] ss:$12 sps:$4 sm:$0xff]  }
0x1078   :  { %v3279_v35 = vsub.f32 1.0, %v7492_v57  ;;  %v3281_v45 = vmul.f32 %v7492_v57, %v8446_v46 }
0x1079   :  { %v3277_v49 = vadd.f32 %v3276_v55, %v3000_v23 }
0x107b   :  { %7493 = vtanh.f32 %v3277_v49  ;;  %v3712_v49 = vld [vmem:[#allocation7] sm:$0x7] }
0x107c   :  { %v3717_v57 = vrot.slane %v3712_v49, %v8068_v59 }
0x1085   :  { %v7494_v62 = vpop.eup %7493 }
0x1086   :  { %v3280_v37 = vmul.f32 %v7494_v62, %v3279_v35  ;;  %v3721_v35 = vrot.slane %v3712_v49, %v8071_v61 }
0x1088   :  { %v8648_v22 = vadd.f32 %v3281_v45, %v3280_v37 }
0x108a   :  { %v8652_v47 = vpack.c.bf16 %v8648_v22, %v8648_v22 }
0x108c   :  { %6523 = vmatmul.mubr.bf16.vlgmr.msra.gmra.mrb[40].mxu0 %v8652_v47 }
0x108d   :  { %7065 = vmatpush3.bf16.msra.mxu0 %v8474_v18  ;;  %6558 = vmatprep.mubr.msk.f32.mxu0 %vm7759_vm0, %v9139_v1 }
0x108e   :  { %7066 = vmatprep.subr.bf16.mxu0 %v9137_v0 }
0x1091   :  { %7068 = vmatpush3.bf16.msra.mxu0 %v8483_v48 }
0x1092   :  { %7069 = vmatprep.subr.bf16.mxu0 %v9137_v0 }
0x1095   :  { %7071 = vmatpush3.bf16.msra.mxu0 %v8493_v2 }
0x1096   :  { %7072 = vmatprep.subr.bf16.mxu0 %v9137_v0 }
0x1099   :  { %7074 = vmatpush3.bf16.msra.mxu0 %v8503_v38 }
0x109a   :  { %7075 = vmatprep.subr.bf16.mxu0 %v9137_v0 }
0x109d   :  { %7077 = vmatpush3.bf16.msra.mxu0 %v8513_v17 }
0x109e   :  { %7078 = vmatprep.subr.bf16.mxu0 %v9137_v0 }
0x10a1   :  { %7080 = vmatpush3.bf16.msra.mxu0 %v8523_v50 }
0x10a2   :  { %7081 = vmatprep.subr.bf16.mxu0 %v9137_v0 }
0x10a5   :  { %7083 = vmatpush3.bf16.msra.mxu0 %v8533_v19 }
0x10a6   :  { %7084 = vmatprep.subr.bf16.mxu0 %v9137_v0 }
0x10a9   :  { %7086 = vmatpush3.bf16.msra.mxu0 %v8547_v15 }
0x10aa   :  { %6561 = vmatprep.subr.bf16.mxu0 %v9139_v1 }
0x115f   :  { %v3389_v46 = vpop.f32.mrb[40].mxu0 }
0x1160   :  { %v8676_v18 = vadd.f32 %v8673_v30, %v3389_v46  ;;  %v6524_v48 = vpop.f32.mrb[41].mxu0 }
0x1161   :  { %v3392_v2 = vpop.f32.mrb[42].mxu0 }
0x1162   :  { %3395 = vmax.xlane.f32.xlu0 %v8676_v18  ;;  %v6525_v38 = vpop.f32.mrb[43].mxu0 }
0x11ef   :  { %v8679_v17 = vpop.xlane.xlu0 %3395 }
0x11f0   :  { %vm3472_vm14 = vcmp.eq.f32.partialorder %v8676_v18, %v8679_v17 }
0x11f1   :  { %v3473_v50 = vsel %vm3472_vm14, %v7948_v7, 128 }
0x11f2   :  { %v3475_v19 = vshra.s32 %v3473_v50, 16  ;;  %v3474_v23 = vand.u32 65535, %v3473_v50 }
0x11f4   :  { %v3477_v15 = vcvt.s32.f32 %v3475_v19  ;;  %v3476_v34 = vcvt.s32.f32 %v3474_v23 }
0x11f6   :  { %3478 = vmin.xlane.f32.xlu1 %v3477_v15 }
0x1283   :  { %v3479_v27 = vpop.xlane.xlu1 %3478 }
0x1284   :  { %vm3480_vm15 = vcmp.eq.f32.partialorder %v3477_v15, %v3479_v27  ;;  %v3485_v53 = vcvt.f32.s32 %v3479_v27 }
0x1285   :  { %v3481_v43 = vsel %vm3480_vm15, %v3476_v34, inf }
0x1286   :  { %3482 = vmin.xlane.f32.xlu0 %v3481_v43  ;;  %v3486_v29 = vshll.u32 %v3485_v53, 16 }
0x1313   :  { %v3483_v12 = vpop.xlane.xlu0 %3482 }
0x1314   :  { %v3484_v31 = vcvt.f32.s32 %v3483_v12 }
0x1316   :  { %v3487_v21 = vadd.s32 %v3486_v29, %v3484_v31  ;;  %v3725_v29 = vrot.slane %v3712_v49, %v8076_v58 }
0x1318   :  { %vm3488_vm1 = vcmp.eq.s32.totalorder %v7948_v7, %v3487_v21 }
0x1319   :  { %5746 = vmatmul.mubr.msk.f32.vlgmr.msra.gmra.mrb[34].mxu1 %vm3488_vm1, %v9135_v24  ;;  %6559 = vmatmul.mubr.msk.f32.vlgmr.msra.gmra.mrb[34].mxu0 %vm3488_vm1, %v9135_v24 }
0x131a   :  { %3858 = vmatpush1.bf16.msra.mxu1 %v8555_v3  ;;  %6562 = vmatpush3.bf16.msra.mxu0 %v7373_v6  ;;  %v7376_v3 = vld [vmem:[#allocation5 + $0x50] ss:$12 sps:$4 sm:$0xff]  }
0x131b   :  { %3859 = vmatprep.subr.bf16.mxu1 %v8557_v42  ;;  %6563 = vmatprep.subr.bf16.mxu0 %v9139_v1  ;;  %v7377_v42 = vld [vmem:[#allocation5 + $0x68] ss:$12 sps:$4 sm:$0xff]  }
0x131c   :  { %3889 = vmatprep.mubr.bf16.mxu1 %v9148_v13  ;;  %6577 = vmatprep.mubr.msk.bf16.mxu0 %vm7759_vm0, %v9139_v1 }
0x131e   :  { %3860 = vmatpush1.bf16.msra.mxu1 %v8563_v28  ;;  %6564 = vmatpush3.bf16.msra.mxu0 %v7374_v36  ;;  %v7378_v28 = vld [vmem:[#allocation5 + $0x80] ss:$12 sps:$4 sm:$0xff]  }
0x131f   :  { %3861 = vmatprep.subr.bf16.mxu1 %v8567_v11  ;;  %6565 = vmatprep.subr.bf16.mxu0 %v9139_v1  ;;  %v7379_v11 = vld [vmem:[#allocation5 + $0x98] ss:$12 sps:$4 sm:$0xff]  }
0x1322   :  { %3862 = vmatpush1.bf16.msra.mxu1 %v8573_v32  ;;  %6566 = vmatpush3.bf16.msra.mxu0 %v7375_v5  ;;  %v7380_v32 = vld [vmem:[#allocation5 + $0xb0] ss:$12 sps:$4 sm:$0xff]  }
0x1323   :  { %3863 = vmatprep.subr.bf16.mxu1 %v8577_v39  ;;  %6567 = vmatprep.subr.bf16.mxu0 %v9139_v1  ;;  %v7381_v39 = vld [vmem:[#allocation8] sm:$0xff]  }
0x1326   :  { %3864 = vmatpush1.bf16.msra.mxu1 %v8580_v40  ;;  %6568 = vmatpush3.bf16.msra.mxu0 %v7376_v3  ;;  %v7382_v40 = vld [vmem:[#allocation8 + $0x8] sm:$0xff]  }
0x1327   :  { %3865 = vmatprep.subr.bf16.mxu1 %v8584_v51  ;;  %6569 = vmatprep.subr.bf16.mxu0 %v9139_v1  ;;  %v7383_v51 = vld [vmem:[#allocation8 + $0x10] sm:$0xff]  }
0x132a   :  { %3866 = vmatpush1.bf16.msra.mxu1 %v8587_v41  ;;  %6570 = vmatpush3.bf16.msra.mxu0 %v7377_v42  ;;  %v7384_v41 = vld [vmem:[#allocation8 + $0x18] sm:$0xff]  }
0x132b   :  { %3867 = vmatprep.subr.bf16.mxu1 %v8591_v8  ;;  %6571 = vmatprep.subr.bf16.mxu0 %v9139_v1  ;;  %v7385_v8 = vld [vmem:[#allocation8 + $0x20] sm:$0xff]  }
0x132e   :  { %3868 = vmatpush1.bf16.msra.mxu1 %v8594_v60  ;;  %6572 = vmatpush3.bf16.msra.mxu0 %v7378_v28  ;;  %v7386_v60 = vld [vmem:[#allocation8 + $0x28] sm:$0xff]  }
0x132f   :  { %3869 = vmatprep.subr.bf16.mxu1 %v8598_v9  ;;  %6573 = vmatprep.subr.bf16.mxu0 %v9139_v1  ;;  %v7387_v9 = vld [vmem:[#allocation8 + $0x30] sm:$0xff]  }
0x1332   :  { %3870 = vmatpush1.bf16.msra.mxu1 %v8601_v33  ;;  %6574 = vmatpush3.bf16.msra.mxu0 %v7379_v11  ;;  %v7388_v33 = vld [vmem:[#allocation8 + $0x38] sm:$0xff]  }
0x1333   :  { %3871 = vmatprep.subr.bf16.mxu1 %v8605_v63  ;;  %6575 = vmatprep.subr.bf16.mxu0 %v9139_v1 }
0x1336   :  { %3872 = vmatpush1.bf16.msra.mxu1 %v8608_v20  ;;  %6576 = vmatpush3.bf16.msra.mxu0 %v7380_v32 }
0x1337   :  { %6581 = vmatprep.subr.bf16.mxu1 %v9139_v1 }
0x1339   :  { %3890 = vmatmul.mubr.bf16.vlgmr.msra.gmra.mrb[40].mxu1 %v8652_v47  ;;  %6578 = vmatmul.mubr.bf16.vlgmr.msra.gmra.mrb[44].mxu0 %v8652_v47 }
0x133a   :  { %6597 = vmatprep.mubr.msk.bf16.mxu1 %vm7759_vm0, %v9139_v1  ;;  %4279 = vmatprep.mubr.f32.mxu0 %v9139_v1 }
0x133b   :  { %6582 = vmatpush3.bf16.msra.mxu1 %v7381_v39 }
0x133c   :  { %6583 = vmatprep.subr.bf16.mxu1 %v9139_v1 }
0x133f   :  { %6584 = vmatpush3.bf16.msra.mxu1 %v7382_v40 }
0x1340   :  { %6585 = vmatprep.subr.bf16.mxu1 %v9139_v1 }
0x1343   :  { %6586 = vmatpush3.bf16.msra.mxu1 %v7383_v51 }
0x1344   :  { %6587 = vmatprep.subr.bf16.mxu1 %v9139_v1 }
0x1347   :  { %6588 = vmatpush3.bf16.msra.mxu1 %v7384_v41 }
0x1348   :  { %6589 = vmatprep.subr.bf16.mxu1 %v9139_v1 }
0x134b   :  { %6590 = vmatpush3.bf16.msra.mxu1 %v7385_v8 }
0x134c   :  { %6591 = vmatprep.subr.bf16.mxu1 %v9139_v1 }
0x134f   :  { %6592 = vmatpush3.bf16.msra.mxu1 %v7386_v60 }
0x1350   :  { %6593 = vmatprep.subr.bf16.mxu1 %v9139_v1 }
0x1353   :  { %6594 = vmatpush3.bf16.msra.mxu1 %v7387_v9 }
0x1354   :  { %6595 = vmatprep.subr.bf16.mxu1 %v9139_v1 }
0x1357   :  { %6596 = vmatpush3.bf16.msra.mxu1 %v7388_v33 }
0x1358   :  { %7119 = vmatprep.subr.bf16.mxu1 %v9137_v0 }
0x13ec   :  { %v3605_v63 = vpop.f32.mrb[34].mxu1  ;;  %v3676_v20 = vpop.f32.mrb[34].mxu0 }
0x13ed   :  { %v3607_v26 = vpop.f32.mrb[35].mxu1  ;;  %v6560_v55 = vpop.f32.mrb[35].mxu0 }
0x13ee   :  { %v4167_v55 = vld [vmem:[#allocation2] sm:$0xff] }
0x140c   :  { %v3891_v62 = vpop.f32.mrb[40].mxu1  ;;  %v3932_v37 = vpop.f32.mrb[44].mxu0 }
0x140d   :  { %v3892_v45 = vadd.f32 %v3891_v62, %v3717_v57  ;;  %v3893_v47 = vpop.f32.mrb[41].mxu1  ;;  %v6579_v46 = vpop.f32.mrb[45].mxu0  ;;  %v3933_v21 = vadd.f32 %v3932_v37, %v3725_v29  ;;  %v4170_v57 = vld [vmem:[#allocation2 + $0x18] sm:$0xff]  ;;  %v4172_v62 = vld [vmem:[#allocation2 + $0x28] sm:$0xff]  ;;  %v4181_v29 = vld [vmem:[#allocation2 + $0x70] sm:$0xff] }
0x140e   :  { %v3894_v48 = vadd.f32 %v3893_v47, %v3721_v35  ;;  %v3895_v2 = vpop.f32.mrb[42].mxu1  ;;  %v3935_v38 = vpop.f32.mrb[46].mxu0  ;;  %v4169_v35 = vld [vmem:[#allocation2 + $0x10] sm:$0xff]  ;;  %v8756_v37 = vpack.c.bf16 %v4170_v57, %v4167_v55  ;;  %v4174_v47 = vld [vmem:[#allocation2 + $0x38] sm:$0xff]  ;;  %v4196_v57 = vld [vmem:[#allocation2 + $0xe8] sm:$0xff] }
0x140f   :  { %v3938_v50 = vadd.f32 %v3892_v45, %v3605_v63  ;;  %v3896_v19 = vpop.f32.mrb[43].mxu1  ;;  %v6580_v15 = vpop.f32.mrb[47].mxu0  ;;  %v8758_v45 = vpack.c.bf16 %v4172_v62, %v4169_v35  ;;  %v4177_v46 = vld [vmem:[#allocation2 + $0x50] sm:$0xff]  ;;  %v4176_v38 = vld [vmem:[#allocation2 + $0x48] sm:$0xff]  ;;  %v4198_v35 = vld [vmem:[#allocation2 + $0xf8] sm:$0xff] }
0x1410   :  { %v3945_v23 = vadd.f32 %v3894_v48, %v3607_v26  ;;  %v4171_v26 = vld [vmem:[#allocation2 + $0x20] sm:$0xff]  ;;  %v4173_v48 = vld [vmem:[#allocation2 + $0x30] sm:$0xff]  ;;  %v8761_v2 = vpack.c.bf16 %v4177_v46, %v4174_v47  ;;  %v4178_v19 = vld [vmem:[#allocation2 + $0x58] sm:$0xff] }
0x1411   :  { %v5772_v27 = vmul.f32 -1.442695, %v3938_v50  ;;  %v4175_v50 = vld [vmem:[#allocation2 + $0x40] sm:$0xff]  ;;  %v8765_v15 = vpack.c.bf16 %v4176_v38, %v4173_v48  ;;  %v4193_v55 = vld [vmem:[#allocation2 + $0xd0] sm:$0xff] }
0x1412   :  { %v5773_v34 = vmul.f32 -1.442695, %v3945_v23  ;;  %v8767_v23 = vpack.c.bf16 %v4178_v19, %v4175_v50  ;;  %v4201_v62 = vld [vmem:[#allocation2 + $0x110] sm:$0xff]  ;;  %v8797_v46 = vpack.c.bf16 %v4196_v57, %v4193_v55  ;;  %v4200_v50 = vld [vmem:[#allocation2 + $0x108] sm:$0xff]  ;;  %v4199_v19 = vld [vmem:[#allocation2 + $0x100] sm:$0xff] }
0x1413   :  { %7495 = vpow2.f32 %v5772_v27  ;;  %v4180_v27 = vld [vmem:[#allocation2 + $0x68] sm:$0xff]  ;;  %v4197_v48 = vld [vmem:[#allocation2 + $0xf0] sm:$0xff]  ;;  %v8801_v38 = vpack.c.bf16 %v4201_v62, %v4198_v35  ;;  %v4210_v55 = vld [vmem:[#allocation2 + $0x158] sm:$0xff] }
0x1414   :  { %7497 = vpow2.f32 %v5773_v34  ;;  %v4183_v34 = vld [vmem:[#allocation2 + $0x80] sm:$0xff]  ;;  %v4213_v57 = vld [vmem:[#allocation2 + $0x170] sm:$0xff] }
0x1415   :  { %v8826_v35 = vpack.c.bf16 %v4213_v57, %v4210_v55  ;;  %v4209_v62 = vld [vmem:[#allocation2 + $0x150] sm:$0xff] }
0x1416   :  { %v8851_v55 = vld [vmem:[#allocation5 + $0x34] ss:$12 sps:$4 sm:$0xff]   ;;  %v8857_v57 = vld [vmem:[#allocation5 + $0x30] ss:$12 sps:$4 sm:$0xff]  }
0x141d   :  { %v7496_v43 = vpop.eup %7495 }
0x141e   :  { %v3942_v53 = vadd.f32 1.0, %v7496_v43  ;;  %v7498_v12 = vpop.eup %7497  ;;  %v4179_v43 = vld [vmem:[#allocation2 + $0x60] sm:$0xff] }
0x141f   :  { %v3949_v31 = vadd.f32 1.0, %v7498_v12  ;;  %v4182_v12 = vld [vmem:[#allocation2 + $0x78] sm:$0xff] }
0x1420   :  { %7499 = vrcp.f32 %v3942_v53  ;;  %v8771_v53 = vpack.c.bf16 %v4183_v34, %v4180_v27  ;;  %v4202_v27 = vld [vmem:[#allocation2 + $0x118] sm:$0xff]  ;;  %v4204_v34 = vld [vmem:[#allocation2 + $0x128] sm:$0xff] }
0x1421   :  { %7501 = vrcp.f32 %v3949_v31  ;;  %v4184_v31 = vld [vmem:[#allocation2 + $0x88] sm:$0xff] }
0x142a   :  { %v7500_v6 = vpop.eup %7499 }
0x142b   :  { %v3952_v36 = vmul.f32 %v7500_v6, %v3933_v21  ;;  %v7502_v3 = vpop.eup %7501  ;;  %v4186_v21 = vld [vmem:[#allocation2 + $0x98] sm:$0xff]  ;;  %v4189_v6 = vld [vmem:[#allocation2 + $0xb0] sm:$0xff] }
0x142c   :  { %v3955_v42 = vsub.f32 1.0, %v7502_v3  ;;  %v3957_v32 = vmul.f32 %v7502_v3, %v8648_v22  ;;  %v4185_v3 = vld [vmem:[#allocation2 + $0x90] sm:$0xff] }
0x142d   :  { %v3953_v5 = vadd.f32 %v3952_v36, %v3676_v20  ;;  %v8775_v36 = vpack.c.bf16 %v4182_v12, %v4179_v43  ;;  %v4207_v43 = vld [vmem:[#allocation2 + $0x140] sm:$0xff]  ;;  %v8805_v12 = vpack.c.bf16 %v4200_v50, %v4197_v48  ;;  %v4212_v48 = vld [vmem:[#allocation2 + $0x168] sm:$0xff] }
0x142e   :  { %v4211_v50 = vld [vmem:[#allocation2 + $0x160] sm:$0xff] }
0x142f   :  { %7503 = vtanh.f32 %v3953_v5  ;;  %v8777_v5 = vpack.c.bf16 %v4184_v31, %v4181_v29  ;;  %v8807_v29 = vpack.c.bf16 %v4202_v27, %v4199_v19  ;;  %v4203_v31 = vld [vmem:[#allocation2 + $0x120] sm:$0xff]  ;;  %v8828_v19 = vpack.c.bf16 %v4212_v48, %v4209_v62  ;;  %v4214_v27 = vld [vmem:[#allocation2 + $0x178] sm:$0xff] }
0x1430   :  { %v7400_v62 = vld [vmem:[#allocation5 + $0x38] ss:$12 sps:$4 sm:$0xff]  }
0x1431   :  { %v8861_v48 = vld [vmem:[#allocation5 + $0x4c] ss:$12 sps:$4 sm:$0xff]  }
0x1439   :  { %v7504_v28 = vpop.eup %7503 }
0x143a   :  { %v3956_v11 = vmul.f32 %v7504_v28, %v3955_v42  ;;  %v8781_v42 = vpack.c.bf16 %v4189_v6, %v4186_v21  ;;  %v4188_v28 = vld [vmem:[#allocation2 + $0xa8] sm:$0xff]  ;;  %v8811_v21 = vpack.c.bf16 %v4207_v43, %v4204_v34  ;;  %v4206_v6 = vld [vmem:[#allocation2 + $0x138] sm:$0xff]  ;;  %v8831_v34 = vpack.c.bf16 %v4214_v27, %v4211_v50 }
0x143b   :  { %v8864_v50 = vld [vmem:[#allocation5 + $0x48] ss:$12 sps:$4 sm:$0xff]   ;;  %v7404_v27 = vld [vmem:[#allocation5 + $0x50] ss:$12 sps:$4 sm:$0xff]  }
0x143c   :  { %v8730_v39 = vadd.f32 %v3957_v32, %v3956_v11  ;;  %v4187_v11 = vld [vmem:[#allocation2 + $0xa0] sm:$0xff]  ;;  %v4190_v32 = vld [vmem:[#allocation2 + $0xb8] sm:$0xff] }
0x143e   :  { %v8734_v40 = vpack.c.bf16 %v8730_v39, %v8730_v39 }
0x1440   :  { %6598 = vmatmul.mubr.bf16.vlgmr.msra.gmra.mrb[44].mxu1 %v8734_v40 }
0x1441   :  { %6633 = vmatprep.mubr.msk.f32.mxu1 %vm7759_vm0, %v9139_v1  ;;  %7121 = vmatpush3.bf16.msra.mxu1 %v8758_v45 }
0x1442   :  { %7122 = vmatprep.subr.bf16.mxu1 %v9137_v0 }
0x1445   :  { %7124 = vmatpush3.bf16.msra.mxu1 %v8767_v23 }
0x1446   :  { %7125 = vmatprep.subr.bf16.mxu1 %v9137_v0 }
0x1449   :  { %7127 = vmatpush3.bf16.msra.mxu1 %v8777_v5 }
0x144a   :  { %7128 = vmatprep.subr.bf16.mxu1 %v9137_v0 }
0x1513   :  { %v4065_v51 = vpop.f32.mrb[44].mxu1 }
0x1514   :  { %v8740_v41 = vadd.f32 %v8673_v30, %v4065_v51  ;;  %v6599_v8 = vpop.f32.mrb[45].mxu1  ;;  %v4168_v30 = vld [vmem:[#allocation2 + $0x8] sm:$0xff] }
0x1515   :  { %v4068_v60 = vpop.f32.mrb[46].mxu1  ;;  %v8754_v49 = vpack.c.bf16 %v4171_v26, %v4168_v30  ;;  %v4192_v51 = vld [vmem:[#allocation2 + $0xc8] sm:$0xff]  ;;  %v4195_v8 = vld [vmem:[#allocation2 + $0xe0] sm:$0xff]  ;;  %v4194_v26 = vld [vmem:[#allocation2 + $0xd8] sm:$0xff] }
0x1516   :  { %9149 = vst [vmem:[#allocation23_spill] sm:$0xff] %v8740_v41  ;;  %4071 = vmax.xlane.f32.xlu1 %v8740_v41  ;;  %v6600_v22 = vpop.f32.mrb[47].mxu1  ;;  %v8785_v60 = vpack.c.bf16 %v4188_v28, %v4185_v3  ;;  %v8791_v30 = vpack.c.bf16 %v4195_v8, %v4192_v51  ;;  %v4205_v3 = vld [vmem:[#allocation2 + $0x130] sm:$0xff]  ;;  %v4208_v28 = vld [vmem:[#allocation2 + $0x148] sm:$0xff] }
0x1517   :  { %7088 = vmatprep.subr.bf16.mxu0 %v8754_v49  ;;  %v8787_v22 = vpack.c.bf16 %v4190_v32, %v4187_v11  ;;  %v8815_v11 = vpack.c.bf16 %v4206_v6, %v4203_v31  ;;  %v8817_v32 = vpack.c.bf16 %v4208_v28, %v4205_v3  ;;  %v8839_v28 = vld [vmem:[#allocation5] ss:$12 sps:$4 sm:$0xff]  }
0x1518   :  { %7090 = vmatpush1.bf16.msra.mxu0 %v8756_v37 }
0x1519   :  { %7092 = vmatprep.subr.bf16.mxu0 %v8761_v2  ;;  %7130 = vmatpush3.bf16.msra.mxu1 %v8787_v22 }
0x151a   :  { %7131 = vmatprep.subr.bf16.mxu1 %v9137_v0 }
0x151c   :  { %7094 = vmatpush1.bf16.msra.mxu0 %v8765_v15 }
0x151d   :  { %7096 = vmatprep.subr.bf16.mxu0 %v8771_v53  ;;  %7133 = vmatpush3.bf16.msra.mxu1 %v8797_v46 }
0x151e   :  { %7134 = vmatprep.subr.bf16.mxu1 %v9137_v0 }
0x1520   :  { %7098 = vmatpush1.bf16.msra.mxu0 %v8775_v36 }
0x1521   :  { %7100 = vmatprep.subr.bf16.mxu0 %v8781_v42  ;;  %7136 = vmatpush3.bf16.msra.mxu1 %v8807_v29 }
0x1522   :  { %7137 = vmatprep.subr.bf16.mxu1 %v9137_v0 }
0x1524   :  { %7102 = vmatpush1.bf16.msra.mxu0 %v8785_v60 }
0x1525   :  { %7104 = vmatprep.subr.bf16.mxu0 %v8791_v30  ;;  %7139 = vmatpush3.bf16.msra.mxu1 %v8817_v32 }
0x1526   :  { %7140 = vmatprep.subr.bf16.mxu1 %v9137_v0  ;;  %v7420_v0 = vld [vmem:[#allocation5 + $0xb0] ss:$12 sps:$4 sm:$0xff]  }
0x1529   :  { %7142 = vmatpush3.bf16.msra.mxu1 %v8831_v34 }
0x152a   :  { %6636 = vmatprep.subr.bf16.mxu1 %v9139_v1 }
0x15a3   :  { %v8743_v9 = vpop.xlane.xlu1 %4071 }
0x15a4   :  { %9150 = vst [vmem:[#allocation24_spill] sm:$0xff] %v8743_v9  ;;  %vm4148_vm2 = vcmp.eq.f32.partialorder %v8740_v41, %v8743_v9 }
0x15a5   :  { %v8748_v33 = vsel %vm4148_vm2, %v7948_v7, 128 }
0x15a6   :  { %v4151_v63 = vshra.s32 %v8748_v33, 16  ;;  %v4150_v51 = vand.u32 65535, %v8748_v33  ;;  %v8835_v33 = vld [vmem:[#allocation5 + $0x4] ss:$12 sps:$4 sm:$0xff]  }
0x15a8   :  { %v8751_v20 = vcvt.s32.f32 %v4151_v63  ;;  %v4191_v63 = vld [vmem:[#allocation2 + $0xc0] sm:$0xff] }
0x15a9   :  { %v8795_v47 = vpack.c.bf16 %v4194_v26, %v4191_v63  ;;  %v4152_v63 = vcvt.s32.f32 %v4150_v51  ;;  %v7392_v51 = vld [vmem:[#allocation5 + $0x8] ss:$12 sps:$4 sm:$0xff]  }
0x15aa   :  { %4154 = vmin.xlane.f32.xlu0 %v8751_v20 }
0x15ab   :  { %7106 = vmatpush1.bf16.msra.mxu0 %v8795_v47 }
0x15ac   :  { %7108 = vmatprep.subr.bf16.mxu0 %v8801_v38 }
0x15af   :  { %7110 = vmatpush1.bf16.msra.mxu0 %v8805_v12 }
0x15b0   :  { %7112 = vmatprep.subr.bf16.mxu0 %v8811_v21 }
0x15b3   :  { %7114 = vmatpush1.bf16.msra.mxu0 %v8815_v11 }
0x15b4   :  { %7116 = vmatprep.subr.bf16.mxu0 %v8826_v35 }
0x15b7   :  { %7118 = vmatpush1.bf16.msra.mxu0 %v8828_v19 }
0x15b8   :  { %4533 = vmatprep.subr.bf16.mxu0 %v8835_v33 }
0x1637   :  { %v4155_v8 = vpop.xlane.xlu0 %4154 }
0x1638   :  { %vm4156_vm3 = vcmp.eq.f32.partialorder %v8751_v20, %v4155_v8  ;;  %v4161_v20 = vcvt.f32.s32 %v4155_v8  ;;  %v7396_v8 = vld [vmem:[#allocation5 + $0x20] ss:$12 sps:$4 sm:$0xff]  }
0x1639   :  { %v4157_v26 = vsel %vm4156_vm3, %v4152_v63, inf  ;;  %v8841_v63 = vld [vmem:[#allocation5 + $0x1c] ss:$12 sps:$4 sm:$0xff]  }
0x163a   :  { %4158 = vmin.xlane.f32.xlu1 %v4157_v26  ;;  %v4162_v31 = vshll.u32 %v4161_v20, 16  ;;  %v8847_v26 = vld [vmem:[#allocation5 + $0x18] ss:$12 sps:$4 sm:$0xff]  }
0x163b   :  { %v8868_v20 = vld [vmem:[#allocation5 + $0x64] ss:$12 sps:$4 sm:$0xff]  }
0x16c7   :  { %v4159_v43 = vpop.xlane.xlu1 %4158 }
0x16c8   :  { %v4160_v6 = vcvt.f32.s32 %v4159_v43  ;;  %v8871_v43 = vld [vmem:[#allocation5 + $0x60] ss:$12 sps:$4 sm:$0xff]  }
0x16ca   :  { %v4163_v3 = vadd.s32 %v4162_v31, %v4160_v6  ;;  %v7408_v31 = vld [vmem:[#allocation5 + $0x68] ss:$12 sps:$4 sm:$0xff]  }
0x16cb   :  { %v8875_v6 = vld [vmem:[#allocation5 + $0x7c] ss:$12 sps:$4 sm:$0xff]  }
0x16cc   :  { %vm4164_vm4 = vcmp.eq.s32.totalorder %v7948_v7, %v4163_v3  ;;  %v8878_v3 = vld [vmem:[#allocation5 + $0x78] ss:$12 sps:$4 sm:$0xff]  }
0x16cd   :  { %5788 = vmatmul.mubr.msk.f32.vlgmr.msra.gmra.mrb[48].mxu0 %vm4164_vm4, %v9135_v24  ;;  %6634 = vmatmul.mubr.msk.f32.vlgmr.msra.gmra.mrb[48].mxu1 %vm4164_vm4, %v9135_v24  ;;  %v8892_v24 = vld [vmem:[#allocation5 + $0xa8] ss:$12 sps:$4 sm:$0xff]  }
0x16ce   :  { %4534 = vmatpush1.bf16.msra.mxu0 %v8839_v28  ;;  %6637 = vmatpush3.bf16.msra.mxu1 %v7392_v51  ;;  %v7412_v51 = vld [vmem:[#allocation5 + $0x80] ss:$12 sps:$4 sm:$0xff]  }
0x16cf   :  { %4535 = vmatprep.subr.bf16.mxu0 %v8841_v63  ;;  %6638 = vmatprep.subr.bf16.mxu1 %v9139_v1 }
0x16d0   :  { %4565 = vmatprep.mubr.bf16.mxu0 %v9148_v13  ;;  %6652 = vmatprep.mubr.msk.bf16.mxu1 %vm7759_vm0, %v9139_v1 }
0x16d2   :  { %4536 = vmatpush1.bf16.msra.mxu0 %v8847_v26  ;;  %6639 = vmatpush3.bf16.msra.mxu1 %v7396_v8  ;;  %v8882_v8 = vld [vmem:[#allocation5 + $0x94] ss:$12 sps:$4 sm:$0xff]  }
0x16d3   :  { %4537 = vmatprep.subr.bf16.mxu0 %v8851_v55  ;;  %6640 = vmatprep.subr.bf16.mxu1 %v9139_v1 }
0x16d6   :  { %4538 = vmatpush1.bf16.msra.mxu0 %v8857_v57  ;;  %6641 = vmatpush3.bf16.msra.mxu1 %v7400_v62  ;;  %v8885_v62 = vld [vmem:[#allocation5 + $0x90] ss:$12 sps:$4 sm:$0xff]  }
0x16d7   :  { %4539 = vmatprep.subr.bf16.mxu0 %v8861_v48  ;;  %6642 = vmatprep.subr.bf16.mxu1 %v9139_v1 }
0x16da   :  { %4540 = vmatpush1.bf16.msra.mxu0 %v8864_v50  ;;  %6643 = vmatpush3.bf16.msra.mxu1 %v7404_v27  ;;  %v7416_v27 = vld [vmem:[#allocation5 + $0x98] ss:$12 sps:$4 sm:$0xff]  }
0x16db   :  { %4541 = vmatprep.subr.bf16.mxu0 %v8868_v20  ;;  %6644 = vmatprep.subr.bf16.mxu1 %v9139_v1 }
0x16de   :  { %4542 = vmatpush1.bf16.msra.mxu0 %v8871_v43  ;;  %6645 = vmatpush3.bf16.msra.mxu1 %v7408_v31  ;;  %v8889_v31 = vld [vmem:[#allocation5 + $0xac] ss:$12 sps:$4 sm:$0xff]  }
0x16df   :  { %4543 = vmatprep.subr.bf16.mxu0 %v8875_v6  ;;  %6646 = vmatprep.subr.bf16.mxu1 %v9139_v1 }
0x16e2   :  { %4544 = vmatpush1.bf16.msra.mxu0 %v8878_v3  ;;  %6647 = vmatpush3.bf16.msra.mxu1 %v7412_v51 }
0x16e3   :  { %4545 = vmatprep.subr.bf16.mxu0 %v8882_v8  ;;  %6648 = vmatprep.subr.bf16.mxu1 %v9139_v1 }
0x16e6   :  { %4546 = vmatpush1.bf16.msra.mxu0 %v8885_v62  ;;  %6649 = vmatpush3.bf16.msra.mxu1 %v7416_v27 }
0x16e7   :  { %4547 = vmatprep.subr.bf16.mxu0 %v8889_v31  ;;  %6650 = vmatprep.subr.bf16.mxu1 %v9139_v1 }
0x16ea   :  { %4548 = vmatpush1.bf16.msra.mxu0 %v8892_v24  ;;  %6651 = vmatpush3.bf16.msra.mxu1 %v7420_v0  ;;  %v7421_v0 = vld [vmem:[#allocation8] sm:$0xff]  }
0x16eb   :  { %6656 = vmatprep.subr.bf16.mxu0 %v9139_v1  ;;  %7144 = vmatprep.subr.bf16.mxu1 %v8754_v49  ;;  %v7423_v49 = vld [vmem:[#allocation8 + $0x10] sm:$0xff]  }
0x16ed   :  { %4566 = vmatmul.mubr.bf16.vlgmr.msra.gmra.mrb[52].mxu0 %v8734_v40  ;;  %6653 = vmatmul.mubr.bf16.vlgmr.msra.gmra.mrb[52].mxu1 %v8734_v40  ;;  %v7422_v40 = vld [vmem:[#allocation8 + $0x8] sm:$0xff]  }
0x16ee   :  { %6672 = vmatprep.mubr.msk.bf16.mxu0 %vm7759_vm0, %v9139_v1  ;;  %7146 = vmatpush1.bf16.msra.mxu1 %v8756_v37  ;;  %v7424_v37 = vld [vmem:[#allocation8 + $0x18] sm:$0xff]  }
0x16ef   :  { %7148 = vmatprep.subr.bf16.mxu1 %v8761_v2  ;;  %4955 = vmatprep.mubr.f32.mxu1 %v9139_v1  ;;  %v7425_v2 = vld [vmem:[#allocation8 + $0x20] sm:$0xff]  }
0x16f0   :  { %6657 = vmatpush3.bf16.msra.mxu0 %v7421_v0 }
0x16f1   :  { %6658 = vmatprep.subr.bf16.mxu0 %v9139_v1 }
0x16f2   :  { %7150 = vmatpush1.bf16.msra.mxu1 %v8765_v15  ;;  %v7426_v15 = vld [vmem:[#allocation8 + $0x28] sm:$0xff]  }
0x16f3   :  { %7152 = vmatprep.subr.bf16.mxu1 %v8771_v53  ;;  %v7427_v53 = vld [vmem:[#allocation8 + $0x30] sm:$0xff]  }
0x16f4   :  { %6659 = vmatpush3.bf16.msra.mxu0 %v7422_v40 }
0x16f5   :  { %6660 = vmatprep.subr.bf16.mxu0 %v9139_v1 }
0x16f6   :  { %7154 = vmatpush1.bf16.msra.mxu1 %v8775_v36  ;;  %v7428_v36 = vld [vmem:[#allocation8 + $0x38] sm:$0xff]  }
0x16f7   :  { %7156 = vmatprep.subr.bf16.mxu1 %v8781_v42  ;;  %v9151_v42 = vmov 0.0|0.0  }
0x16f8   :  { %6661 = vmatpush3.bf16.msra.mxu0 %v7423_v49 }
0x16f9   :  { %6662 = vmatprep.subr.bf16.mxu0 %v9139_v1 }
0x16fa   :  { %7158 = vmatpush1.bf16.msra.mxu1 %v8785_v60 }
0x16fb   :  { %7160 = vmatprep.subr.bf16.mxu1 %v8791_v30 }
0x16fc   :  { %6663 = vmatpush3.bf16.msra.mxu0 %v7424_v37 }
0x16fd   :  { %6664 = vmatprep.subr.bf16.mxu0 %v9139_v1 }
0x16fe   :  { %7162 = vmatpush1.bf16.msra.mxu1 %v8795_v47 }
0x16ff   :  { %7164 = vmatprep.subr.bf16.mxu1 %v8801_v38 }
0x1700   :  { %6665 = vmatpush3.bf16.msra.mxu0 %v7425_v2 }
0x1701   :  { %6666 = vmatprep.subr.bf16.mxu0 %v9139_v1 }
0x1702   :  { %7166 = vmatpush1.bf16.msra.mxu1 %v8805_v12  ;;  %v4388_v12 = vld [vmem:[#allocation7] sm:$0x7] }
0x1703   :  { %7168 = vmatprep.subr.bf16.mxu1 %v8811_v21  ;;  %v4393_v21 = vrot.slane %v4388_v12, %v8068_v59  ;;  %v4401_v10 = vrot.slane %v4388_v12, %v8076_v58 }
0x1704   :  { %6667 = vmatpush3.bf16.msra.mxu0 %v7426_v15 }
0x1705   :  { %6668 = vmatprep.subr.bf16.mxu0 %v9139_v1 }
0x1706   :  { %7170 = vmatpush1.bf16.msra.mxu1 %v8815_v11  ;;  %v4397_v11 = vrot.slane %v4388_v12, %v8071_v61 }
0x1707   :  { %7172 = vmatprep.subr.bf16.mxu1 %v8826_v35 }
0x1708   :  { %6669 = vmatpush3.bf16.msra.mxu0 %v7427_v53 }
0x1709   :  { %6670 = vmatprep.subr.bf16.mxu0 %v9139_v1 }
0x170a   :  { %7174 = vmatpush1.bf16.msra.mxu1 %v8828_v19 }
0x170b   :  { %5209 = vmatprep.subr.bf16.mxu1 %v8835_v33 }
0x170c   :  { %6671 = vmatpush3.bf16.msra.mxu0 %v7428_v36 }
0x170d   :  { %7175 = vmatprep.subr.bf16.mxu0 %v9151_v42 }
0x17a0   :  { %v4281_v60 = vpop.f32.mrb[48].mxu0  ;;  %v4352_v30 = vpop.f32.mrb[48].mxu1 }
0x17a1   :  { %v4283_v47 = vpop.f32.mrb[49].mxu0  ;;  %v6635_v38 = vpop.f32.mrb[49].mxu1 }
0x17c0   :  { %v4567_v35 = vpop.f32.mrb[52].mxu0  ;;  %v4608_v19 = vpop.f32.mrb[52].mxu1 }
0x17c1   :  { %v4568_v33 = vadd.f32 %v4567_v35, %v4393_v21  ;;  %v4569_v51 = vpop.f32.mrb[53].mxu0  ;;  %v6654_v27 = vpop.f32.mrb[53].mxu1  ;;  %v4609_v35 = vadd.f32 %v4608_v19, %v4401_v10  ;;  %v9152_v10 = vmov 0.0   ;;  %v3397_v19 = vsub.f32 %v8676_v18, %v8679_v17 }
0x17c2   :  { %v4570_v0 = vadd.f32 %v4569_v51, %v4397_v11  ;;  %v4571_v40 = vpop.f32.mrb[54].mxu0  ;;  %v4611_v49 = vpop.f32.mrb[54].mxu1 }
0x17c3   :  { %v4614_v37 = vadd.f32 %v4568_v33, %v4281_v60  ;;  %v4572_v2 = vpop.f32.mrb[55].mxu0  ;;  %v6655_v15 = vpop.f32.mrb[55].mxu1 }
0x17c4   :  { %v4621_v53 = vadd.f32 %v4570_v0, %v4283_v47  ;;  %v3398_v2 = vmul.f32 1.442695, %v3397_v19  ;;  %v7433_v19 = vld [vmem:[#allocation5 + $0x68] ss:$12 sps:$4 sm:$0xff]  }
0x17c5   :  { %v5814_v36 = vmul.f32 -1.442695, %v4614_v37 }
0x17c6   :  { %v5815_v38 = vmul.f32 -1.442695, %v4621_v53 }
0x17c7   :  { %7505 = vpow2.f32 %v5814_v36 }
0x17c8   :  { %7507 = vpow2.f32 %v5815_v38 }
0x17d1   :  { %v7506_v1 = vpop.eup %7505 }
0x17d2   :  { %v4618_v41 = vadd.f32 1.0, %v7506_v1  ;;  %v7508_v9 = vpop.eup %7507 }
0x17d3   :  { %v4625_v21 = vadd.f32 1.0, %v7508_v9 }
0x17d4   :  { %7509 = vrcp.f32 %v4618_v41 }
0x17d5   :  { %7511 = vrcp.f32 %v4625_v21 }
0x17de   :  { %v7510_v27 = vpop.eup %7509 }
0x17df   :  { %v4628_v11 = vmul.f32 %v7510_v27, %v4609_v35  ;;  %v7512_v60 = vpop.eup %7511 }
0x17e0   :  { %v4631_v33 = vsub.f32 1.0, %v7512_v60  ;;  %v4633_v40 = vmul.f32 %v7512_v60, %v8730_v39  ;;  %v8957_v39 = vld [vmem:[#allocation10] ss:$0 sm:$0xff] }
0x17e1   :  { %v4629_v51 = vadd.f32 %v4628_v11, %v4352_v30  ;;  %v2045_v30 = vsub.f32 %v8392_v16, %v8395_v56 }
0x17e3   :  { %7513 = vtanh.f32 %v4629_v51  ;;  %v2046_v12 = vmul.f32 1.442695, %v2045_v30 }
0x17ed   :  { %v7514_v47 = vpop.eup %7513 }
0x17ee   :  { %v4632_v0 = vmul.f32 %v7514_v47, %v4631_v33 }
0x17f0   :  { %v8932_v49 = vadd.f32 %v4633_v40, %v4632_v0 }
0x17f2   :  { %v8936_v1 = vpack.c.bf16 %v8932_v49, %v8932_v49 }
0x17f4   :  { %6673 = vmatmul.mubr.bf16.vlgmr.msra.gmra.mrb[56].mxu0 %v8936_v1 }
0x17f5   :  { %7177 = vmatpush3.bf16.msra.mxu0 %v8758_v45  ;;  %6708 = vmatprep.mubr.msk.f32.mxu0 %vm7759_vm0, %v9152_v10 }
0x17f6   :  { %7178 = vmatprep.subr.bf16.mxu0 %v9151_v42 }
0x17f9   :  { %7180 = vmatpush3.bf16.msra.mxu0 %v8767_v23 }
0x17fa   :  { %7181 = vmatprep.subr.bf16.mxu0 %v9151_v42 }
0x17fd   :  { %7183 = vmatpush3.bf16.msra.mxu0 %v8777_v5 }
0x17fe   :  { %7184 = vmatprep.subr.bf16.mxu0 %v9151_v42 }
0x1801   :  { %7186 = vmatpush3.bf16.msra.mxu0 %v8787_v22 }
0x1802   :  { %7187 = vmatprep.subr.bf16.mxu0 %v9151_v42 }
0x1805   :  { %7189 = vmatpush3.bf16.msra.mxu0 %v8797_v46 }
0x1806   :  { %7190 = vmatprep.subr.bf16.mxu0 %v9151_v42 }
0x1809   :  { %7192 = vmatpush3.bf16.msra.mxu0 %v8807_v29 }
0x180a   :  { %7193 = vmatprep.subr.bf16.mxu0 %v9151_v42 }
0x180d   :  { %7195 = vmatpush3.bf16.msra.mxu0 %v8817_v32 }
0x180e   :  { %7196 = vmatprep.subr.bf16.mxu0 %v9151_v42 }
0x1811   :  { %7198 = vmatpush3.bf16.msra.mxu0 %v8831_v34  ;;  %v693_v34 = vsub.f32 %v8108_v44, %v8111_v52 }
0x1812   :  { %6711 = vmatprep.subr.bf16.mxu0 %v9152_v10 }
0x1813   :  { %v694_v42 = vmul.f32 1.442695, %v693_v34 }
0x1815   :  { %7515 = vpow2.f32 %v694_v42 }
0x1816   :  { %7517 = vpow2.f32 %v2046_v12 }
0x1817   :  { %7519 = vpow2.f32 %v3398_v2 }
0x181f   :  { %v7516_v35 = vpop.eup %7515 }
0x1820   :  { %v7518_v27 = vpop.eup %7517 }
0x1821   :  { %v7520_v11 = vpop.eup %7519 }
0x18c7   :  { %v4741_v41 = vpop.f32.mrb[56].mxu0 }
0x18c8   :  { %v8960_v9 = vadd.f32 %v8957_v39, %v4741_v41  ;;  %v6674_v45 = vpop.f32.mrb[57].mxu0  ;;  %v7429_v41 = vld [vmem:[#allocation5 + $0x8] ss:$12 sps:$4 sm:$0xff]  }
0x18c9   :  { %v4744_v23 = vpop.f32.mrb[58].mxu0 }
0x18ca   :  { %4747 = vmax.xlane.f32.xlu0 %v8960_v9  ;;  %v6675_v5 = vpop.f32.mrb[59].mxu0  ;;  %v9153_v23 = vmov 1.0  }
0x18cb   :  { %v7430_v5 = vld [vmem:[#allocation5 + $0x20] ss:$12 sps:$4 sm:$0xff]  }
0x1957   :  { %v8963_v22 = vpop.xlane.xlu0 %4747 }
0x1958   :  { %vm4824_vm5 = vcmp.eq.f32.partialorder %v8960_v9, %v8963_v22  ;;  %v4749_v15 = vsub.f32 %v8960_v9, %v8963_v22 }
0x1959   :  { %v4825_v46 = vsel %vm4824_vm5, %v7948_v7, 128 }
0x195a   :  { %v4827_v29 = vshra.s32 %v4825_v46, 16  ;;  %v4826_v37 = vand.u32 65535, %v4825_v46  ;;  %v4750_v21 = vmul.f32 1.442695, %v4749_v15 }
0x195c   :  { %v4829_v32 = vcvt.s32.f32 %v4827_v29  ;;  %v4828_v36 = vcvt.s32.f32 %v4826_v37  ;;  %7521 = vpow2.f32 %v4750_v21 }
0x195e   :  { %4830 = vmin.xlane.f32.xlu1 %v4829_v32 }
0x1966   :  { %v7522_v51 = vpop.eup %7521 }
0x19eb   :  { %v4831_v53 = vpop.xlane.xlu1 %4830 }
0x19ec   :  { %vm4832_vm6 = vcmp.eq.f32.partialorder %v4829_v32, %v4831_v53  ;;  %v4837_v60 = vcvt.f32.s32 %v4831_v53  ;;  %v7431_v32 = vld [vmem:[#allocation5 + $0x38] ss:$12 sps:$4 sm:$0xff]  }
0x19ed   :  { %v4833_v38 = vsel %vm4832_vm6, %v4828_v36, inf }
0x19ee   :  { %4834 = vmin.xlane.f32.xlu0 %v4833_v38  ;;  %v4838_v47 = vshll.u32 %v4837_v60, 16 }
0x19f2   :  { %696 = vadd.xlane.f32.xlu0 %v7516_v35 }
0x19f6   :  { %2048 = vadd.xlane.f32.xlu0 %v7518_v27 }
0x19fa   :  { %3400 = vadd.xlane.f32.xlu0 %v7520_v11 }
0x19fe   :  { %4752 = vadd.xlane.f32.xlu0 %v7522_v51 }
0x1a7b   :  { %v4835_v33 = vpop.xlane.xlu0 %4834 }
0x1a7c   :  { %v4836_v0 = vcvt.f32.s32 %v4835_v33 }
0x1a7e   :  { %v4839_v40 = vadd.s32 %v4838_v47, %v4836_v0  ;;  %v7435_v47 = vld [vmem:[#allocation5 + $0x98] ss:$12 sps:$4 sm:$0xff]  }
0x1a7f   :  { %v697_v45 = vpop.xlane.xlu0 %696 }
0x1a80   :  { %vm4840_vm7 = vcmp.eq.s32.totalorder %v7948_v7, %v4839_v40  ;;  %7523 = vlog2.f32 %v697_v45  ;;  %v7762_v7 = vmov 1966171168  }
0x1a81   :  { %5830 = vmatmul.mubr.msk.f32.vlgmr.msra.gmra.mrb[50].mxu1 %vm4840_vm7, %v9153_v23  ;;  %6709 = vmatmul.mubr.msk.f32.vlgmr.msra.gmra.mrb[50].mxu0 %vm4840_vm7, %v9153_v23  ;;  %v705_v29 = vunpack.c.l.s4 %v7762_v7 }
0x1a82   :  { %5210 = vmatpush1.bf16.msra.mxu1 %v8839_v28  ;;  %6712 = vmatpush3.bf16.msra.mxu0 %v7429_v41 }
0x1a83   :  { %v2049_v46 = vpop.xlane.xlu0 %2048  ;;  %5211 = vmatprep.subr.bf16.mxu1 %v8841_v63  ;;  %6713 = vmatprep.subr.bf16.mxu0 %v9152_v10  ;;  %v706_v63 = vunpack.c.0.s8 %v705_v29 }
0x1a84   :  { %7525 = vlog2.f32 %v2049_v46  ;;  %5241 = vmatprep.mubr.bf16.mxu1 %v9148_v13  ;;  %6727 = vmatprep.mubr.msk.bf16.mxu0 %vm7759_vm0, %v9152_v10  ;;  %v7432_v13 = vld [vmem:[#allocation5 + $0x50] ss:$12 sps:$4 sm:$0xff]  }
0x1a86   :  { %5212 = vmatpush1.bf16.msra.mxu1 %v8847_v26  ;;  %6714 = vmatpush3.bf16.msra.mxu0 %v7430_v5  ;;  %v8992_v26 = vsub.s32 %v706_v63, %v8065_v54 }
0x1a87   :  { %v3401_v28 = vpop.xlane.xlu0 %3400  ;;  %5213 = vmatprep.subr.bf16.mxu1 %v8851_v55  ;;  %6715 = vmatprep.subr.bf16.mxu0 %v9152_v10 }
0x1a88   :  { %7527 = vlog2.f32 %v3401_v28 }
0x1a8a   :  { %v7524_v34 = vpop.eup %7523  ;;  %5214 = vmatpush1.bf16.msra.mxu1 %v8857_v57  ;;  %6716 = vmatpush3.bf16.msra.mxu0 %v7431_v32 }
0x1a8b   :  { %v699_v42 = vmul.f32 0.6931472, %v7524_v34  ;;  %v4753_v30 = vpop.xlane.xlu0 %4752  ;;  %5215 = vmatprep.subr.bf16.mxu1 %v8861_v48  ;;  %6717 = vmatprep.subr.bf16.mxu0 %v9152_v10 }
0x1a8c   :  { %7529 = vlog2.f32 %v4753_v30 }
0x1a8d   :  { %v700_v55 = vadd.f32 %v699_v42, %v8111_v52  ;;  %v7434_v52 = vld [vmem:[#allocation5 + $0x80] ss:$12 sps:$4 sm:$0xff]  }
0x1a8e   :  { %v7526_v12 = vpop.eup %7525  ;;  %5216 = vmatpush1.bf16.msra.mxu1 %v8864_v50  ;;  %6718 = vmatpush3.bf16.msra.mxu0 %v7432_v13 }
0x1a8f   :  { %v701_v57 = vsub.f32 %v8108_v44, %v700_v55  ;;  %v2051_v37 = vmul.f32 0.6931472, %v7526_v12  ;;  %5217 = vmatprep.subr.bf16.mxu1 %v8868_v20  ;;  %6719 = vmatprep.subr.bf16.mxu0 %v9152_v10 }
0x1a91   :  { %v703_v48 = vcombine.high %v701_v57, %v701_v57  ;;  %v710_v2 = vrot.slane %v701_v57, %v8992_v26  ;;  %v2052_v54 = vadd.f32 %v2051_v37, %v8395_v56 }
0x1a92   :  { %v7528_v15 = vpop.eup %7527  ;;  %5218 = vmatpush1.bf16.msra.mxu1 %v8871_v43  ;;  %6720 = vmatpush3.bf16.msra.mxu0 %v7433_v19 }
0x1a93   :  { %v717_v50 = vrot.slane %v703_v48, %v8992_v26  ;;  %v718_v53 = vcombine.high %v710_v2, %v710_v2  ;;  %v726_v44 = vrot.slane %v710_v2, %v8992_v26  ;;  %5573 = vst.sshfl [vmem:[#allocation13] sm:$0x1 pattern:$0x73625140] %v710_v2  ;;  %v2053_v20 = vsub.f32 %v8392_v16, %v2052_v54 }
0x1a94   :  { %5219 = vmatprep.subr.bf16.mxu1 %v8875_v6  ;;  %v3403_v36 = vmul.f32 0.6931472, %v7528_v15  ;;  %6721 = vmatprep.subr.bf16.mxu0 %v9152_v10 }
0x1a95   :  { %v719_v38 = vcombine.high %v717_v50, %v717_v50  ;;  %v733_v56 = vrot.slane %v717_v50, %v8992_v26  ;;  %v740_v43 = vrot.slane %v718_v53, %v8992_v26  ;;  %v748_v21 = vcombine.high %v726_v44, %v726_v44  ;;  %5574 = vst.sshfl [vmem:[#allocation13 + $0x8] sm:$0x1 pattern:$0x73625140] %v718_v53 }
0x1a96   :  { %5575 = vst.sshfl [vmem:[#allocation13 + $0x20] sm:$0x1 pattern:$0x73625140] %v717_v50  ;;  %v7530_v35 = vpop.eup %7529  ;;  %v2055_v27 = vcombine.high %v2053_v20, %v2053_v20  ;;  %v2062_v11 = vrot.slane %v2053_v20, %v8992_v26  ;;  %v3404_v51 = vadd.f32 %v3403_v36, %v8679_v17  ;;  %5220 = vmatpush1.bf16.msra.mxu1 %v8878_v3 }
0x1a97   :  { %6722 = vmatpush3.bf16.msra.mxu0 %v7434_v52  ;;  %v747_v16 = vrot.slane %v719_v38, %v8992_v26  ;;  %v749_v6 = vcombine.high %v733_v56, %v733_v56  ;;  %v750_v60 = vcombine.high %v740_v43, %v740_v43  ;;  %762 = vst [vmem:[#allocation13 + $0x10] sm:$0x1] %v748_v21  ;;  %5576 = vst.sshfl [vmem:[#allocation13 + $0x28] sm:$0x1 pattern:$0x73625140] %v719_v38 }
0x1a98   :  { %v4755_v33 = vmul.f32 0.6931472, %v7530_v35  ;;  %5221 = vmatprep.subr.bf16.mxu1 %v8882_v8  ;;  %6723 = vmatprep.subr.bf16.mxu0 %v9152_v10  ;;  %v2069_v0 = vrot.slane %v2055_v27, %v8992_v26  ;;  %v2070_v40 = vcombine.high %v2062_v11, %v2062_v11  ;;  %v2078_v17 = vrot.slane %v2062_v11, %v8992_v26  ;;  %v7437_v43 = vld [vmem:[#allocation8] sm:$0xff]   ;;  %v7439_v21 = vld [vmem:[#allocation8 + $0x10] sm:$0xff]   ;;  %v7440_v35 = vld [vmem:[#allocation8 + $0x18] sm:$0xff]  }
0x1a99   :  { %5657 = vst.sshfl [vmem:[#allocation13 + $0x2] sm:$0x1 pattern:$0x73625140] %v2062_v11  ;;  %v3405_v3 = vsub.f32 %v8676_v18, %v3404_v51  ;;  %v751_v41 = vcombine.high %v747_v16, %v747_v16  ;;  %763 = vst [vmem:[#allocation13 + $0x18] sm:$0x1] %v750_v60 }
0x1a9a   :  { %766 = vst [vmem:[#allocation13 + $0x30] sm:$0x1] %v749_v6  ;;  %v4756_v45 = vadd.f32 %v4755_v33, %v8963_v22  ;;  %v2071_v23 = vcombine.high %v2069_v0, %v2069_v0  ;;  %v2085_v5 = vrot.slane %v2069_v0, %v8992_v26  ;;  %v2092_v8 = vrot.slane %v2070_v40, %v8992_v26  ;;  %v7436_v22 = vld [vmem:[#allocation5 + $0xb0] ss:$12 sps:$4 sm:$0xff]   ;;  %v7441_v27 = vld [vmem:[#allocation8 + $0x20] sm:$0xff]   ;;  %v7443_v51 = vld [vmem:[#allocation8 + $0x30] sm:$0xff]  }
0x1a9b   :  { %v2100_v46 = vcombine.high %v2078_v17, %v2078_v17  ;;  %5658 = vst.sshfl [vmem:[#allocation13 + $0xa] sm:$0x1 pattern:$0x73625140] %v2070_v40  ;;  %5222 = vmatpush1.bf16.msra.mxu1 %v8885_v62  ;;  %767 = vst [vmem:[#allocation13 + $0x38] sm:$0x1] %v751_v41  ;;  %v3407_v7 = vcombine.high %v3405_v3, %v3405_v3  ;;  %v3414_v29 = vrot.slane %v3405_v3, %v8992_v26 }
0x1a9c   :  { %5659 = vst.sshfl [vmem:[#allocation13 + $0x22] sm:$0x1 pattern:$0x73625140] %v2069_v0  ;;  %v4757_v18 = vsub.f32 %v8960_v9, %v4756_v45  ;;  %6724 = vmatpush3.bf16.msra.mxu0 %v7435_v47  ;;  %5223 = vmatprep.subr.bf16.mxu1 %v8889_v31  ;;  %v2099_v32 = vrot.slane %v2071_v23, %v8992_v26  ;;  %v7442_v11 = vld [vmem:[#allocation8 + $0x28] sm:$0xff]   ;;  %v7444_v16 = vld [vmem:[#allocation8 + $0x38] sm:$0xff]  }
0x1a9d   :  { %v2101_v28 = vcombine.high %v2085_v5, %v2085_v5  ;;  %v2102_v63 = vcombine.high %v2092_v8, %v2092_v8  ;;  %2114 = vst [vmem:[#allocation13 + $0x12] sm:$0x1] %v2100_v46  ;;  %5660 = vst.sshfl [vmem:[#allocation13 + $0x2a] sm:$0x1 pattern:$0x73625140] %v2071_v23  ;;  %6725 = vmatprep.subr.bf16.mxu0 %v9152_v10  ;;  %v3421_v62 = vrot.slane %v3407_v7, %v8992_v26 }
0x1a9e   :  { %v3422_v34 = vcombine.high %v3414_v29, %v3414_v29  ;;  %v3430_v13 = vrot.slane %v3414_v29, %v8992_v26  ;;  %5741 = vst.sshfl [vmem:[#allocation13 + $0x4] sm:$0x1 pattern:$0x73625140] %v3414_v29  ;;  %v4759_v42 = vcombine.high %v4757_v18, %v4757_v18  ;;  %v2103_v9 = vcombine.high %v2099_v32, %v2099_v32  ;;  %v5064_v0 = vld [vmem:[#allocation7] sm:$0x7] }
0x1a9f   :  { %2115 = vst [vmem:[#allocation13 + $0x1a] sm:$0x1] %v2102_v63  ;;  %2118 = vst [vmem:[#allocation13 + $0x32] sm:$0x1] %v2101_v28  ;;  %v4766_v31 = vrot.slane %v4757_v18, %v8992_v26  ;;  %5224 = vmatpush1.bf16.msra.mxu1 %v8892_v24  ;;  %v3423_v30 = vcombine.high %v3421_v62, %v3421_v62  ;;  %v3437_v55 = vrot.slane %v3421_v62, %v8992_v26 }
0x1aa0   :  { %v3444_v12 = vrot.slane %v3422_v34, %v8992_v26  ;;  %v3452_v19 = vcombine.high %v3430_v13, %v3430_v13  ;;  %5742 = vst.sshfl [vmem:[#allocation13 + $0xc] sm:$0x1 pattern:$0x73625140] %v3422_v34  ;;  %6726 = vmatpush3.bf16.msra.mxu0 %v7436_v22  ;;  %2119 = vst [vmem:[#allocation13 + $0x3a] sm:$0x1] %v2103_v9  ;;  %v4773_v57 = vrot.slane %v4759_v42, %v8992_v26 }
0x1aa1   :  { %5743 = vst.sshfl [vmem:[#allocation13 + $0x24] sm:$0x1 pattern:$0x73625140] %v3421_v62  ;;  %v4774_v37 = vcombine.high %v4766_v31, %v4766_v31  ;;  %v4782_v48 = vrot.slane %v4766_v31, %v8992_v26  ;;  %6731 = vmatprep.subr.bf16.mxu1 %v9152_v10  ;;  %v3451_v24 = vrot.slane %v3423_v30, %v8992_v26 }
0x1aa2   :  { %5825 = vst.sshfl [vmem:[#allocation13 + $0x6] sm:$0x1 pattern:$0x73625140] %v4766_v31  ;;  %v3453_v2 = vcombine.high %v3437_v55, %v3437_v55  ;;  %v3454_v54 = vcombine.high %v3444_v12, %v3444_v12  ;;  %3466 = vst [vmem:[#allocation13 + $0x14] sm:$0x1] %v3452_v19  ;;  %5242 = vmatmul.mubr.bf16.vlgmr.msra.gmra.mrb[56].mxu1 %v8936_v1  ;;  %v4775_v15 = vcombine.high %v4773_v57, %v4773_v57 }
0x1aa3   :  { %5744 = vst.sshfl [vmem:[#allocation13 + $0x2c] sm:$0x1 pattern:$0x73625140] %v3423_v30  ;;  %v4789_v52 = vrot.slane %v4773_v57, %v8992_v26  ;;  %v4796_v50 = vrot.slane %v4774_v37, %v8992_v26  ;;  %v4804_v53 = vcombine.high %v4782_v48, %v4782_v48  ;;  %6728 = vmatmul.mubr.bf16.vlgmr.msra.gmra.mrb[60].mxu0 %v8936_v1  ;;  %v7438_v1 = vld [vmem:[#allocation8 + $0x8] sm:$0xff]  }
0x1aa4   :  { %5826 = vst.sshfl [vmem:[#allocation13 + $0xe] sm:$0x1 pattern:$0x73625140] %v4774_v37  ;;  %v3455_v44 = vcombine.high %v3451_v24, %v3451_v24  ;;  %3467 = vst [vmem:[#allocation13 + $0x1c] sm:$0x1] %v3454_v54  ;;  %6747 = vmatprep.mubr.msk.bf16.mxu1 %vm7759_vm0, %v9152_v10  ;;  %v4803_v20 = vrot.slane %v4775_v15, %v8992_v26  ;;  %6732 = vmatpush3.bf16.msra.mxu1 %v7437_v43 }
0x1aa5   :  { %5827 = vst.sshfl [vmem:[#allocation13 + $0x26] sm:$0x1 pattern:$0x73625140] %v4773_v57  ;;  %3470 = vst [vmem:[#allocation13 + $0x34] sm:$0x1] %v3453_v2  ;;  %v4805_v36 = vcombine.high %v4789_v52, %v4789_v52  ;;  %v4806_v38 = vcombine.high %v4796_v50, %v4796_v50  ;;  %6733 = vmatprep.subr.bf16.mxu1 %v9152_v10  ;;  %v5069_v40 = vrot.slane %v5064_v0, %v8068_v59 }
0x1aa6   :  { %4818 = vst [vmem:[#allocation13 + $0x16] sm:$0x1] %v4804_v53  ;;  %5828 = vst.sshfl [vmem:[#allocation13 + $0x2e] sm:$0x1 pattern:$0x73625140] %v4775_v15  ;;  %v4807_v56 = vcombine.high %v4803_v20, %v4803_v20  ;;  %v5073_v17 = vrot.slane %v5064_v0, %v8071_v61  ;;  %v5077_v62 = vrot.slane %v5064_v0, %v8076_v58 }
0x1aa7   :  { %3471 = vst [vmem:[#allocation13 + $0x3c] sm:$0x1] %v3455_v44  ;;  %4819 = vst [vmem:[#allocation13 + $0x1e] sm:$0x1] %v4806_v38  ;;  %v1369_v58 = vsub.f32 %v8172_v14, %v8175_v25  ;;  %v9154_v2 = vld [vmem:[#allocation22_spill] sm:$0xff]  ;;  %v9155_v52 = vld [vmem:[#allocation24_spill] sm:$0xff] }
0x1aa8   :  { %4822 = vst [vmem:[#allocation13 + $0x36] sm:$0x1] %v4805_v36  ;;  %4823 = vst [vmem:[#allocation13 + $0x3e] sm:$0x1] %v4807_v56  ;;  %6734 = vmatpush3.bf16.msra.mxu1 %v7438_v1  ;;  %v2721_v54 = vsub.f32 %v9154_v2, %v8459_v4  ;;  %v9156_v50 = vld [vmem:[#allocation23_spill] sm:$0xff] }
0x1aa9   :  { %6735 = vmatprep.subr.bf16.mxu1 %v9152_v10  ;;  %v1370_v24 = vmul.f32 1.442695, %v1369_v58  ;;  %v4073_v53 = vsub.f32 %v9156_v50, %v9155_v52 }
0x1aaa   :  { %v2722_v15 = vmul.f32 1.442695, %v2721_v54 }
0x1aab   :  { %v4074_v44 = vmul.f32 1.442695, %v4073_v53 }
0x1aac   :  { %6736 = vmatpush3.bf16.msra.mxu1 %v7439_v21 }
0x1aad   :  { %6737 = vmatprep.subr.bf16.mxu1 %v9152_v10 }
0x1ab0   :  { %6738 = vmatpush3.bf16.msra.mxu1 %v7440_v35 }
0x1ab1   :  { %6739 = vmatprep.subr.bf16.mxu1 %v9152_v10 }
0x1ab4   :  { %6740 = vmatpush3.bf16.msra.mxu1 %v7441_v27 }
0x1ab5   :  { %6741 = vmatprep.subr.bf16.mxu1 %v9152_v10 }
0x1ab8   :  { %6742 = vmatpush3.bf16.msra.mxu1 %v7442_v11 }
0x1ab9   :  { %6743 = vmatprep.subr.bf16.mxu1 %v9152_v10 }
0x1abc   :  { %6744 = vmatpush3.bf16.msra.mxu1 %v7443_v51 }
0x1abd   :  { %6745 = vmatprep.subr.bf16.mxu1 %v9152_v10 }
0x1ac0   :  { %6746 = vmatpush3.bf16.msra.mxu1 %v7444_v16 }
0x1b54   :  { %v4957_v6 = vpop.f32.mrb[50].mxu1  ;;  %v5028_v60 = vpop.f32.mrb[50].mxu0 }
0x1b55   :  { %v4959_v33 = vpop.f32.mrb[51].mxu1  ;;  %v6710_v47 = vpop.f32.mrb[51].mxu0 }
0x1b75   :  { %v5243_v3 = vpop.f32.mrb[56].mxu1 }
0x1b76   :  { %v5244_v41 = vadd.f32 %v5243_v3, %v5069_v40  ;;  %v5284_v45 = vpop.f32.mrb[60].mxu0  ;;  %v5245_v23 = vpop.f32.mrb[57].mxu1 }
0x1b77   :  { %v5246_v5 = vadd.f32 %v5245_v23, %v5073_v17  ;;  %v6729_v8 = vpop.f32.mrb[61].mxu0  ;;  %v5247_v46 = vpop.f32.mrb[58].mxu1  ;;  %v5285_v13 = vadd.f32 %v5284_v45, %v5077_v62 }
0x1b78   :  { %v5290_v7 = vadd.f32 %v5244_v41, %v4957_v6  ;;  %v5287_v29 = vpop.f32.mrb[62].mxu0  ;;  %v5248_v10 = vpop.f32.mrb[59].mxu1 }
0x1b79   :  { %v5297_v18 = vadd.f32 %v5246_v5, %v4959_v33  ;;  %v6730_v22 = vpop.f32.mrb[63].mxu0 }
0x1b7a   :  { %v5856_v32 = vmul.f32 -1.442695, %v5290_v7 }
0x1b7b   :  { %v5857_v28 = vmul.f32 -1.442695, %v5297_v18 }
0x1b7c   :  { %7531 = vpow2.f32 %v5856_v32 }
0x1b7d   :  { %7533 = vpow2.f32 %v5857_v28 }
0x1b86   :  { %v7532_v63 = vpop.eup %7531 }
0x1b87   :  { %v5294_v59 = vadd.f32 1.0, %v7532_v63  ;;  %v7534_v61 = vpop.eup %7533 }
0x1b88   :  { %v5301_v34 = vadd.f32 1.0, %v7534_v61 }
0x1b89   :  { %7535 = vrcp.f32 %v5294_v59 }
0x1b8a   :  { %7537 = vrcp.f32 %v5301_v34 }
0x1b93   :  { %v7536_v42 = vpop.eup %7535 }
0x1b94   :  { %v5304_v9 = vmul.f32 %v7536_v42, %v5285_v13  ;;  %v7538_v30 = vpop.eup %7537 }
0x1b95   :  { %v5307_v55 = vsub.f32 1.0, %v7538_v30  ;;  %v5309_v57 = vmul.f32 %v7538_v30, %v8932_v49 }
0x1b96   :  { %v5305_v31 = vadd.f32 %v5304_v9, %v5028_v60 }
0x1b98   :  { %7539 = vtanh.f32 %v5305_v31 }
0x1b99   :  { %7541 = vpow2.f32 %v1370_v24 }
0x1b9a   :  { %7543 = vpow2.f32 %v2722_v15 }
0x1b9b   :  { %7545 = vpow2.f32 %v4074_v44 }
0x1ba2   :  { %v7540_v12 = vpop.eup %7539 }
0x1ba3   :  { %v5308_v19 = vmul.f32 %v7540_v12, %v5307_v55  ;;  %v7542_v43 = vpop.eup %7541 }
0x1ba4   :  { %v7544_v1 = vpop.eup %7543 }
0x1ba5   :  { %v5310_v37 = vadd.f32 %v5309_v57, %v5308_v19  ;;  %v7546_v21 = vpop.eup %7545 }
0x1ba7   :  { %v5311_v48 = vpack.c.bf16 %v5310_v37, %v5310_v37  ;;  %5500 = vst [vmem:[#allocation14] sm:$0xff] %v5310_v37 }
0x1ba9   :  { %6748 = vmatmul.mubr.bf16.vlgmr.msra.gmra.mrb[60].mxu1 %v5311_v48 }
0x1c7c   :  { %v5417_v20 = vpop.f32.mrb[60].mxu1 }
0x1c7d   :  { %v9062_v49 = vadd.f32 %v8957_v39, %v5417_v20  ;;  %v6749_v36 = vpop.f32.mrb[61].mxu1 }
0x1c7e   :  { %v5420_v38 = vpop.f32.mrb[62].mxu1 }
0x1c7f   :  { %5423 = vmax.xlane.f32.xlu1 %v9062_v49  ;;  %v6750_v56 = vpop.f32.mrb[63].mxu1 }
0x1c83   :  { %1372 = vadd.xlane.f32.xlu1 %v7542_v43 }
0x1c87   :  { %2724 = vadd.xlane.f32.xlu1 %v7544_v1 }
0x1c8b   :  { %4076 = vadd.xlane.f32.xlu1 %v7546_v21 }
0x1d0c   :  { %v9065_v35 = vpop.xlane.xlu1 %5423 }
0x1d0d   :  { %v5425_v27 = vsub.f32 %v9062_v49, %v9065_v35 }
0x1d0f   :  { %v5426_v11 = vmul.f32 1.442695, %v5425_v27 }
0x1d10   :  { %v1373_v39 = vpop.xlane.xlu1 %1372 }
0x1d11   :  { %7547 = vpow2.f32 %v5426_v11 }
0x1d12   :  { %7549 = vlog2.f32 %v1373_v39 }
0x1d14   :  { %v2725_v51 = vpop.xlane.xlu1 %2724 }
0x1d15   :  { %7551 = vlog2.f32 %v2725_v51 }
0x1d18   :  { %v4077_v16 = vpop.xlane.xlu1 %4076 }
0x1d19   :  { %7553 = vlog2.f32 %v4077_v16 }
0x1d1b   :  { %v7548_v6 = vpop.eup %7547 }
0x1d1c   :  { %v7550_v60 = vpop.eup %7549  ;;  %5428 = vadd.xlane.f32.xlu1 %v7548_v6 }
0x1d1d   :  { %v1375_v33 = vmul.f32 0.6931472, %v7550_v60 }
0x1d1f   :  { %v7552_v47 = vpop.eup %7551  ;;  %v1376_v0 = vadd.f32 %v1375_v33, %v8175_v25 }
0x1d20   :  { %v2727_v40 = vmul.f32 0.6931472, %v7552_v47 }
0x1d21   :  { %v1377_v17 = vsub.f32 %v8172_v14, %v1376_v0 }
0x1d22   :  { %v2728_v3 = vadd.f32 %v2727_v40, %v8459_v4 }
0x1d23   :  { %v7554_v41 = vpop.eup %7553  ;;  %v1379_v45 = vcombine.high %v1377_v17, %v1377_v17  ;;  %v1386_v23 = vrot.slane %v1377_v17, %v8992_v26 }
0x1d24   :  { %v2729_v5 = vsub.f32 %v9154_v2, %v2728_v3  ;;  %v4079_v8 = vmul.f32 0.6931472, %v7554_v41 }
0x1d25   :  { %v1393_v46 = vrot.slane %v1379_v45, %v8992_v26  ;;  %v1394_v7 = vcombine.high %v1386_v23, %v1386_v23  ;;  %v1402_v29 = vrot.slane %v1386_v23, %v8992_v26  ;;  %5615 = vst.sshfl [vmem:[#allocation13 + $0x1] sm:$0x1 pattern:$0x73625140] %v1386_v23 }
0x1d26   :  { %v2731_v10 = vcombine.high %v2729_v5, %v2729_v5  ;;  %v2738_v25 = vrot.slane %v2729_v5, %v8992_v26  ;;  %v4080_v14 = vadd.f32 %v4079_v8, %v9155_v52 }
0x1d27   :  { %v1395_v18 = vcombine.high %v1393_v46, %v1393_v46  ;;  %v1409_v4 = vrot.slane %v1393_v46, %v8992_v26  ;;  %v1416_v22 = vrot.slane %v1394_v7, %v8992_v26  ;;  %v1424_v32 = vcombine.high %v1402_v29, %v1402_v29  ;;  %5616 = vst.sshfl [vmem:[#allocation13 + $0x9] sm:$0x1 pattern:$0x73625140] %v1394_v7 }
0x1d28   :  { %5617 = vst.sshfl [vmem:[#allocation13 + $0x21] sm:$0x1 pattern:$0x73625140] %v1393_v46  ;;  %v2745_v28 = vrot.slane %v2731_v10, %v8992_v26  ;;  %v2746_v63 = vcombine.high %v2738_v25, %v2738_v25  ;;  %v2754_v59 = vrot.slane %v2738_v25, %v8992_v26  ;;  %v4081_v61 = vsub.f32 %v9156_v50, %v4080_v14 }
0x1d29   :  { %5699 = vst.sshfl [vmem:[#allocation13 + $0x3] sm:$0x1 pattern:$0x73625140] %v2738_v25  ;;  %v1423_v62 = vrot.slane %v1395_v18, %v8992_v26  ;;  %v1425_v34 = vcombine.high %v1409_v4, %v1409_v4  ;;  %v1426_v13 = vcombine.high %v1416_v22, %v1416_v22  ;;  %1438 = vst [vmem:[#allocation13 + $0x11] sm:$0x1] %v1424_v32 }
0x1d2a   :  { %5618 = vst.sshfl [vmem:[#allocation13 + $0x29] sm:$0x1 pattern:$0x73625140] %v1395_v18  ;;  %v2747_v42 = vcombine.high %v2745_v28, %v2745_v28  ;;  %v2761_v9 = vrot.slane %v2745_v28, %v8992_v26  ;;  %v2768_v31 = vrot.slane %v2746_v63, %v8992_v26  ;;  %v2776_v30 = vcombine.high %v2754_v59, %v2754_v59 }
0x1d2b   :  { %5700 = vst.sshfl [vmem:[#allocation13 + $0xb] sm:$0x1 pattern:$0x73625140] %v2746_v63  ;;  %v1427_v55 = vcombine.high %v1423_v62, %v1423_v62  ;;  %1439 = vst [vmem:[#allocation13 + $0x19] sm:$0x1] %v1426_v13  ;;  %v4083_v12 = vcombine.high %v4081_v61, %v4081_v61  ;;  %v4090_v19 = vrot.slane %v4081_v61, %v8992_v26 }
0x1d2c   :  { %5701 = vst.sshfl [vmem:[#allocation13 + $0x23] sm:$0x1 pattern:$0x73625140] %v2745_v28  ;;  %1442 = vst [vmem:[#allocation13 + $0x31] sm:$0x1] %v1425_v34  ;;  %v2775_v57 = vrot.slane %v2747_v42, %v8992_v26  ;;  %v2777_v37 = vcombine.high %v2761_v9, %v2761_v9  ;;  %v2778_v48 = vcombine.high %v2768_v31, %v2768_v31 }
0x1d2d   :  { %2790 = vst [vmem:[#allocation13 + $0x13] sm:$0x1] %v2776_v30  ;;  %5702 = vst.sshfl [vmem:[#allocation13 + $0x2b] sm:$0x1 pattern:$0x73625140] %v2747_v42  ;;  %v4097_v58 = vrot.slane %v4083_v12, %v8992_v26  ;;  %v4098_v24 = vcombine.high %v4090_v19, %v4090_v19  ;;  %v4106_v2 = vrot.slane %v4090_v19, %v8992_v26 }
0x1d2e   :  { %1443 = vst [vmem:[#allocation13 + $0x39] sm:$0x1] %v1427_v55  ;;  %5783 = vst.sshfl [vmem:[#allocation13 + $0x5] sm:$0x1 pattern:$0x73625140] %v4090_v19  ;;  %v2779_v54 = vcombine.high %v2775_v57, %v2775_v57 }
0x1d2f   :  { %2791 = vst [vmem:[#allocation13 + $0x1b] sm:$0x1] %v2778_v48  ;;  %2794 = vst [vmem:[#allocation13 + $0x33] sm:$0x1] %v2777_v37  ;;  %v4099_v15 = vcombine.high %v4097_v58, %v4097_v58  ;;  %v4113_v52 = vrot.slane %v4097_v58, %v8992_v26  ;;  %v4120_v50 = vrot.slane %v4098_v24, %v8992_v26 }
0x1d30   :  { %v4128_v53 = vcombine.high %v4106_v2, %v4106_v2  ;;  %5784 = vst.sshfl [vmem:[#allocation13 + $0xd] sm:$0x1 pattern:$0x73625140] %v4098_v24  ;;  %2795 = vst [vmem:[#allocation13 + $0x3b] sm:$0x1] %v2779_v54 }
0x1d31   :  { %5785 = vst.sshfl [vmem:[#allocation13 + $0x25] sm:$0x1 pattern:$0x73625140] %v4097_v58  ;;  %v4127_v44 = vrot.slane %v4099_v15, %v8992_v26  ;;  %v4129_v20 = vcombine.high %v4113_v52, %v4113_v52  ;;  %v4130_v36 = vcombine.high %v4120_v50, %v4120_v50 }
0x1d32   :  { %4142 = vst [vmem:[#allocation13 + $0x15] sm:$0x1] %v4128_v53  ;;  %5786 = vst.sshfl [vmem:[#allocation13 + $0x2d] sm:$0x1 pattern:$0x73625140] %v4099_v15 }
0x1d33   :  { %v4131_v38 = vcombine.high %v4127_v44, %v4127_v44  ;;  %4143 = vst [vmem:[#allocation13 + $0x1d] sm:$0x1] %v4130_v36  ;;  %4146 = vst [vmem:[#allocation13 + $0x35] sm:$0x1] %v4129_v20 }
0x1d35   :  { %4147 = vst [vmem:[#allocation13 + $0x3d] sm:$0x1] %v4131_v38 }
0x1d36   :  { %7700 = shalt.err (!%p7697_p10)
}
0x1d37   :  { %s7701_s30 = scalar_lea.hbm %s9132_s7, 128 }
0x1d38   :  { %p7702_p11 = scmp.ne.s32.totalorder %s9132_s7, %s7701_s30  ;;  %p7705_p12 = scmp.lt.u32.totalorder %s7701_s30, %s9132_s7 }
0x1d3a   :  { %p7707_p13 = pnand %p7705_p12, %p7702_p11 }
0x1d3c   :  { %7710 = shalt.err (!%p7707_p13)
}
0x1d3d   :  { %5522 = dma.vmem_to_hbm [thread:$0]  %s5520_s27, 128, %s9132_s7, [#allocation15]  }
0x1d3e   :  { %s7764_s7 = smov [#allocation13]  }
0x1d3f   :  { %s5506_s14 = sshll.u32 %s7764_s7, 4  ;;  %s5507_s14 = int_to_ptr.vmem [resolvable:$true] %s5506_s14 }
0x1d40   :  { %s7711_s3 = scalar_lea.vmem %s5507_s14, 1024  ;;  %p7716_p1 = scmp.lt.s32.totalorder %s5507_s14, %s5507_s14 }
0x1d41   :  { %p7712_p0 = scmp.ne.s32.totalorder %s5507_s14, %s7711_s3  ;;  %p7717_p2 = scmp.lt.s32.totalorder %s7711_s3, %s7711_s3 }
0x1d43   :  { %p7718_p3 = por %p7717_p2, %p7716_p1 }
0x1d45   :  { %p7719_p4 = pnand %p7718_p3, %p7712_p0 }
0x1da9   :  { %v5429_v56 = vpop.xlane.xlu1 %5428 }
0x1daa   :  { %7555 = vlog2.f32 %v5429_v56 }
0x1db4   :  { %v7556_v43 = vpop.eup %7555 }
0x1db5   :  { %v5431_v1 = vmul.f32 0.6931472, %v7556_v43 }
0x1db7   :  { %v5432_v21 = vadd.f32 %v5431_v1, %v9065_v35 }
0x1db9   :  { %v5433_v27 = vsub.f32 %v9062_v49, %v5432_v21 }
0x1dbb   :  { %v5435_v11 = vcombine.high %v5433_v27, %v5433_v27  ;;  %v5442_v39 = vrot.slane %v5433_v27, %v8992_v26 }
0x1dbd   :  { %v5449_v51 = vrot.slane %v5435_v11, %v8992_v26  ;;  %v5450_v16 = vcombine.high %v5442_v39, %v5442_v39  ;;  %v5458_v6 = vrot.slane %v5442_v39, %v8992_v26  ;;  %5867 = vst.sshfl [vmem:[#allocation13 + $0x7] sm:$0x1 pattern:$0x73625140] %v5442_v39 }
0x1dbf   :  { %v5451_v60 = vcombine.high %v5449_v51, %v5449_v51  ;;  %v5465_v33 = vrot.slane %v5449_v51, %v8992_v26  ;;  %v5472_v47 = vrot.slane %v5450_v16, %v8992_v26  ;;  %v5480_v0 = vcombine.high %v5458_v6, %v5458_v6  ;;  %5868 = vst.sshfl [vmem:[#allocation13 + $0xf] sm:$0x1 pattern:$0x73625140] %v5450_v16 }
0x1dc0   :  { %5869 = vst.sshfl [vmem:[#allocation13 + $0x27] sm:$0x1 pattern:$0x73625140] %v5449_v51 }
0x1dc1   :  { %v5479_v49 = vrot.slane %v5451_v60, %v8992_v26  ;;  %v5481_v35 = vcombine.high %v5465_v33, %v5465_v33  ;;  %v5482_v40 = vcombine.high %v5472_v47, %v5472_v47  ;;  %5494 = vst [vmem:[#allocation13 + $0x17] sm:$0x1] %v5480_v0  ;;  %5870 = vst.sshfl [vmem:[#allocation13 + $0x2f] sm:$0x1 pattern:$0x73625140] %v5451_v60 }
0x1dc3   :  { %v5483_v17 = vcombine.high %v5479_v49, %v5479_v49  ;;  %5495 = vst [vmem:[#allocation13 + $0x1f] sm:$0x1] %v5482_v40  ;;  %5498 = vst [vmem:[#allocation13 + $0x37] sm:$0x1] %v5481_v35 }
0x1dc5   :  { %5499 = vst [vmem:[#allocation13 + $0x3f] sm:$0x1] %v5483_v17 }
0x1dc6   :  { %7722 = shalt.err (!%p7719_p4)
}
0x1dc7   :  { %s7723_s16 = scalar_lea.hbm %s9131_s6, 1024 }
0x1dc8   :  { %p7724_p5 = scmp.ne.s32.totalorder %s9131_s6, %s7723_s16  ;;  %p7727_p6 = scmp.lt.u32.totalorder %s7723_s16, %s9131_s6 }
0x1dca   :  { %p7729_p7 = pnand %p7727_p6, %p7724_p5 }
0x1dcc   :  { %7732 = shalt.err (!%p7729_p7)
}
0x1dcd   :  { %s7765_s22 = smov 128   ;;  %s7766_s23 = smov 8  }
0x1dce   :  { %5512 = dma.vmem_to_hbm [thread:$0]  %s5507_s14, 1024, %s9131_s6, [#allocation4], %s7765_s22, %s7765_s22, %s7766_s23  }
0x1dcf   :  { %7741 = dma.done.wait [#allocation4], 1024  }
0x1dd0   :  { %7742 = vsyncadd [#allocation4], 4294966272 }
0x1dd1   :  { %7743 = dma.done.wait [#allocation15], 128  }
0x1dd2   :  { %7744 = vsyncadd [#allocation15], 4294967168 }
0x1dd3   :  { %5529 = vsyncpa [#allocation3], 1 }
0x1dd4   :  { %5530 = vsyncpa [#allocation6], 1 }
0x1dd5   :  { %5531 = vsyncpa [#allocation9], 1 }
0x1dd6   :  { %5532 = vsyncpa [#allocation12], 1 }
0x1dd7   :  { %5533 = vsyncpa [#allocation4], 1 }
0x1dd8   :  { %5534 = vsyncpa [#allocation15], 1 }

</bundles_post_ra>
